<compile_context>
chip_gen: v7x
topology: tpu7x:2x2x1
jax: 0.10.0
libtpu: 0.0.40
codegen_flags: <defaults>
</compile_context>

<pallas_src>
import math

import numpy as np
import jax
import jax.numpy as jnp
from jax import lax
from jax.experimental import pallas as pl
from jax.experimental.pallas import tpu as pltpu

_SQRT2 = math.sqrt(2.0)
_SMEM = pltpu.MemorySpace.SMEM
_IMG = 28 * 28            # flattened input pixels
_LAB = 16                 # label features padded 10 -> 16

# ---------------- packed-parameter layout (shared by init_params & kernel) ----------
# bf16 weight slab (rows x 128): name -> (row_start, rows_in_slot, cols).
# Row starts are multiples of 16 (bf16 sublane tile); unused cols/rows are zero.
_WB_ROWS = 832
_WB = {
    "fc2":   (0,   256, 128),
    "fc3":   (256, 128, 64),
    "wi_w1": (384, 64,  128),
    "wi_w2": (448, 128, 128),
    "wt_w1": (576, 64,  128),
    "wt_w2": (640, 128, 128),
    "l1":    (768, 16,  16),   # real rows = 10, zero-padded to 16
    "l2":    (784, 16,  32),
    "l3":    (800, 32,  64),
}
# f32 bias / LayerNorm slab (1 x _VEC_LEN): name -> (lane_start, length).
# Lane starts are multiples of 128.
_VEC = {
    "cb1": (0, 784), "cb2": (896, 392),
    "fc1_b": (1408, 256), "fc2_b": (1664, 128), "fc3_b": (1792, 64),
    "l1_b": (1920, 16), "l2_b": (2048, 32), "l3_b": (2176, 64),
    "wi_b1": (2304, 128), "wi_b2": (2432, 128), "wi_g": (2560, 128), "wi_be": (2688, 128),
    "wt_b1": (2816, 128), "wt_b2": (2944, 128), "wt_g": (3072, 128), "wt_be": (3200, 128),
}
_VEC_LEN = 3328


# ----------------------------- in-kernel helpers -----------------------------------

def _silu(y):                       # nn.SiLU
    return y * jax.nn.sigmoid(y)


def _gelu(y):                       # nn.GELU default = exact erf GELU
    return 0.5 * y * (1.0 + jax.lax.erf(y / _SQRT2))


def _bdot(x, w):
    """MXU dot: bf16 operands, f32 accumulation."""
    return jnp.dot(x.astype(jnp.bfloat16), w, preferred_element_type=jnp.float32)


def _proj_head(x, w1, b1, w2, b2, g, beta):
    proj = _bdot(x, w1) + b1
    h = _gelu(proj)
    h = _bdot(h, w2) + b2
    # nn.Dropout() is identity at inference time.
    h = h + proj
    mu = jnp.mean(h, axis=-1, keepdims=True)
    var = jnp.mean(jnp.square(h - mu), axis=-1, keepdims=True)
    return (h - mu) * jax.lax.rsqrt(var + 1e-5) * g + beta


# ----------------------------- fused Pallas kernel ----------------------------------

def _basic_clip_kernel(scal_ref,          # SMEM (1,4): [temperature, s1, s2, 0]
                       x_ref,             # (TM, 784) bf16   image-row tile
                       lab_ref,           # (B_pad, 16) bf16 full (padded) label batch
                       t1_ref, t2_ref,    # int8 Toeplitz (784,784), (784,392)
                       fc1_ref,           # bf16 (392, 256)
                       wb_ref,            # bf16 (_WB_ROWS, 128) packed weight slab
                       vec_ref,           # f32  (1, _VEC_LEN) packed bias/LN slab
                       o_ref):            # f32  (TM, B_pad) logits tile

    def vvec(name):
        off, n = _VEC[name]
        return vec_ref[:, off:off + n]            # (1, n) f32, broadcasts over rows

    def wseg(name):
        r0, nr, nc = _WB[name]
        return wb_ref[r0:r0 + nr, 0:nc]           # bf16 weight segment

    temp = scal_ref[0, 0]
    s1 = scal_ref[0, 1]
    s2 = scal_ref[0, 2]

    # ---- DigitEncoder: convs lowered to int8-stored Toeplitz matmuls, dequant in VMEM
    x = x_ref[...]                                                         # bf16 (TM,784)
    t1 = t1_ref[...].astype(jnp.bfloat16)
    a1 = _silu(jnp.dot(x, t1, preferred_element_type=jnp.float32) * s1 + vvec("cb1"))
    t2 = t2_ref[...].astype(jnp.bfloat16)
    a2 = _silu(jnp.dot(a1.astype(jnp.bfloat16), t2,
                       preferred_element_type=jnp.float32) * s2 + vvec("cb2"))
    h = _silu(_bdot(a2, fc1_ref[...]) + vvec("fc1_b"))                     # (TM,256)
    h = _silu(_bdot(h, wseg("fc2")) + vvec("fc2_b"))                       # (TM,128)
    i_f = _bdot(h, wseg("fc3")) + vvec("fc3_b")                            # (TM,64)

    # ---- LabelEncoder on the whole (padded) batch: cheap, recomputed per grid step
    lab = lab_ref[...]
    t = _gelu(jnp.dot(lab, wseg("l1"), preferred_element_type=jnp.float32) + vvec("l1_b"))
    t = _gelu(_bdot(t, wseg("l2")) + vvec("l2_b"))
    t_f = _bdot(t, wseg("l3")) + vvec("l3_b")                              # (B_pad,64)

    # ---- Projection heads
    i_e = _proj_head(i_f, wseg("wi_w1"), vvec("wi_b1"), wseg("wi_w2"), vvec("wi_b2"),
                     vvec("wi_g"), vvec("wi_be"))                          # (TM,128)
    t_e = _proj_head(t_f, wseg("wt_w1"), vvec("wt_b1"), wseg("wt_w2"), vvec("wt_b2"),
                     vvec("wt_g"), vvec("wt_be"))                          # (B_pad,128)

    # ---- F.normalize(p=2, dim=1, eps=1e-12) + scaled similarity
    i_ss = jnp.sum(i_e * i_e, axis=-1, keepdims=True)
    t_ss = jnp.sum(t_e * t_e, axis=-1, keepdims=True)
    # rsqrt(max(ss, eps^2)) == 1 / max(||x||, eps); temperature folded into image scale.
    i_n = (i_e * (temp * jax.lax.rsqrt(jnp.maximum(i_ss, 1e-24)))).astype(jnp.bfloat16)
    t_n = (t_e * jax.lax.rsqrt(jnp.maximum(t_ss, 1e-24))).astype(jnp.bfloat16)
    o_ref[...] = jax.lax.dot_general(i_n, t_n, (((1,), (1,)), ((), ())),
                                     preferred_element_type=jnp.float32)


# ----------------------------- wrapper ----------------------------------------------

def _round_up(n, m):
    return ((n + m - 1) // m) * m


def basic_clip_forward(params, imgs, labels):
    B = imgs.shape[0]
    TM = 128 if B >= 128 else _round_up(B, 16)
    B_pad = _round_up(B, TM)

    x = imgs.reshape(B, _IMG).astype(jnp.bfloat16)     # C=1 -> (C,H,W) flatten == (H,W)
    x = jnp.pad(x, ((0, B_pad - B), (0, 0)))
    lab = jnp.pad(labels.astype(jnp.bfloat16),
                  ((0, B_pad - B), (0, _LAB - labels.shape[1])))

    grid = (B_pad // TM,)
    in_specs = [
        pl.BlockSpec(memory_space=_SMEM),                       # scalars
        pl.BlockSpec((TM, _IMG), lambda i: (i, 0)),             # image rows (tiled)
        pl.BlockSpec((B_pad, _LAB), lambda i: (0, 0)),          # labels (resident)
        pl.BlockSpec((_IMG, 784), lambda i: (0, 0)),            # T1 int8 (resident)
        pl.BlockSpec((_IMG, 392), lambda i: (0, 0)),            # T2 int8 (resident)
        pl.BlockSpec((392, 256), lambda i: (0, 0)),             # fc1     (resident)
        pl.BlockSpec((_WB_ROWS, 128), lambda i: (0, 0)),        # weight slab
        pl.BlockSpec((1, _VEC_LEN), lambda i: (0, 0)),          # bias/LN slab
    ]
    out = pl.pallas_call(
        _basic_clip_kernel,
        out_shape=jax.ShapeDtypeStruct((B_pad, B_pad), jnp.float32),
        grid=grid,
        in_specs=in_specs,
        out_specs=pl.BlockSpec((TM, B_pad), lambda i: (i, 0)),
        compiler_params=pltpu.CompilerParams(dimension_semantics=("parallel",)),
    )(params["scal"], x, lab, params["t1"], params["t2"],
      params["fc1"], params["wB"], params["vec"])
    return out[:B, :B]


# ----------------------------- parameters -------------------------------------------

def _init_linear_np(key, fan_in, fan_out):
    kw, kb = jax.random.split(key)
    bound = 1.0 / math.sqrt(fan_in)
    w = jax.random.uniform(kw, (fan_in, fan_out), jnp.float32, -bound, bound)
    b = jax.random.uniform(kb, (fan_out,), jnp.float32, -bound, bound)
    return np.asarray(w), np.asarray(b)


def _init_conv_np(key, out_c, in_c, k):
    kw, kb = jax.random.split(key)
    fan_in = in_c * k * k
    bound = 1.0 / math.sqrt(fan_in)
    w = jax.random.uniform(kw, (out_c, in_c, k, k), jnp.float32, -bound, bound)
    b = jax.random.uniform(kb, (out_c,), jnp.float32, -bound, bound)
    return np.asarray(w), np.asarray(b)


def _init_head_np(key):
    k1, k2 = jax.random.split(key)
    w1, b1 = _init_linear_np(k1, 64, 128)
    w2, b2 = _init_linear_np(k2, 128, 128)
    return dict(w1=w1, b1=b1, w2=w2, b2=b2,
                g=np.ones((128,), np.float32), be=np.zeros((128,), np.float32))


def _conv_as_matrix_np(w, b, H, W, stride=2, pad=1):
    """Conv2d(w, b, stride, pad) on a (C,H,W)-flattened input as a dense
    (C*H*W, O*Ho*Wo) f32 matrix + (1, O*Ho*Wo) bias, PyTorch (C,H,W) flatten order."""
    O, C, kh, kw = w.shape
    Ho = (H + 2 * pad - kh) // stride + 1
    Wo = (W + 2 * pad - kw) // stride + 1
    T = np.zeros((C * H * W, O * Ho * Wo), np.float32)
    for o in range(O):
        for ho in range(Ho):
            for wo in range(Wo):
                col = (o * Ho + ho) * Wo + wo
                for ci in range(C):
                    for di in range(kh):
                        for dj in range(kw):
                            hi = stride * ho + di - pad
                            wi = stride * wo + dj - pad
                            if 0 <= hi < H and 0 <= wi < W:
                                T[(ci * H + hi) * W + wi, col] = w[o, ci, di, dj]
    bias = np.repeat(b, Ho * Wo).reshape(1, O * Ho * Wo).astype(np.float32)
    return T, bias


def _quantize_int8(T):
    amax = float(np.max(np.abs(T)))
    scale = amax / 127.0 if amax > 0.0 else 1.0
    q = np.clip(np.rint(T / scale), -127, 127).astype(np.int8)
    return q, np.float32(scale)


def init_params(key):
    ks = jax.random.split(key, 10)

    c1_w, c1_b = _init_conv_np(ks[0], 4, 1, 3)
    c2_w, c2_b = _init_conv_np(ks[1], 8, 4, 3)
    T1, cb1 = _conv_as_matrix_np(c1_w, c1_b, 28, 28)     # (784, 784), (1, 784)
    T2, cb2 = _conv_as_matrix_np(c2_w, c2_b, 14, 14)     # (784, 392), (1, 392)
    t1_q, s1 = _quantize_int8(T1)
    t2_q, s2 = _quantize_int8(T2)

    fc1_w, fc1_b = _init_linear_np(ks[2], 392, 256)
    fc2_w, fc2_b = _init_linear_np(ks[3], 256, 128)
    fc3_w, fc3_b = _init_linear_np(ks[4], 128, 64)
    l1_w, l1_b = _init_linear_np(ks[5], 10, 16)
    l2_w, l2_b = _init_linear_np(ks[6], 16, 32)
    l3_w, l3_b = _init_linear_np(ks[7], 32, 64)
    wi = _init_head_np(ks[8])
    wt = _init_head_np(ks[9])

    # ---- bf16 weight slab ----
    wB = np.zeros((_WB_ROWS, 128), np.float32)

    def put(name, arr):
        r0, _, _ = _WB[name]
        rr, cc = arr.shape
        wB[r0:r0 + rr, 0:cc] = arr

    put("fc2", fc2_w); put("fc3", fc3_w)
    put("wi_w1", wi["w1"]); put("wi_w2", wi["w2"])
    put("wt_w1", wt["w1"]); put("wt_w2", wt["w2"])
    put("l1", l1_w); put("l2", l2_w); put("l3", l3_w)

    # ---- f32 bias / LayerNorm slab ----
    vec = np.zeros((1, _VEC_LEN), np.float32)

    def putv(name, arr):
        off, _ = _VEC[name]
        flat = np.asarray(arr, np.float32).reshape(-1)
        vec[0, off:off + flat.size] = flat

    putv("cb1", cb1); putv("cb2", cb2)
    putv("fc1_b", fc1_b); putv("fc2_b", fc2_b); putv("fc3_b", fc3_b)
    putv("l1_b", l1_b); putv("l2_b", l2_b); putv("l3_b", l3_b)
    putv("wi_b1", wi["b1"]); putv("wi_b2", wi["b2"]); putv("wi_g", wi["g"]); putv("wi_be", wi["be"])
    putv("wt_b1", wt["b1"]); putv("wt_b2", wt["b2"]); putv("wt_g", wt["g"]); putv("wt_be", wt["be"])

    return {
        # Reference multiplies logits by self.temperature == log(1/0.07) directly (no .exp()).
        "scal": jnp.array([[math.log(1.0 / 0.07), float(s1), float(s2), 0.0]], jnp.float32),
        "t1": jnp.asarray(t1_q),                                  # int8
        "t2": jnp.asarray(t2_q),                                  # int8
        "fc1": jnp.asarray(fc1_w).astype(jnp.bfloat16),
        "wB": jnp.asarray(wB).astype(jnp.bfloat16),
        "vec": jnp.asarray(vec),                                  # f32
    }


# ----------------------------- main --------------------------------------------------

if __name__ == "__main__":
    key = jax.random.PRNGKey(0)
    k_img, k_lab, k_par = jax.random.split(key, 3)
    B = 4
    # 28x28 is forced by Linear(392, 256) after the two stride-2 convs.
    imgs = jax.random.normal(k_img, (B, 1, 28, 28), jnp.float32)          # NCHW
    labels = jax.nn.one_hot(jax.random.randint(k_lab, (B,), 0, 10), 10).astype(jnp.float32)
    params = init_params(k_par)

    logits = jax.jit(basic_clip_forward)(params, imgs, labels)
    logits = jax.block_until_ready(logits)
    assert logits.shape == (B, B) and logits.dtype == jnp.float32
    assert bool(jnp.all(jnp.isfinite(logits)))
    print("KERNEL_OK")
</pallas_src>

<mosaic_0001>
module attributes {stable_mosaic.version = 11 : i64} {
  func.func @_basic_clip_kernel(%arg0: i32, %arg1: memref<1x4xf32, #tpu.memory_space<smem>>, %arg2: memref<16x784xbf16, #tpu.memory_space<vmem>>, %arg3: memref<16x16xbf16, #tpu.memory_space<vmem>>, %arg4: memref<784x784xi8, #tpu.memory_space<vmem>>, %arg5: memref<784x392xi8, #tpu.memory_space<vmem>>, %arg6: memref<392x256xbf16, #tpu.memory_space<vmem>>, %arg7: memref<832x128xbf16, #tpu.memory_space<vmem>>, %arg8: memref<1x3328xf32, #tpu.memory_space<vmem>>, %arg9: memref<16x16xf32, #tpu.memory_space<vmem>>) attributes {dimension_semantics = [#tpu.dimension_semantics<parallel>], iteration_bounds = array<i64: 1>, scalar_prefetch = 0 : i64, scratch_operands = 0 : i64, tpu.core_type = #tpu.core_type<tc>, window_params = [{transform_indices = @transform_0, window_bounds = array<i64: 1, 4>}, {transform_indices = @transform_1, window_bounds = array<i64: 16, 784>}, {pipeline_mode = #tpu.pipeline_mode<synchronous>, transform_indices = @transform_2, window_bounds = array<i64: 16, 16>}, {pipeline_mode = #tpu.pipeline_mode<synchronous>, transform_indices = @transform_3, window_bounds = array<i64: 784, 784>}, {pipeline_mode = #tpu.pipeline_mode<synchronous>, transform_indices = @transform_4, window_bounds = array<i64: 784, 392>}, {pipeline_mode = #tpu.pipeline_mode<synchronous>, transform_indices = @transform_5, window_bounds = array<i64: 392, 256>}, {pipeline_mode = #tpu.pipeline_mode<synchronous>, transform_indices = @transform_6, window_bounds = array<i64: 832, 128>}, {pipeline_mode = #tpu.pipeline_mode<synchronous>, transform_indices = @transform_7, window_bounds = array<i64: 1, 3328>}, {transform_indices = @transform_8, window_bounds = array<i64: 16, 16>}]} {
    %c0 = arith.constant 0 : index
    %c0_0 = arith.constant 0 : index
    %0 = memref.load %arg1[%c0, %c0_0] : memref<1x4xf32, #tpu.memory_space<smem>>
    %c0_1 = arith.constant 0 : index
    %c1 = arith.constant 1 : index
    %1 = memref.load %arg1[%c0_1, %c1] : memref<1x4xf32, #tpu.memory_space<smem>>
    %c0_2 = arith.constant 0 : index
    %c2 = arith.constant 2 : index
    %2 = memref.load %arg1[%c0_2, %c2] : memref<1x4xf32, #tpu.memory_space<smem>>
    %c0_3 = arith.constant 0 : index
    %c0_4 = arith.constant 0 : index
    %3 = vector.load %arg2[%c0_3, %c0_4] : memref<16x784xbf16, #tpu.memory_space<vmem>>, vector<16x784xbf16>
    %c0_5 = arith.constant 0 : index
    %c0_6 = arith.constant 0 : index
    %4 = vector.load %arg4[%c0_5, %c0_6] : memref<784x784xi8, #tpu.memory_space<vmem>>, vector<784x784xi8>
    %5 = arith.sitofp %4 : vector<784x784xi8> to vector<784x784xbf16>
    %cst = arith.constant dense<0.000000e+00> : vector<16x784xf32>
    %6 = tpu.matmul %3, %5, %cst {dimension_numbers = #tpu.dot_dimension_numbers<[1], [0], [0], [1], [0, 0, 1, 1], [], []>} : vector<16x784xbf16>, vector<784x784xbf16>, vector<16x784xf32> -> vector<16x784xf32>
    %7 = vector.broadcast %1 : f32 to vector<16x784xf32>
    %8 = arith.mulf %6, %7 : vector<16x784xf32>
    %c0_7 = arith.constant 0 : index
    %c0_8 = arith.constant 0 : index
    %9 = vector.load %arg8[%c0_7, %c0_8] : memref<1x3328xf32, #tpu.memory_space<vmem>>, vector<1x784xf32>
    %10 = vector.broadcast %9 : vector<1x784xf32> to vector<16x784xf32>
    %11 = arith.addf %8, %10 : vector<16x784xf32>
    %12 = arith.negf %11 : vector<16x784xf32>
    %13 = math.exp %12 : vector<16x784xf32>
    %cst_9 = arith.constant 1.000000e+00 : f32
    %14 = vector.broadcast %cst_9 : f32 to vector<16x784xf32>
    %15 = arith.addf %14, %13 : vector<16x784xf32>
    %16 = arith.divf %14, %15 : vector<16x784xf32>
    %17 = arith.mulf %11, %16 : vector<16x784xf32>
    %c0_10 = arith.constant 0 : index
    %c0_11 = arith.constant 0 : index
    %18 = vector.load %arg5[%c0_10, %c0_11] : memref<784x392xi8, #tpu.memory_space<vmem>>, vector<784x392xi8>
    %19 = arith.sitofp %18 : vector<784x392xi8> to vector<784x392xbf16>
    %20 = arith.truncf %17 : vector<16x784xf32> to vector<16x784xbf16>
    %cst_12 = arith.constant dense<0.000000e+00> : vector<16x392xf32>
    %21 = tpu.matmul %20, %19, %cst_12 {dimension_numbers = #tpu.dot_dimension_numbers<[1], [0], [0], [1], [0, 0, 1, 1], [], []>} : vector<16x784xbf16>, vector<784x392xbf16>, vector<16x392xf32> -> vector<16x392xf32>
    %22 = vector.broadcast %2 : f32 to vector<16x392xf32>
    %23 = arith.mulf %21, %22 : vector<16x392xf32>
    %c0_13 = arith.constant 0 : index
    %c896 = arith.constant 896 : index
    %24 = vector.load %arg8[%c0_13, %c896] : memref<1x3328xf32, #tpu.memory_space<vmem>>, vector<1x392xf32>
    %25 = vector.broadcast %24 : vector<1x392xf32> to vector<16x392xf32>
    %26 = arith.addf %23, %25 : vector<16x392xf32>
    %27 = arith.negf %26 : vector<16x392xf32>
    %28 = math.exp %27 : vector<16x392xf32>
    %cst_14 = arith.constant 1.000000e+00 : f32
    %29 = vector.broadcast %cst_14 : f32 to vector<16x392xf32>
    %30 = arith.addf %29, %28 : vector<16x392xf32>
    %31 = arith.divf %29, %30 : vector<16x392xf32>
    %32 = arith.mulf %26, %31 : vector<16x392xf32>
    %c0_15 = arith.constant 0 : index
    %c0_16 = arith.constant 0 : index
    %33 = vector.load %arg6[%c0_15, %c0_16] : memref<392x256xbf16, #tpu.memory_space<vmem>>, vector<392x256xbf16>
    %34 = arith.truncf %32 : vector<16x392xf32> to vector<16x392xbf16>
    %cst_17 = arith.constant dense<0.000000e+00> : vector<16x256xf32>
    %35 = tpu.matmul %34, %33, %cst_17 {dimension_numbers = #tpu.dot_dimension_numbers<[1], [0], [0], [1], [0, 0, 1, 1], [], []>} : vector<16x392xbf16>, vector<392x256xbf16>, vector<16x256xf32> -> vector<16x256xf32>
    %c0_18 = arith.constant 0 : index
    %c1408 = arith.constant 1408 : index
    %36 = vector.load %arg8[%c0_18, %c1408] : memref<1x3328xf32, #tpu.memory_space<vmem>>, vector<1x256xf32>
    %37 = vector.broadcast %36 : vector<1x256xf32> to vector<16x256xf32>
    %38 = arith.addf %35, %37 : vector<16x256xf32>
    %39 = arith.negf %38 : vector<16x256xf32>
    %40 = math.exp %39 : vector<16x256xf32>
    %cst_19 = arith.constant 1.000000e+00 : f32
    %41 = vector.broadcast %cst_19 : f32 to vector<16x256xf32>
    %42 = arith.addf %41, %40 : vector<16x256xf32>
    %43 = arith.divf %41, %42 : vector<16x256xf32>
    %44 = arith.mulf %38, %43 : vector<16x256xf32>
    %c0_20 = arith.constant 0 : index
    %c0_21 = arith.constant 0 : index
    %45 = vector.load %arg7[%c0_20, %c0_21] : memref<832x128xbf16, #tpu.memory_space<vmem>>, vector<256x128xbf16>
    %46 = arith.truncf %44 : vector<16x256xf32> to vector<16x256xbf16>
    %cst_22 = arith.constant dense<0.000000e+00> : vector<16x128xf32>
    %47 = tpu.matmul %46, %45, %cst_22 {dimension_numbers = #tpu.dot_dimension_numbers<[1], [0], [0], [1], [0, 0, 1, 1], [], []>} : vector<16x256xbf16>, vector<256x128xbf16>, vector<16x128xf32> -> vector<16x128xf32>
    %c0_23 = arith.constant 0 : index
    %c1664 = arith.constant 1664 : index
    %48 = vector.load %arg8[%c0_23, %c1664] : memref<1x3328xf32, #tpu.memory_space<vmem>>, vector<1x128xf32>
    %49 = vector.broadcast %48 : vector<1x128xf32> to vector<16x128xf32>
    %50 = arith.addf %47, %49 : vector<16x128xf32>
    %51 = arith.negf %50 : vector<16x128xf32>
    %52 = math.exp %51 : vector<16x128xf32>
    %cst_24 = arith.constant 1.000000e+00 : f32
    %53 = vector.broadcast %cst_24 : f32 to vector<16x128xf32>
    %54 = arith.addf %53, %52 : vector<16x128xf32>
    %55 = arith.divf %53, %54 : vector<16x128xf32>
    %56 = arith.mulf %50, %55 : vector<16x128xf32>
    %c256 = arith.constant 256 : index
    %c0_25 = arith.constant 0 : index
    %57 = vector.load %arg7[%c256, %c0_25] : memref<832x128xbf16, #tpu.memory_space<vmem>>, vector<128x64xbf16>
    %58 = arith.truncf %56 : vector<16x128xf32> to vector<16x128xbf16>
    %cst_26 = arith.constant dense<0.000000e+00> : vector<16x64xf32>
    %59 = tpu.matmul %58, %57, %cst_26 {dimension_numbers = #tpu.dot_dimension_numbers<[1], [0], [0], [1], [0, 0, 1, 1], [], []>} : vector<16x128xbf16>, vector<128x64xbf16>, vector<16x64xf32> -> vector<16x64xf32>
    %c0_27 = arith.constant 0 : index
    %c1792 = arith.constant 1792 : index
    %60 = vector.load %arg8[%c0_27, %c1792] : memref<1x3328xf32, #tpu.memory_space<vmem>>, vector<1x64xf32>
    %61 = vector.broadcast %60 : vector<1x64xf32> to vector<16x64xf32>
    %62 = arith.addf %59, %61 : vector<16x64xf32>
    %c0_28 = arith.constant 0 : index
    %c0_29 = arith.constant 0 : index
    %63 = vector.load %arg3[%c0_28, %c0_29] : memref<16x16xbf16, #tpu.memory_space<vmem>>, vector<16x16xbf16>
    %c768 = arith.constant 768 : index
    %c0_30 = arith.constant 0 : index
    %64 = vector.load %arg7[%c768, %c0_30] : memref<832x128xbf16, #tpu.memory_space<vmem>>, vector<16x16xbf16>
    %cst_31 = arith.constant dense<0.000000e+00> : vector<16x16xf32>
    %65 = tpu.matmul %63, %64, %cst_31 {dimension_numbers = #tpu.dot_dimension_numbers<[1], [0], [0], [1], [0, 0, 1, 1], [], []>} : vector<16x16xbf16>, vector<16x16xbf16>, vector<16x16xf32> -> vector<16x16xf32>
    %c0_32 = arith.constant 0 : index
    %c1920 = arith.constant 1920 : index
    %66 = vector.load %arg8[%c0_32, %c1920] : memref<1x3328xf32, #tpu.memory_space<vmem>>, vector<1x16xf32>
    %67 = vector.broadcast %66 : vector<1x16xf32> to vector<16x16xf32>
    %68 = arith.addf %65, %67 : vector<16x16xf32>
    %cst_33 = arith.constant 5.000000e-01 : f32
    %69 = vector.broadcast %cst_33 : f32 to vector<16x16xf32>
    %70 = arith.mulf %69, %68 : vector<16x16xf32>
    %cst_34 = arith.constant 1.41421354 : f32
    %71 = vector.broadcast %cst_34 : f32 to vector<16x16xf32>
    %72 = arith.divf %68, %71 : vector<16x16xf32>
    %73 = math.erf %72 : vector<16x16xf32>
    %cst_35 = arith.constant 1.000000e+00 : f32
    %74 = vector.broadcast %cst_35 : f32 to vector<16x16xf32>
    %75 = arith.addf %74, %73 : vector<16x16xf32>
    %76 = arith.mulf %70, %75 : vector<16x16xf32>
    %c784 = arith.constant 784 : index
    %c0_36 = arith.constant 0 : index
    %77 = vector.load %arg7[%c784, %c0_36] : memref<832x128xbf16, #tpu.memory_space<vmem>>, vector<16x32xbf16>
    %78 = arith.truncf %76 : vector<16x16xf32> to vector<16x16xbf16>
    %cst_37 = arith.constant dense<0.000000e+00> : vector<16x32xf32>
    %79 = tpu.matmul %78, %77, %cst_37 {dimension_numbers = #tpu.dot_dimension_numbers<[1], [0], [0], [1], [0, 0, 1, 1], [], []>} : vector<16x16xbf16>, vector<16x32xbf16>, vector<16x32xf32> -> vector<16x32xf32>
    %c0_38 = arith.constant 0 : index
    %c2048 = arith.constant 2048 : index
    %80 = vector.load %arg8[%c0_38, %c2048] : memref<1x3328xf32, #tpu.memory_space<vmem>>, vector<1x32xf32>
    %81 = vector.broadcast %80 : vector<1x32xf32> to vector<16x32xf32>
    %82 = arith.addf %79, %81 : vector<16x32xf32>
    %cst_39 = arith.constant 5.000000e-01 : f32
    %83 = vector.broadcast %cst_39 : f32 to vector<16x32xf32>
    %84 = arith.mulf %83, %82 : vector<16x32xf32>
    %cst_40 = arith.constant 1.41421354 : f32
    %85 = vector.broadcast %cst_40 : f32 to vector<16x32xf32>
    %86 = arith.divf %82, %85 : vector<16x32xf32>
    %87 = math.erf %86 : vector<16x32xf32>
    %cst_41 = arith.constant 1.000000e+00 : f32
    %88 = vector.broadcast %cst_41 : f32 to vector<16x32xf32>
    %89 = arith.addf %88, %87 : vector<16x32xf32>
    %90 = arith.mulf %84, %89 : vector<16x32xf32>
    %c800 = arith.constant 800 : index
    %c0_42 = arith.constant 0 : index
    %91 = vector.load %arg7[%c800, %c0_42] : memref<832x128xbf16, #tpu.memory_space<vmem>>, vector<32x64xbf16>
    %92 = arith.truncf %90 : vector<16x32xf32> to vector<16x32xbf16>
    %cst_43 = arith.constant dense<0.000000e+00> : vector<16x64xf32>
    %93 = tpu.matmul %92, %91, %cst_43 {dimension_numbers = #tpu.dot_dimension_numbers<[1], [0], [0], [1], [0, 0, 1, 1], [], []>} : vector<16x32xbf16>, vector<32x64xbf16>, vector<16x64xf32> -> vector<16x64xf32>
    %c0_44 = arith.constant 0 : index
    %c2176 = arith.constant 2176 : index
    %94 = vector.load %arg8[%c0_44, %c2176] : memref<1x3328xf32, #tpu.memory_space<vmem>>, vector<1x64xf32>
    %95 = vector.broadcast %94 : vector<1x64xf32> to vector<16x64xf32>
    %96 = arith.addf %93, %95 : vector<16x64xf32>
    %c384 = arith.constant 384 : index
    %c0_45 = arith.constant 0 : index
    %97 = vector.load %arg7[%c384, %c0_45] : memref<832x128xbf16, #tpu.memory_space<vmem>>, vector<64x128xbf16>
    %c0_46 = arith.constant 0 : index
    %c2304 = arith.constant 2304 : index
    %98 = vector.load %arg8[%c0_46, %c2304] : memref<1x3328xf32, #tpu.memory_space<vmem>>, vector<1x128xf32>
    %c448 = arith.constant 448 : index
    %c0_47 = arith.constant 0 : index
    %99 = vector.load %arg7[%c448, %c0_47] : memref<832x128xbf16, #tpu.memory_space<vmem>>, vector<128x128xbf16>
    %c0_48 = arith.constant 0 : index
    %c2432 = arith.constant 2432 : index
    %100 = vector.load %arg8[%c0_48, %c2432] : memref<1x3328xf32, #tpu.memory_space<vmem>>, vector<1x128xf32>
    %c0_49 = arith.constant 0 : index
    %c2560 = arith.constant 2560 : index
    %101 = vector.load %arg8[%c0_49, %c2560] : memref<1x3328xf32, #tpu.memory_space<vmem>>, vector<1x128xf32>
    %c0_50 = arith.constant 0 : index
    %c2688 = arith.constant 2688 : index
    %102 = vector.load %arg8[%c0_50, %c2688] : memref<1x3328xf32, #tpu.memory_space<vmem>>, vector<1x128xf32>
    %103 = arith.truncf %62 : vector<16x64xf32> to vector<16x64xbf16>
    %cst_51 = arith.constant dense<0.000000e+00> : vector<16x128xf32>
    %104 = tpu.matmul %103, %97, %cst_51 {dimension_numbers = #tpu.dot_dimension_numbers<[1], [0], [0], [1], [0, 0, 1, 1], [], []>} : vector<16x64xbf16>, vector<64x128xbf16>, vector<16x128xf32> -> vector<16x128xf32>
    %105 = vector.broadcast %98 : vector<1x128xf32> to vector<16x128xf32>
    %106 = arith.addf %104, %105 : vector<16x128xf32>
    %cst_52 = arith.constant 5.000000e-01 : f32
    %107 = vector.broadcast %cst_52 : f32 to vector<16x128xf32>
    %108 = arith.mulf %107, %106 : vector<16x128xf32>
    %cst_53 = arith.constant 1.41421354 : f32
    %109 = vector.broadcast %cst_53 : f32 to vector<16x128xf32>
    %110 = arith.divf %106, %109 : vector<16x128xf32>
    %111 = math.erf %110 : vector<16x128xf32>
    %cst_54 = arith.constant 1.000000e+00 : f32
    %112 = vector.broadcast %cst_54 : f32 to vector<16x128xf32>
    %113 = arith.addf %112, %111 : vector<16x128xf32>
    %114 = arith.mulf %108, %113 : vector<16x128xf32>
    %115 = arith.truncf %114 : vector<16x128xf32> to vector<16x128xbf16>
    %cst_55 = arith.constant dense<0.000000e+00> : vector<16x128xf32>
    %116 = tpu.matmul %115, %99, %cst_55 {dimension_numbers = #tpu.dot_dimension_numbers<[1], [0], [0], [1], [0, 0, 1, 1], [], []>} : vector<16x128xbf16>, vector<128x128xbf16>, vector<16x128xf32> -> vector<16x128xf32>
    %117 = vector.broadcast %100 : vector<1x128xf32> to vector<16x128xf32>
    %118 = arith.addf %116, %117 : vector<16x128xf32>
    %119 = arith.addf %118, %106 : vector<16x128xf32>
    %cst_56 = arith.constant dense<0.000000e+00> : vector<16xf32>
    %120 = vector.multi_reduction <add>, %119, %cst_56 [1] : vector<16x128xf32> to vector<16xf32>
    %121 = vector.shape_cast %120 : vector<16xf32> to vector<16x1xf32>
    %cst_57 = arith.constant 1.280000e+02 : f32
    %122 = vector.broadcast %cst_57 : f32 to vector<16x1xf32>
    %123 = arith.divf %121, %122 : vector<16x1xf32>
    %124 = vector.broadcast %123 : vector<16x1xf32> to vector<16x128xf32>
    %125 = arith.subf %119, %124 : vector<16x128xf32>
    %126 = arith.mulf %125, %125 : vector<16x128xf32>
    %cst_58 = arith.constant dense<0.000000e+00> : vector<16xf32>
    %127 = vector.multi_reduction <add>, %126, %cst_58 [1] : vector<16x128xf32> to vector<16xf32>
    %128 = vector.shape_cast %127 : vector<16xf32> to vector<16x1xf32>
    %cst_59 = arith.constant 1.280000e+02 : f32
    %129 = vector.broadcast %cst_59 : f32 to vector<16x1xf32>
    %130 = arith.divf %128, %129 : vector<16x1xf32>
    %131 = vector.broadcast %123 : vector<16x1xf32> to vector<16x128xf32>
    %132 = arith.subf %119, %131 : vector<16x128xf32>
    %cst_60 = arith.constant 9.99999974E-6 : f32
    %133 = vector.broadcast %cst_60 : f32 to vector<16x1xf32>
    %134 = arith.addf %130, %133 : vector<16x1xf32>
    %135 = math.rsqrt %134 : vector<16x1xf32>
    %136 = vector.broadcast %135 : vector<16x1xf32> to vector<16x128xf32>
    %137 = arith.mulf %132, %136 : vector<16x128xf32>
    %138 = vector.broadcast %101 : vector<1x128xf32> to vector<16x128xf32>
    %139 = arith.mulf %137, %138 : vector<16x128xf32>
    %140 = vector.broadcast %102 : vector<1x128xf32> to vector<16x128xf32>
    %141 = arith.addf %139, %140 : vector<16x128xf32>
    %c576 = arith.constant 576 : index
    %c0_61 = arith.constant 0 : index
    %142 = vector.load %arg7[%c576, %c0_61] : memref<832x128xbf16, #tpu.memory_space<vmem>>, vector<64x128xbf16>
    %c0_62 = arith.constant 0 : index
    %c2816 = arith.constant 2816 : index
    %143 = vector.load %arg8[%c0_62, %c2816] : memref<1x3328xf32, #tpu.memory_space<vmem>>, vector<1x128xf32>
    %c640 = arith.constant 640 : index
    %c0_63 = arith.constant 0 : index
    %144 = vector.load %arg7[%c640, %c0_63] : memref<832x128xbf16, #tpu.memory_space<vmem>>, vector<128x128xbf16>
    %c0_64 = arith.constant 0 : index
    %c2944 = arith.constant 2944 : index
    %145 = vector.load %arg8[%c0_64, %c2944] : memref<1x3328xf32, #tpu.memory_space<vmem>>, vector<1x128xf32>
    %c0_65 = arith.constant 0 : index
    %c3072 = arith.constant 3072 : index
    %146 = vector.load %arg8[%c0_65, %c3072] : memref<1x3328xf32, #tpu.memory_space<vmem>>, vector<1x128xf32>
    %c0_66 = arith.constant 0 : index
    %c3200 = arith.constant 3200 : index
    %147 = vector.load %arg8[%c0_66, %c3200] : memref<1x3328xf32, #tpu.memory_space<vmem>>, vector<1x128xf32>
    %148 = arith.truncf %96 : vector<16x64xf32> to vector<16x64xbf16>
    %cst_67 = arith.constant dense<0.000000e+00> : vector<16x128xf32>
    %149 = tpu.matmul %148, %142, %cst_67 {dimension_numbers = #tpu.dot_dimension_numbers<[1], [0], [0], [1], [0, 0, 1, 1], [], []>} : vector<16x64xbf16>, vector<64x128xbf16>, vector<16x128xf32> -> vector<16x128xf32>
    %150 = vector.broadcast %143 : vector<1x128xf32> to vector<16x128xf32>
    %151 = arith.addf %149, %150 : vector<16x128xf32>
    %cst_68 = arith.constant 5.000000e-01 : f32
    %152 = vector.broadcast %cst_68 : f32 to vector<16x128xf32>
    %153 = arith.mulf %152, %151 : vector<16x128xf32>
    %cst_69 = arith.constant 1.41421354 : f32
    %154 = vector.broadcast %cst_69 : f32 to vector<16x128xf32>
    %155 = arith.divf %151, %154 : vector<16x128xf32>
    %156 = math.erf %155 : vector<16x128xf32>
    %cst_70 = arith.constant 1.000000e+00 : f32
    %157 = vector.broadcast %cst_70 : f32 to vector<16x128xf32>
    %158 = arith.addf %157, %156 : vector<16x128xf32>
    %159 = arith.mulf %153, %158 : vector<16x128xf32>
    %160 = arith.truncf %159 : vector<16x128xf32> to vector<16x128xbf16>
    %cst_71 = arith.constant dense<0.000000e+00> : vector<16x128xf32>
    %161 = tpu.matmul %160, %144, %cst_71 {dimension_numbers = #tpu.dot_dimension_numbers<[1], [0], [0], [1], [0, 0, 1, 1], [], []>} : vector<16x128xbf16>, vector<128x128xbf16>, vector<16x128xf32> -> vector<16x128xf32>
    %162 = vector.broadcast %145 : vector<1x128xf32> to vector<16x128xf32>
    %163 = arith.addf %161, %162 : vector<16x128xf32>
    %164 = arith.addf %163, %151 : vector<16x128xf32>
    %cst_72 = arith.constant dense<0.000000e+00> : vector<16xf32>
    %165 = vector.multi_reduction <add>, %164, %cst_72 [1] : vector<16x128xf32> to vector<16xf32>
    %166 = vector.shape_cast %165 : vector<16xf32> to vector<16x1xf32>
    %cst_73 = arith.constant 1.280000e+02 : f32
    %167 = vector.broadcast %cst_73 : f32 to vector<16x1xf32>
    %168 = arith.divf %166, %167 : vector<16x1xf32>
    %169 = vector.broadcast %168 : vector<16x1xf32> to vector<16x128xf32>
    %170 = arith.subf %164, %169 : vector<16x128xf32>
    %171 = arith.mulf %170, %170 : vector<16x128xf32>
    %cst_74 = arith.constant dense<0.000000e+00> : vector<16xf32>
    %172 = vector.multi_reduction <add>, %171, %cst_74 [1] : vector<16x128xf32> to vector<16xf32>
    %173 = vector.shape_cast %172 : vector<16xf32> to vector<16x1xf32>
    %cst_75 = arith.constant 1.280000e+02 : f32
    %174 = vector.broadcast %cst_75 : f32 to vector<16x1xf32>
    %175 = arith.divf %173, %174 : vector<16x1xf32>
    %176 = vector.broadcast %168 : vector<16x1xf32> to vector<16x128xf32>
    %177 = arith.subf %164, %176 : vector<16x128xf32>
    %cst_76 = arith.constant 9.99999974E-6 : f32
    %178 = vector.broadcast %cst_76 : f32 to vector<16x1xf32>
    %179 = arith.addf %175, %178 : vector<16x1xf32>
    %180 = math.rsqrt %179 : vector<16x1xf32>
    %181 = vector.broadcast %180 : vector<16x1xf32> to vector<16x128xf32>
    %182 = arith.mulf %177, %181 : vector<16x128xf32>
    %183 = vector.broadcast %146 : vector<1x128xf32> to vector<16x128xf32>
    %184 = arith.mulf %182, %183 : vector<16x128xf32>
    %185 = vector.broadcast %147 : vector<1x128xf32> to vector<16x128xf32>
    %186 = arith.addf %184, %185 : vector<16x128xf32>
    %187 = arith.mulf %141, %141 : vector<16x128xf32>
    %cst_77 = arith.constant dense<0.000000e+00> : vector<16xf32>
    %188 = vector.multi_reduction <add>, %187, %cst_77 [1] : vector<16x128xf32> to vector<16xf32>
    %189 = vector.shape_cast %188 : vector<16xf32> to vector<16x1xf32>
    %190 = arith.mulf %186, %186 : vector<16x128xf32>
    %cst_78 = arith.constant dense<0.000000e+00> : vector<16xf32>
    %191 = vector.multi_reduction <add>, %190, %cst_78 [1] : vector<16x128xf32> to vector<16xf32>
    %192 = vector.shape_cast %191 : vector<16xf32> to vector<16x1xf32>
    %cst_79 = arith.constant 1.000000e-24 : f32
    %193 = vector.broadcast %cst_79 : f32 to vector<16x1xf32>
    %194 = arith.maximumf %189, %193 : vector<16x1xf32>
    %195 = math.rsqrt %194 : vector<16x1xf32>
    %196 = vector.broadcast %0 : f32 to vector<16x1xf32>
    %197 = arith.mulf %196, %195 : vector<16x1xf32>
    %198 = vector.broadcast %197 : vector<16x1xf32> to vector<16x128xf32>
    %199 = arith.mulf %141, %198 : vector<16x128xf32>
    %200 = arith.truncf %199 : vector<16x128xf32> to vector<16x128xbf16>
    %cst_80 = arith.constant 1.000000e-24 : f32
    %201 = vector.broadcast %cst_80 : f32 to vector<16x1xf32>
    %202 = arith.maximumf %192, %201 : vector<16x1xf32>
    %203 = math.rsqrt %202 : vector<16x1xf32>
    %204 = vector.broadcast %203 : vector<16x1xf32> to vector<16x128xf32>
    %205 = arith.mulf %186, %204 : vector<16x128xf32>
    %206 = arith.truncf %205 : vector<16x128xf32> to vector<16x128xbf16>
    %cst_81 = arith.constant dense<0.000000e+00> : vector<16x16xf32>
    %207 = tpu.matmul %200, %206, %cst_81 {dimension_numbers = #tpu.dot_dimension_numbers<[1], [1], [0], [0], [0, 0, 1, 0], [], []>} : vector<16x128xbf16>, vector<16x128xbf16>, vector<16x16xf32> -> vector<16x16xf32>
    %c0_82 = arith.constant 0 : index
    %c0_83 = arith.constant 0 : index
    %208 = vector.load %arg9[%c0_82, %c0_83] : memref<16x16xf32, #tpu.memory_space<vmem>>, vector<16x16xf32>
    tpu.vector_store %arg9[%c0_82, %c0_83], %207 {strides = array<i32>} : memref<16x16xf32, #tpu.memory_space<vmem>>, vector<16x16xf32>,
    return
  }
  func.func @transform_0(%arg0: i32) -> (i32, i32) {
    %c0_i32 = arith.constant 0 : i32
    %c0_i32_0 = arith.constant 0 : i32
    %c0_i32_1 = arith.constant 0 : i32
    return %c0_i32, %c0_i32_0 : i32, i32
  }
  func.func @transform_1(%arg0: i32) -> (i32, i32) {
    %c0_i32 = arith.constant 0 : i32
    %c0_i32_0 = arith.constant 0 : i32
    return %arg0, %c0_i32 : i32, i32
  }
  func.func @transform_2(%arg0: i32) -> (i32, i32) {
    %c0_i32 = arith.constant 0 : i32
    %c0_i32_0 = arith.constant 0 : i32
    %c0_i32_1 = arith.constant 0 : i32
    return %c0_i32, %c0_i32_0 : i32, i32
  }
  func.func @transform_3(%arg0: i32) -> (i32, i32) {
    %c0_i32 = arith.constant 0 : i32
    %c0_i32_0 = arith.constant 0 : i32
    %c0_i32_1 = arith.constant 0 : i32
    return %c0_i32, %c0_i32_0 : i32, i32
  }
  func.func @transform_4(%arg0: i32) -> (i32, i32) {
    %c0_i32 = arith.constant 0 : i32
    %c0_i32_0 = arith.constant 0 : i32
    %c0_i32_1 = arith.constant 0 : i32
    return %c0_i32, %c0_i32_0 : i32, i32
  }
  func.func @transform_5(%arg0: i32) -> (i32, i32) {
    %c0_i32 = arith.constant 0 : i32
    %c0_i32_0 = arith.constant 0 : i32
    %c0_i32_1 = arith.constant 0 : i32
    return %c0_i32, %c0_i32_0 : i32, i32
  }
  func.func @transform_6(%arg0: i32) -> (i32, i32) {
    %c0_i32 = arith.constant 0 : i32
    %c0_i32_0 = arith.constant 0 : i32
    %c0_i32_1 = arith.constant 0 : i32
    return %c0_i32, %c0_i32_0 : i32, i32
  }
  func.func @transform_7(%arg0: i32) -> (i32, i32) {
    %c0_i32 = arith.constant 0 : i32
    %c0_i32_0 = arith.constant 0 : i32
    %c0_i32_1 = arith.constant 0 : i32
    return %c0_i32, %c0_i32_0 : i32, i32
  }
  func.func @transform_8(%arg0: i32) -> (i32, i32) {
    %c0_i32 = arith.constant 0 : i32
    %c0_i32_0 = arith.constant 0 : i32
    return %arg0, %c0_i32 : i32, i32
  }
}

</mosaic_0001>

<bundles_post_ra>
// kernel: basic_clip_forward.1
= control target key start
LH: loop header
LB: loop body
LE: loop exit
PB: predicated region body
PF: predicated region fallthrough
CT: control target
= control target key end

     0   :  { %13 = vsyncpa [#allocation4], 0  ;;  %s10253_s0 = inlined_call_operand.vmem [shape: f32[1,4], index: 0, kind: input, shape index: {}]   ;;  %s10254_s1 = inlined_call_operand.vmem [shape: bf16[16,784], index: 1, kind: input, shape index: {}]   ;;  %s10255_s2 = inlined_call_operand.vmem [shape: bf16[16,16], index: 2, kind: input, shape index: {}]   ;;  %s10256_s3 = inlined_call_operand.vmem [shape: s8[784,784], index: 3, kind: input, shape index: {}]   ;;  %s10257_s4 = inlined_call_operand.vmem [shape: s8[784,392], index: 4, kind: input, shape index: {}]   ;;  %s10258_s5 = inlined_call_operand.hbm [shape: bf16[392,256], index: 5, kind: input, shape index: {}]   ;;  %s10259_s6 = inlined_call_operand.vmem [shape: bf16[832,128], index: 6, kind: input, shape index: {}]   ;;  %s10260_s7 = inlined_call_operand.vmem [shape: f32[1,3328], index: 7, kind: input, shape index: {}]   ;;  %s10261_s8 = inlined_call_operand.vmem [shape: f32[16,16], index: 8, kind: output, shape index: {}]  }
   0x1   :  { %s21_s29 = sshll.u32 %s10253_s0, 4  ;;  %s22_s29 = int_to_ptr.vmem [resolvable:$true] %s21_s29 }
   0x2   :  { %14 = vsyncpa [#allocation3], 0  ;;  %s7881_s30 = scalar_lea.vmem %s22_s29, 16  ;;  %p7886_p1 = scmp.lt.s32.totalorder %s22_s29, %s22_s29 }
   0x3   :  { %p7882_p0 = scmp.ne.s32.totalorder %s22_s29, %s7881_s30  ;;  %p7887_p2 = scmp.lt.s32.totalorder %s7881_s30, %s7881_s30 }
   0x5   :  { %p7888_p3 = por %p7887_p2, %p7886_p1 }
   0x7   :  { %p7889_p4 = pnand %p7888_p3, %p7882_p0 }
   0x9   :  { %7892 = shalt.err (!%p7889_p4)
}
   0xa   :  { %s7919_s9 = smov [#allocation2]   ;;  %s7920_s10 = smov [#allocation5]  }
   0xb   :  { %24 = dma.vmem_to_smem %s22_s29, 16, %s7919_s9, [#allocation4]  }
   0xc   :  { %s38_s11 = sshll.u32 %s7920_s10, 4  ;;  %s7893_s14 = scalar_lea.hbm %s10258_s5, 6272  ;;  %s39_s11 = int_to_ptr.vmem [resolvable:$true] %s38_s11 }
   0xd   :  { %p7894_p5 = scmp.ne.s32.totalorder %s10258_s5, %s7893_s14  ;;  %p7897_p6 = scmp.lt.u32.totalorder %s7893_s14, %s10258_s5 }
   0xf   :  { %p7899_p7 = pnand %p7897_p6, %p7894_p5 }
  0x11   :  { %7902 = shalt.err (!%p7899_p7)
}
  0x12   :  { %s7903_s18 = scalar_lea.vmem %s39_s11, 6272  ;;  %p7908_p9 = scmp.lt.s32.totalorder %s39_s11, %s39_s11 }
  0x13   :  { %p7904_p8 = scmp.ne.s32.totalorder %s39_s11, %s7903_s18  ;;  %p7909_p10 = scmp.lt.s32.totalorder %s7903_s18, %s7903_s18 }
  0x15   :  { %p7910_p11 = por %p7909_p10, %p7908_p9 }
  0x17   :  { %p7911_p12 = pnand %p7910_p11, %p7904_p8 }
  0x19   :  { %7914 = shalt.err (!%p7911_p12)
}
  0x1a   :  { %s7921_s19 = smov 128   ;;  %s7922_s20 = smov 8  }
  0x1b   :  { %44 = dma.hbm_to_vmem [thread:$0]  %s10258_s5, 6272, %s39_s11, [#allocation3], %s7921_s19, %s7921_s19, %s7922_s20  }
  0x1c   :  { %7915 = dma.done.wait [#allocation4], 16  }
  0x1d   :  { %7916 = vsyncadd [#allocation4], 4294967280 }
  0x1e   :  { %7917 = dma.done.wait [#allocation3], 6272  }
  0x1f   :  { %7918 = vsyncadd [#allocation3], 4294961024 }
  0x20   :  { %55 = sfence }
  0x21   :  { %v68_v0 = vld [vmem:[%s10256_s3] sm:$0xff]  ;;  %v70_v1 = vld [vmem:[%s10256_s3 + $0xe] sm:$0xff]  ;;  %v76_v12 = vld [vmem:[%s10256_s3 + $0x38] sm:$0xff]  ;;  %vm2455_vm0 = vcmask 130048   ;;  %vm7925_vm1 = vmmov 0   ;;  %s6560_s26 = sld [smem:[#allocation2 + $0x1]] }
  0x22   :  { %v72_v2 = vld [vmem:[%s10256_s3 + $0x1c] sm:$0xff]  ;;  %v264_v3 = vunpack.c.l.s8.bf16 %v68_v0  ;;  %v268_v4 = vunpack.c.l.s8.bf16 %v70_v1  ;;  %v265_v5 = vunpack.c.h.s8.bf16 %v68_v0  ;;  %v269_v6 = vunpack.c.h.s8.bf16 %v70_v1  ;;  %v74_v7 = vld [vmem:[%s10256_s3 + $0x2a] sm:$0xff]  ;;  %v80_v18 = vld [vmem:[%s10256_s3 + $0x54] sm:$0xff]  ;;  %s6561_s29 = sld [smem:[#allocation2 + $0x2]] }
  0x23   :  { %v272_v8 = vunpack.c.l.s8.bf16 %v72_v2  ;;  %v276_v9 = vunpack.c.l.s8.bf16 %v74_v7  ;;  %v273_v10 = vunpack.c.h.s8.bf16 %v72_v2  ;;  %v277_v11 = vunpack.c.h.s8.bf16 %v74_v7  ;;  %v78_v13 = vld [vmem:[%s10256_s3 + $0x46] sm:$0xff]  ;;  %v84_v34 = vld [vmem:[%s10256_s3 + $0x70] sm:$0xff]  ;;  %v86_v35 = vld [vmem:[%s10256_s3 + $0x7e] sm:$0xff] }
  0x24   :  { %v6570_v14 = vcombine.high %v264_v3, %v268_v4  ;;  %v6569_v15 = vcombine.low %v264_v3, %v268_v4  ;;  %v6572_v16 = vcombine.high %v265_v5, %v269_v6  ;;  %v6571_v17 = vcombine.low %v265_v5, %v269_v6  ;;  %v82_v19 = vld [vmem:[%s10256_s3 + $0x62] sm:$0xff]  ;;  %v88_v40 = vld [vmem:[%s10256_s3 + $0x8c] sm:$0xff]  ;;  %v90_v45 = vld [vmem:[%s10256_s3 + $0x9a] sm:$0xff] }
  0x25   :  { %v6577_v20 = vcombine.high %v272_v8, %v276_v9  ;;  %v6579_v21 = vcombine.high %v273_v10, %v277_v11  ;;  %v280_v22 = vunpack.c.l.s8.bf16 %v76_v12  ;;  %v284_v23 = vunpack.c.l.s8.bf16 %v78_v13  ;;  %v7592_v46 = vld [vmem:[%s10254_s1 + $0x4] ss:$28 sps:$4 sm:$0xff]   ;;  %v92_v55 = vld [vmem:[%s10256_s3 + $0xa8] sm:$0xff]  ;;  %v94_v56 = vld [vmem:[%s10256_s3 + $0xb6] sm:$0xff] }
  0x26   :  { %2459 = vmatprep.subr.bf16.mxu0 %v6570_v14  ;;  %2631 = vmatprep.subr.bf16.mxu1 %v6572_v16  ;;  %v281_v24 = vunpack.c.h.s8.bf16 %v76_v12  ;;  %v285_v25 = vunpack.c.h.s8.bf16 %v78_v13  ;;  %v6576_v26 = vcombine.low %v272_v8, %v276_v9  ;;  %v6578_v27 = vcombine.low %v273_v10, %v277_v11  ;;  %v96_v1 = vld [vmem:[%s10256_s3 + $0xc4] sm:$0xff]  ;;  %v98_v2 = vld [vmem:[%s10256_s3 + $0xd2] sm:$0xff] }
  0x27   :  { %2460 = vmatpush1.bf16.msra.mxu0 %v6569_v15  ;;  %2632 = vmatpush1.bf16.msra.mxu1 %v6571_v17  ;;  %v288_v28 = vunpack.c.l.s8.bf16 %v80_v18  ;;  %v292_v29 = vunpack.c.l.s8.bf16 %v82_v19  ;;  %v6584_v30 = vcombine.high %v280_v22, %v284_v23  ;;  %v289_v32 = vunpack.c.h.s8.bf16 %v80_v18  ;;  %v100_v11 = vld [vmem:[%s10256_s3 + $0xe0] sm:$0xff]  ;;  %v102_v12 = vld [vmem:[%s10256_s3 + $0xee] sm:$0xff] }
  0x28   :  { %2461 = vmatprep.subr.bf16.mxu0 %v6577_v20  ;;  %2633 = vmatprep.subr.bf16.mxu1 %v6579_v21  ;;  %v6586_v31 = vcombine.high %v281_v24, %v285_v25  ;;  %v293_v33 = vunpack.c.h.s8.bf16 %v82_v19  ;;  %v6583_v36 = vcombine.low %v280_v22, %v284_v23  ;;  %v6585_v37 = vcombine.low %v281_v24, %v285_v25  ;;  %v104_v21 = vld [vmem:[%s10256_s3 + $0xfc] sm:$0xff]  ;;  %v106_v22 = vld [vmem:[%s10256_s3 + $0x10a] sm:$0xff] }
  0x29   :  { %v6591_v38 = vcombine.high %v288_v28, %v292_v29  ;;  %v296_v39 = vunpack.c.l.s8.bf16 %v84_v34  ;;  %v300_v42 = vunpack.c.l.s8.bf16 %v86_v35  ;;  %v297_v43 = vunpack.c.h.s8.bf16 %v84_v34  ;;  %2491 = vmatprep.mubr.bf16.mxu0 %v7592_v46  ;;  %2663 = vmatprep.mubr.bf16.mxu1 %v7592_v46  ;;  %v108_v23 = vld [vmem:[%s10256_s3 + $0x118] sm:$0xff]  ;;  %v114_v34 = vld [vmem:[%s10256_s3 + $0x142] sm:$0xff] }
  0x2a   :  { %v6593_v41 = vcombine.high %v289_v32, %v293_v33  ;;  %v301_v44 = vunpack.c.h.s8.bf16 %v86_v35  ;;  %v6590_v47 = vcombine.low %v288_v28, %v292_v29  ;;  %v6592_v48 = vcombine.low %v289_v32, %v293_v33  ;;  %v110_v32 = vld [vmem:[%s10256_s3 + $0x126] sm:$0xff]  ;;  %v112_v33 = vld [vmem:[%s10256_s3 + $0x134] sm:$0xff] }
  0x2b   :  { %2462 = vmatpush1.bf16.msra.mxu0 %v6576_v26  ;;  %2634 = vmatpush1.bf16.msra.mxu1 %v6578_v27  ;;  %v304_v49 = vunpack.c.l.s8.bf16 %v88_v40  ;;  %v308_v50 = vunpack.c.l.s8.bf16 %v90_v45  ;;  %v6598_v51 = vcombine.high %v296_v39, %v300_v42  ;;  %v305_v53 = vunpack.c.h.s8.bf16 %v88_v40 }
  0x2c   :  { %2463 = vmatprep.subr.bf16.mxu0 %v6584_v30  ;;  %2635 = vmatprep.subr.bf16.mxu1 %v6586_v31  ;;  %v6600_v52 = vcombine.high %v297_v43, %v301_v44  ;;  %v309_v54 = vunpack.c.h.s8.bf16 %v90_v45  ;;  %v6597_v57 = vcombine.low %v296_v39, %v300_v42  ;;  %v6599_v58 = vcombine.low %v297_v43, %v301_v44  ;;  %v116_v43 = vld [vmem:[%s10256_s3 + $0x150] sm:$0xff] }
  0x2d   :  { %v6605_v59 = vcombine.high %v304_v49, %v308_v50  ;;  %v312_v60 = vunpack.c.l.s8.bf16 %v92_v55  ;;  %v316_v62 = vunpack.c.l.s8.bf16 %v94_v56  ;;  %v313_v63 = vunpack.c.h.s8.bf16 %v92_v55 }
  0x2e   :  { %v6607_v61 = vcombine.high %v305_v53, %v309_v54  ;;  %v317_v0 = vunpack.c.h.s8.bf16 %v94_v56  ;;  %v6604_v3 = vcombine.low %v304_v49, %v308_v50  ;;  %v6606_v4 = vcombine.low %v305_v53, %v309_v54  ;;  %v120_v53 = vld [vmem:[%s10256_s3 + $0x16c] sm:$0xff]  ;;  %v122_v54 = vld [vmem:[%s10256_s3 + $0x17a] sm:$0xff] }
  0x2f   :  { %2464 = vmatpush1.bf16.msra.mxu0 %v6583_v36  ;;  %2636 = vmatpush1.bf16.msra.mxu1 %v6585_v37  ;;  %v320_v5 = vunpack.c.l.s8.bf16 %v96_v1  ;;  %v324_v6 = vunpack.c.l.s8.bf16 %v98_v2  ;;  %v6612_v7 = vcombine.high %v312_v60, %v316_v62  ;;  %v321_v9 = vunpack.c.h.s8.bf16 %v96_v1 }
  0x30   :  { %2465 = vmatprep.subr.bf16.mxu0 %v6591_v38  ;;  %2637 = vmatprep.subr.bf16.mxu1 %v6593_v41  ;;  %v6614_v8 = vcombine.high %v313_v63, %v317_v0  ;;  %v325_v10 = vunpack.c.h.s8.bf16 %v98_v2  ;;  %v6611_v13 = vcombine.low %v312_v60, %v316_v62  ;;  %v6613_v14 = vcombine.low %v313_v63, %v317_v0  ;;  %v124_v63 = vld [vmem:[%s10256_s3 + $0x188] sm:$0xff] }
  0x31   :  { %v6619_v15 = vcombine.high %v320_v5, %v324_v6  ;;  %v328_v16 = vunpack.c.l.s8.bf16 %v100_v11  ;;  %v332_v18 = vunpack.c.l.s8.bf16 %v102_v12  ;;  %v329_v19 = vunpack.c.h.s8.bf16 %v100_v11 }
  0x32   :  { %v6621_v17 = vcombine.high %v321_v9, %v325_v10  ;;  %v333_v20 = vunpack.c.h.s8.bf16 %v102_v12  ;;  %v6618_v24 = vcombine.low %v320_v5, %v324_v6  ;;  %v6620_v25 = vcombine.low %v321_v9, %v325_v10  ;;  %v128_v9 = vld [vmem:[%s10256_s3 + $0x1a4] sm:$0xff]  ;;  %v130_v10 = vld [vmem:[%s10256_s3 + $0x1b2] sm:$0xff] }
  0x33   :  { %2466 = vmatpush1.bf16.msra.mxu0 %v6590_v47  ;;  %2638 = vmatpush1.bf16.msra.mxu1 %v6592_v48  ;;  %v336_v26 = vunpack.c.l.s8.bf16 %v104_v21  ;;  %v340_v27 = vunpack.c.l.s8.bf16 %v106_v22  ;;  %v6626_v28 = vcombine.high %v328_v16, %v332_v18  ;;  %v337_v30 = vunpack.c.h.s8.bf16 %v104_v21 }
  0x34   :  { %2467 = vmatprep.subr.bf16.mxu0 %v6598_v51  ;;  %2639 = vmatprep.subr.bf16.mxu1 %v6600_v52  ;;  %v6628_v29 = vcombine.high %v329_v19, %v333_v20  ;;  %v341_v31 = vunpack.c.h.s8.bf16 %v106_v22  ;;  %v6625_v35 = vcombine.low %v328_v16, %v332_v18  ;;  %v6627_v36 = vcombine.low %v329_v19, %v333_v20  ;;  %v118_v52 = vld [vmem:[%s10256_s3 + $0x15e] sm:$0xff] }
  0x35   :  { %v6633_v37 = vcombine.high %v336_v26, %v340_v27  ;;  %v344_v38 = vunpack.c.l.s8.bf16 %v108_v23  ;;  %v348_v40 = vunpack.c.l.s8.bf16 %v110_v32  ;;  %v345_v41 = vunpack.c.h.s8.bf16 %v108_v23  ;;  %v132_v19 = vld [vmem:[%s10256_s3 + $0x1c0] sm:$0xff] }
  0x36   :  { %v6635_v39 = vcombine.high %v337_v30, %v341_v31  ;;  %v349_v42 = vunpack.c.h.s8.bf16 %v110_v32  ;;  %v6632_v44 = vcombine.low %v336_v26, %v340_v27  ;;  %v6634_v45 = vcombine.low %v337_v30, %v341_v31  ;;  %v138_v30 = vld [vmem:[%s10256_s3 + $0x1ea] sm:$0xff] }
  0x37   :  { %2468 = vmatpush1.bf16.msra.mxu0 %v6597_v57  ;;  %2640 = vmatpush1.bf16.msra.mxu1 %v6599_v58  ;;  %v352_v46 = vunpack.c.l.s8.bf16 %v112_v33  ;;  %v356_v47 = vunpack.c.l.s8.bf16 %v114_v34  ;;  %v6640_v48 = vcombine.high %v344_v38, %v348_v40  ;;  %v353_v50 = vunpack.c.h.s8.bf16 %v112_v33 }
  0x38   :  { %2469 = vmatprep.subr.bf16.mxu0 %v6605_v59  ;;  %2641 = vmatprep.subr.bf16.mxu1 %v6607_v61  ;;  %v6642_v49 = vcombine.high %v345_v41, %v349_v42  ;;  %v357_v51 = vunpack.c.h.s8.bf16 %v114_v34  ;;  %v6639_v55 = vcombine.low %v344_v38, %v348_v40  ;;  %v6641_v56 = vcombine.low %v345_v41, %v349_v42 }
  0x39   :  { %v6647_v57 = vcombine.high %v352_v46, %v356_v47  ;;  %v360_v58 = vunpack.c.l.s8.bf16 %v116_v43  ;;  %v364_v60 = vunpack.c.l.s8.bf16 %v118_v52  ;;  %v361_v61 = vunpack.c.h.s8.bf16 %v116_v43 }
  0x3a   :  { %v6649_v59 = vcombine.high %v353_v50, %v357_v51  ;;  %v365_v62 = vunpack.c.h.s8.bf16 %v118_v52  ;;  %v6646_v0 = vcombine.low %v352_v46, %v356_v47  ;;  %v6648_v1 = vcombine.low %v353_v50, %v357_v51  ;;  %v7594_v46 = vld [vmem:[%s10254_s1] ss:$28 sps:$4 sm:$0xff]   ;;  %v144_v50 = vld [vmem:[%s10256_s3 + $0x214] sm:$0xff] }
  0x3b   :  { %2470 = vmatpush1.bf16.msra.mxu0 %v6604_v3  ;;  %2642 = vmatpush1.bf16.msra.mxu1 %v6606_v4  ;;  %v368_v2 = vunpack.c.l.s8.bf16 %v120_v53  ;;  %v372_v3 = vunpack.c.l.s8.bf16 %v122_v54  ;;  %v6654_v4 = vcombine.high %v360_v58, %v364_v60  ;;  %v369_v6 = vunpack.c.h.s8.bf16 %v120_v53 }
  0x3c   :  { %2471 = vmatprep.subr.bf16.mxu0 %v6612_v7  ;;  %2643 = vmatprep.subr.bf16.mxu1 %v6614_v8  ;;  %v6656_v5 = vcombine.high %v361_v61, %v365_v62  ;;  %v373_v7 = vunpack.c.h.s8.bf16 %v122_v54  ;;  %v126_v8 = vld [vmem:[%s10256_s3 + $0x196] sm:$0xff]  ;;  %v6653_v11 = vcombine.low %v360_v58, %v364_v60  ;;  %v6655_v12 = vcombine.low %v361_v61, %v365_v62 }
  0x3d   :  { %v380_v16 = vunpack.c.l.s8.bf16 %v126_v8  ;;  %v381_v18 = vunpack.c.h.s8.bf16 %v126_v8  ;;  %v6660_v20 = vcombine.low %v368_v2, %v372_v3  ;;  %v384_v22 = vunpack.c.l.s8.bf16 %v128_v9  ;;  %v148_v61 = vld [vmem:[%s10256_s3 + $0x230] sm:$0xff]  ;;  %v154_v8 = vld [vmem:[%s10256_s3 + $0x25a] sm:$0xff] }
  0x3e   :  { %v6662_v21 = vcombine.low %v369_v6, %v373_v7  ;;  %v388_v23 = vunpack.c.l.s8.bf16 %v130_v10  ;;  %v385_v26 = vunpack.c.h.s8.bf16 %v128_v9  ;;  %v389_v27 = vunpack.c.h.s8.bf16 %v130_v10 }
  0x3f   :  { %2472 = vmatpush1.bf16.msra.mxu0 %v6611_v13  ;;  %2644 = vmatpush1.bf16.msra.mxu1 %v6613_v14  ;;  %v6661_v13 = vcombine.high %v368_v2, %v372_v3  ;;  %v376_v14 = vunpack.c.l.s8.bf16 %v124_v63  ;;  %v392_v34 = vunpack.c.l.s8.bf16 %v132_v19  ;;  %v404_v43 = vunpack.c.l.s8.bf16 %v138_v30  ;;  %v150_v2 = vld [vmem:[%s10256_s3 + $0x23e] sm:$0xff] }
  0x40   :  { %2473 = vmatprep.subr.bf16.mxu0 %v6619_v15  ;;  %2645 = vmatprep.subr.bf16.mxu1 %v6621_v17  ;;  %v6663_v15 = vcombine.high %v369_v6, %v373_v7  ;;  %v377_v17 = vunpack.c.h.s8.bf16 %v124_v63  ;;  %v6675_v33 = vcombine.high %v384_v22, %v388_v23  ;;  %v6674_v40 = vcombine.low %v384_v22, %v388_v23  ;;  %v152_v7 = vld [vmem:[%s10256_s3 + $0x24c] sm:$0xff]  ;;  %v158_v22 = vld [vmem:[%s10256_s3 + $0x276] sm:$0xff] }
  0x41   :  { %v6667_v31 = vcombine.low %v376_v14, %v380_v16  ;;  %v6676_v41 = vcombine.low %v385_v26, %v389_v27  ;;  %vm5336_vm2 = vcmask 64512   ;;  %vm5340_vm3 = vcmask 1043456  }
  0x42   :  { %v6669_v32 = vcombine.low %v377_v17, %v381_v18  ;;  %vm6041_vm4 = vcmask 523264   ;;  %vm5937_vm5 = vcmask 261120  }
  0x43   :  { %2474 = vmatpush1.bf16.msra.mxu0 %v6618_v24  ;;  %2646 = vmatpush1.bf16.msra.mxu1 %v6620_v25  ;;  %v6668_v24 = vcombine.high %v376_v14, %v380_v16  ;;  %v6670_v25 = vcombine.high %v377_v17, %v381_v18  ;;  %v428_v14 = vunpack.c.l.s8.bf16 %v150_v2  ;;  %v429_v16 = vunpack.c.h.s8.bf16 %v150_v2  ;;  %v156_v17 = vld [vmem:[%s10256_s3 + $0x268] sm:$0xff] }
  0x44   :  { %2475 = vmatprep.subr.bf16.mxu0 %v6626_v28  ;;  %2647 = vmatprep.subr.bf16.mxu1 %v6628_v29  ;;  %v134_v28 = vld [vmem:[%s10256_s3 + $0x1ce] sm:$0xff]  ;;  %v136_v29 = vld [vmem:[%s10256_s3 + $0x1dc] sm:$0xff]  ;;  %v174_v2 = vld [vmem:[%s10256_s3 + $0x2e6] sm:$0xff] }
  0x45   :  { %v397_v38 = vunpack.c.h.s8.bf16 %v134_v28  ;;  %v400_v42 = vunpack.c.l.s8.bf16 %v136_v29 }
  0x47   :  { %2476 = vmatpush1.bf16.msra.mxu0 %v6625_v35  ;;  %2648 = vmatpush1.bf16.msra.mxu1 %v6627_v36  ;;  %v6677_v35 = vcombine.high %v385_v26, %v389_v27  ;;  %v396_v36 = vunpack.c.l.s8.bf16 %v134_v28  ;;  %v6689_v53 = vcombine.high %v400_v42, %v404_v43  ;;  %v6688_v62 = vcombine.low %v400_v42, %v404_v43 }
  0x48   :  { %2477 = vmatprep.subr.bf16.mxu0 %v6633_v37  ;;  %2649 = vmatprep.subr.bf16.mxu1 %v6635_v39  ;;  %v393_v37 = vunpack.c.h.s8.bf16 %v132_v19  ;;  %v140_v39 = vld [vmem:[%s10256_s3 + $0x1f8] sm:$0xff]  ;;  %v437_v26 = vunpack.c.h.s8.bf16 %v154_v8 }
  0x49   :  { %v6681_v51 = vcombine.low %v392_v34, %v396_v36  ;;  %v408_v54 = vunpack.c.l.s8.bf16 %v140_v39 }
  0x4a   :  { %v6684_v47 = vcombine.high %v393_v37, %v397_v38  ;;  %v6683_v52 = vcombine.low %v393_v37, %v397_v38  ;;  %v164_v37 = vld [vmem:[%s10256_s3 + $0x2a0] sm:$0xff] }
  0x4b   :  { %2478 = vmatpush1.bf16.msra.mxu0 %v6632_v44  ;;  %2650 = vmatpush1.bf16.msra.mxu1 %v6634_v45  ;;  %v142_v44 = vld [vmem:[%s10256_s3 + $0x206] sm:$0xff]  ;;  %v6682_v45 = vcombine.high %v392_v34, %v396_v36  ;;  %v444_v34 = vunpack.c.l.s8.bf16 %v158_v22  ;;  %v445_v36 = vunpack.c.h.s8.bf16 %v158_v22  ;;  %v182_v22 = vld [vmem:[%s10256_s3 + $0x31e] sm:$0xff] }
  0x4c   :  { %2479 = vmatprep.subr.bf16.mxu0 %v6640_v48  ;;  %2651 = vmatprep.subr.bf16.mxu1 %v6642_v49  ;;  %v401_v48 = vunpack.c.h.s8.bf16 %v136_v29  ;;  %v405_v49 = vunpack.c.h.s8.bf16 %v138_v30  ;;  %v412_v58 = vunpack.c.l.s8.bf16 %v142_v44  ;;  %v413_v60 = vunpack.c.h.s8.bf16 %v142_v44 }
  0x4d   :  { %v440_v30 = vunpack.c.l.s8.bf16 %v156_v17 }
  0x4e   :  { %v6690_v63 = vcombine.low %v401_v48, %v405_v49  ;;  %v6696_v3 = vcombine.high %v408_v54, %v412_v58  ;;  %v6695_v9 = vcombine.low %v408_v54, %v412_v58 }
  0x4f   :  { %2480 = vmatpush1.bf16.msra.mxu0 %v6639_v55  ;;  %2652 = vmatpush1.bf16.msra.mxu1 %v6641_v56  ;;  %v146_v55 = vld [vmem:[%s10256_s3 + $0x222] sm:$0xff]  ;;  %v6724_v42 = vcombine.high %v440_v30, %v444_v34 }
  0x50   :  { %2481 = vmatprep.subr.bf16.mxu0 %v6647_v57  ;;  %2653 = vmatprep.subr.bf16.mxu1 %v6649_v59  ;;  %v7595_v56 = vld [vmem:[%s10254_s1 + $0xc] ss:$28 sps:$4 sm:$0xff]   ;;  %v6691_v57 = vcombine.high %v401_v48, %v405_v49  ;;  %v409_v59 = vunpack.c.h.s8.bf16 %v140_v39  ;;  %v421_v6 = vunpack.c.h.s8.bf16 %v146_v55 }
  0x52   :  { %v6697_v10 = vcombine.low %v409_v59, %v413_v60 }
  0x53   :  { %2482 = vmatpush1.bf16.msra.mxu0 %v6646_v0  ;;  %2654 = vmatpush1.bf16.msra.mxu1 %v6648_v1  ;;  %v416_v0 = vunpack.c.l.s8.bf16 %v144_v50  ;;  %v420_v1 = vunpack.c.l.s8.bf16 %v146_v55  ;;  %v168_v55 = vld [vmem:[%s10256_s3 + $0x2bc] sm:$0xff] }
  0x54   :  { %2483 = vmatprep.subr.bf16.mxu0 %v6654_v4  ;;  %2655 = vmatprep.subr.bf16.mxu1 %v6656_v5  ;;  %v6698_v4 = vcombine.high %v409_v59, %v413_v60  ;;  %v417_v5 = vunpack.c.h.s8.bf16 %v144_v50  ;;  %v456_v50 = vunpack.c.l.s8.bf16 %v164_v37  ;;  %v464_v59 = vunpack.c.l.s8.bf16 %v168_v55 }
  0x55   :  { %v6702_v18 = vcombine.low %v416_v0, %v420_v1 }
  0x56   :  { %v6704_v19 = vcombine.low %v417_v5, %v421_v6 }
  0x57   :  { %2484 = vmatpush1.bf16.msra.mxu0 %v6653_v11  ;;  %2656 = vmatpush1.bf16.msra.mxu1 %v6655_v12  ;;  %v6703_v11 = vcombine.high %v416_v0, %v420_v1  ;;  %v424_v12 = vunpack.c.l.s8.bf16 %v148_v61  ;;  %v172_v1 = vld [vmem:[%s10256_s3 + $0x2d8] sm:$0xff] }
  0x58   :  { %2485 = vmatprep.subr.bf16.mxu0 %v6661_v13  ;;  %2657 = vmatprep.subr.bf16.mxu1 %v6663_v15  ;;  %v6705_v13 = vcombine.high %v417_v5, %v421_v6  ;;  %v425_v15 = vunpack.c.h.s8.bf16 %v148_v61  ;;  %v472_v6 = vunpack.c.l.s8.bf16 %v172_v1 }
  0x59   :  { %v6710_v23 = vcombine.high %v424_v12, %v428_v14  ;;  %v6709_v27 = vcombine.low %v424_v12, %v428_v14  ;;  %v178_v12 = vld [vmem:[%s10256_s3 + $0x302] sm:$0xff] }
  0x5a   :  { %v6711_v28 = vcombine.low %v425_v15, %v429_v16 }
  0x5b   :  { %2486 = vmatpush1.bf16.msra.mxu0 %v6660_v20  ;;  %2658 = vmatpush1.bf16.msra.mxu1 %v6662_v21  ;;  %v432_v20 = vunpack.c.l.s8.bf16 %v152_v7  ;;  %v436_v21 = vunpack.c.l.s8.bf16 %v154_v8  ;;  %v476_v8 = vunpack.c.l.s8.bf16 %v174_v2 }
  0x5c   :  { %2487 = vmatprep.subr.bf16.mxu0 %v6668_v24  ;;  %2659 = vmatprep.subr.bf16.mxu1 %v6670_v25  ;;  %v6712_v24 = vcombine.high %v425_v15, %v429_v16  ;;  %v433_v25 = vunpack.c.h.s8.bf16 %v152_v7  ;;  %v484_v16 = vunpack.c.l.s8.bf16 %v178_v12 }
  0x5d   :  { %v6717_v29 = vcombine.high %v432_v20, %v436_v21  ;;  %v6716_v38 = vcombine.low %v432_v20, %v436_v21  ;;  %v485_v20 = vunpack.c.h.s8.bf16 %v178_v12  ;;  %v180_v21 = vld [vmem:[%s10256_s3 + $0x310] sm:$0xff] }
  0x5e   :  { %v6718_v39 = vcombine.low %v433_v25, %v437_v26 }
  0x5f   :  { %2488 = vmatpush1.bf16.msra.mxu0 %v6667_v31  ;;  %2660 = vmatpush1.bf16.msra.mxu1 %v6669_v32  ;;  %v160_v31 = vld [vmem:[%s10256_s3 + $0x284] sm:$0xff]  ;;  %v162_v32 = vld [vmem:[%s10256_s3 + $0x292] sm:$0xff] }
  0x60   :  { %2489 = vmatprep.subr.bf16.mxu0 %v6675_v33  ;;  %2661 = vmatprep.subr.bf16.mxu1 %v6677_v35  ;;  %v6719_v33 = vcombine.high %v433_v25, %v437_v26  ;;  %v441_v35 = vunpack.c.h.s8.bf16 %v156_v17  ;;  %v449_v44 = vunpack.c.h.s8.bf16 %v160_v31  ;;  %v6752_v17 = vcombine.high %v472_v6, %v476_v8 }
  0x61   :  { %v488_v26 = vunpack.c.l.s8.bf16 %v180_v21 }
  0x62   :  { %v6726_v43 = vcombine.high %v441_v35, %v445_v36  ;;  %v6725_v48 = vcombine.low %v441_v35, %v445_v36 }
  0x63   :  { %2490 = vmatpush1.bf16.msra.mxu0 %v6674_v40  ;;  %2662 = vmatpush1.bf16.msra.mxu1 %v6676_v41  ;;  %v448_v40 = vunpack.c.l.s8.bf16 %v160_v31  ;;  %v452_v41 = vunpack.c.l.s8.bf16 %v162_v32  ;;  %v184_v31 = vld [vmem:[%s10256_s3 + $0x32c] sm:$0xff] }
  0x64   :  { %2502 = vmatprep.subr.bf16.mxu0 %v6682_v45  ;;  %2674 = vmatprep.subr.bf16.mxu1 %v6684_v47  ;;  %v453_v45 = vunpack.c.h.s8.bf16 %v162_v32  ;;  %v6723_v47 = vcombine.low %v440_v30, %v444_v34  ;;  %v493_v30 = vunpack.c.h.s8.bf16 %v182_v22  ;;  %v186_v32 = vld [vmem:[%s10256_s3 + $0x33a] sm:$0xff]  ;;  %v496_v35 = vunpack.c.l.s8.bf16 %v184_v31 }
  0x65   :  { %v6731_v49 = vcombine.high %v448_v40, %v452_v41  ;;  %v500_v36 = vunpack.c.l.s8.bf16 %v186_v32 }
  0x66   :  { %2492 = vmatmul.mubr.bf16.vlgmr.msra.gmra.mrb[0].mxu0 %v7594_v46  ;;  %2664 = vmatmul.mubr.bf16.vlgmr.msra.gmra.mrb[0].mxu1 %v7594_v46  ;;  %v166_v46 = vld [vmem:[%s10256_s3 + $0x2ae] sm:$0xff]  ;;  %v6732_v58 = vcombine.low %v449_v44, %v453_v45 }
  0x67   :  { %2503 = vmatpush1.bf16.msra.mxu0 %v6681_v51  ;;  %2675 = vmatpush1.bf16.msra.mxu1 %v6683_v52  ;;  %v6733_v51 = vcombine.high %v449_v44, %v453_v45  ;;  %v460_v52 = vunpack.c.l.s8.bf16 %v166_v46  ;;  %v461_v54 = vunpack.c.h.s8.bf16 %v166_v46  ;;  %v6773_v45 = vcombine.high %v496_v35, %v500_v36 }
  0x68   :  { %2504 = vmatprep.subr.bf16.mxu0 %v6689_v53  ;;  %2676 = vmatprep.subr.bf16.mxu1 %v6691_v57  ;;  %v457_v53 = vunpack.c.h.s8.bf16 %v164_v37  ;;  %v6730_v57 = vcombine.low %v448_v40, %v452_v41  ;;  %v501_v40 = vunpack.c.h.s8.bf16 %v186_v32  ;;  %v188_v41 = vld [vmem:[%s10256_s3 + $0x348] sm:$0xff] }
  0x69   :  { %2534 = vmatprep.mubr.bf16.mxu0 %v7595_v56  ;;  %2706 = vmatprep.mubr.bf16.mxu1 %v7595_v56  ;;  %v170_v56 = vld [vmem:[%s10256_s3 + $0x2ca] sm:$0xff]  ;;  %v6738_v61 = vcombine.high %v456_v50, %v460_v52  ;;  %v504_v46 = vunpack.c.l.s8.bf16 %v188_v41 }
  0x6a   :  { %v468_v60 = vunpack.c.l.s8.bf16 %v170_v56  ;;  %v469_v0 = vunpack.c.h.s8.bf16 %v170_v56 }
  0x6b   :  { %2505 = vmatpush1.bf16.msra.mxu0 %v6688_v62  ;;  %2677 = vmatpush1.bf16.msra.mxu1 %v6690_v63  ;;  %v6740_v62 = vcombine.high %v457_v53, %v461_v54  ;;  %v465_v63 = vunpack.c.h.s8.bf16 %v168_v55 }
  0x6c   :  { %2506 = vmatprep.subr.bf16.mxu0 %v6696_v3  ;;  %2678 = vmatprep.subr.bf16.mxu1 %v6698_v4  ;;  %v6737_v3 = vcombine.low %v456_v50, %v460_v52  ;;  %v6739_v4 = vcombine.low %v457_v53, %v461_v54  ;;  %v6745_v5 = vcombine.high %v464_v59, %v468_v60  ;;  %v194_v52 = vld [vmem:[%s10256_s3 + $0x372] sm:$0xff] }
  0x6d   :  { %v6747_v7 = vcombine.high %v465_v63, %v469_v0  ;;  %v6746_v14 = vcombine.low %v465_v63, %v469_v0  ;;  %v6772_v53 = vcombine.low %v496_v35, %v500_v36  ;;  %v516_v56 = vunpack.c.l.s8.bf16 %v194_v52 }
  0x6f   :  { %2507 = vmatpush1.bf16.msra.mxu0 %v6695_v9  ;;  %2679 = vmatpush1.bf16.msra.mxu1 %v6697_v10  ;;  %v473_v9 = vunpack.c.h.s8.bf16 %v172_v1  ;;  %v477_v10 = vunpack.c.h.s8.bf16 %v174_v2 }
  0x70   :  { %2508 = vmatprep.subr.bf16.mxu0 %v6703_v11  ;;  %2680 = vmatprep.subr.bf16.mxu1 %v6705_v13  ;;  %v176_v11 = vld [vmem:[%s10256_s3 + $0x2f4] sm:$0xff]  ;;  %v6744_v13 = vcombine.low %v464_v59, %v468_v60  ;;  %v517_v60 = vunpack.c.h.s8.bf16 %v194_v52 }
  0x71   :  { %v480_v15 = vunpack.c.l.s8.bf16 %v176_v11 }
  0x73   :  { %2509 = vmatpush1.bf16.msra.mxu0 %v6702_v18  ;;  %2681 = vmatpush1.bf16.msra.mxu1 %v6704_v19  ;;  %v6754_v18 = vcombine.high %v473_v9, %v477_v10  ;;  %v481_v19 = vunpack.c.h.s8.bf16 %v176_v11  ;;  %v6759_v25 = vcombine.high %v480_v15, %v484_v16 }
  0x74   :  { %2510 = vmatprep.subr.bf16.mxu0 %v6710_v23  ;;  %2682 = vmatprep.subr.bf16.mxu1 %v6712_v24  ;;  %v6751_v23 = vcombine.low %v472_v6, %v476_v8  ;;  %v6753_v24 = vcombine.low %v473_v9, %v477_v10  ;;  %v202_v8 = vld [vmem:[%s10256_s3 + $0x3aa] sm:$0xff] }
  0x75   :  { %v6760_v34 = vcombine.low %v481_v19, %v485_v20  ;;  %v532_v12 = vunpack.c.l.s8.bf16 %v202_v8 }
  0x77   :  { %2511 = vmatpush1.bf16.msra.mxu0 %v6709_v27  ;;  %2683 = vmatpush1.bf16.msra.mxu1 %v6711_v28  ;;  %v6761_v27 = vcombine.high %v481_v19, %v485_v20  ;;  %v492_v28 = vunpack.c.l.s8.bf16 %v182_v22  ;;  %v7597_v19 = vld [vmem:[%s10254_s1 + $0x8] ss:$28 sps:$4 sm:$0xff]  }
  0x78   :  { %2512 = vmatprep.subr.bf16.mxu0 %v6717_v29  ;;  %2684 = vmatprep.subr.bf16.mxu1 %v6719_v33  ;;  %v489_v29 = vunpack.c.h.s8.bf16 %v180_v21  ;;  %v6758_v33 = vcombine.low %v480_v15, %v484_v16  ;;  %v533_v16 = vunpack.c.h.s8.bf16 %v202_v8 }
  0x79   :  { %v6766_v37 = vcombine.high %v488_v26, %v492_v28 }
  0x7a   :  { %v6767_v44 = vcombine.low %v489_v29, %v493_v30 }
  0x7b   :  { %2513 = vmatpush1.bf16.msra.mxu0 %v6716_v38  ;;  %2685 = vmatpush1.bf16.msra.mxu1 %v6718_v39  ;;  %v6768_v38 = vcombine.high %v489_v29, %v493_v30  ;;  %v497_v39 = vunpack.c.h.s8.bf16 %v184_v31  ;;  %v210_v29 = vld [vmem:[%s10256_s3 + $0x3e2] sm:$0xff]  ;;  %v7598_v30 = vld [vmem:[%s10254_s1 + $0x14] ss:$28 sps:$4 sm:$0xff]  }
  0x7c   :  { %2514 = vmatprep.subr.bf16.mxu0 %v6724_v42  ;;  %2686 = vmatprep.subr.bf16.mxu1 %v6726_v43  ;;  %v190_v42 = vld [vmem:[%s10256_s3 + $0x356] sm:$0xff]  ;;  %v6765_v43 = vcombine.low %v488_v26, %v492_v28 }
  0x7d   :  { %v509_v50 = vunpack.c.h.s8.bf16 %v190_v42  ;;  %v6774_v54 = vcombine.low %v497_v39, %v501_v40  ;;  %v208_v28 = vld [vmem:[%s10256_s3 + $0x3d4] sm:$0xff] }
  0x7f   :  { %2515 = vmatpush1.bf16.msra.mxu0 %v6723_v47  ;;  %2687 = vmatpush1.bf16.msra.mxu1 %v6725_v48  ;;  %v6775_v47 = vcombine.high %v497_v39, %v501_v40  ;;  %v508_v48 = vunpack.c.l.s8.bf16 %v190_v42  ;;  %v212_v39 = vld [vmem:[%s10256_s3 + $0x3f0] sm:$0xff]  ;;  %v214_v40 = vld [vmem:[%s10256_s3 + $0x3fe] sm:$0xff] }
  0x80   :  { %2516 = vmatprep.subr.bf16.mxu0 %v6731_v49  ;;  %2688 = vmatprep.subr.bf16.mxu1 %v6733_v51  ;;  %v505_v49 = vunpack.c.h.s8.bf16 %v188_v41  ;;  %v192_v51 = vld [vmem:[%s10256_s3 + $0x364] sm:$0xff] }
  0x81   :  { %v512_v55 = vunpack.c.l.s8.bf16 %v192_v51  ;;  %v513_v59 = vunpack.c.h.s8.bf16 %v192_v51  ;;  %v6779_v63 = vcombine.low %v504_v46, %v508_v48 }
  0x82   :  { %v6781_v0 = vcombine.low %v505_v49, %v509_v50 }
  0x83   :  { %2517 = vmatpush1.bf16.msra.mxu0 %v6730_v57  ;;  %2689 = vmatpush1.bf16.msra.mxu1 %v6732_v58  ;;  %v6780_v57 = vcombine.high %v504_v46, %v508_v48  ;;  %v6782_v58 = vcombine.high %v505_v49, %v509_v50  ;;  %v6787_v1 = vcombine.high %v512_v55, %v516_v56  ;;  %v557_v48 = vunpack.c.h.s8.bf16 %v214_v40  ;;  %v216_v49 = vld [vmem:[%s10256_s3 + $0x40c] sm:$0xff]  ;;  %v218_v50 = vld [vmem:[%s10256_s3 + $0x41a] sm:$0xff] }
  0x84   :  { %2518 = vmatprep.subr.bf16.mxu0 %v6738_v61  ;;  %2690 = vmatprep.subr.bf16.mxu1 %v6740_v62  ;;  %v196_v61 = vld [vmem:[%s10256_s3 + $0x380] sm:$0xff]  ;;  %v198_v62 = vld [vmem:[%s10256_s3 + $0x38e] sm:$0xff]  ;;  %v6786_v9 = vcombine.low %v512_v55, %v516_v56  ;;  %v6788_v10 = vcombine.low %v513_v59, %v517_v60  ;;  %v564_v56 = vunpack.c.l.s8.bf16 %v218_v50 }
  0x85   :  { %v520_v2 = vunpack.c.l.s8.bf16 %v196_v61  ;;  %v525_v6 = vunpack.c.h.s8.bf16 %v198_v62 }
  0x87   :  { %2519 = vmatpush1.bf16.msra.mxu0 %v6737_v3  ;;  %2691 = vmatpush1.bf16.msra.mxu1 %v6739_v4  ;;  %v6789_v3 = vcombine.high %v513_v59, %v517_v60  ;;  %v524_v4 = vunpack.c.l.s8.bf16 %v198_v62  ;;  %v220_v59 = vld [vmem:[%s10256_s3 + $0x428] sm:$0xff]  ;;  %v222_v60 = vld [vmem:[%s10256_s3 + $0x436] sm:$0xff] }
  0x88   :  { %2520 = vmatprep.subr.bf16.mxu0 %v6745_v5  ;;  %2692 = vmatprep.subr.bf16.mxu1 %v6747_v7  ;;  %v521_v5 = vunpack.c.h.s8.bf16 %v196_v61  ;;  %v200_v7 = vld [vmem:[%s10256_s3 + $0x39c] sm:$0xff] }
  0x89   :  { %v528_v11 = vunpack.c.l.s8.bf16 %v200_v7  ;;  %v529_v15 = vunpack.c.h.s8.bf16 %v200_v7  ;;  %v6793_v20 = vcombine.low %v520_v2, %v524_v4 }
  0x8a   :  { %v6795_v21 = vcombine.low %v521_v5, %v525_v6 }
  0x8b   :  { %2521 = vmatpush1.bf16.msra.mxu0 %v6744_v13  ;;  %2693 = vmatpush1.bf16.msra.mxu1 %v6746_v14  ;;  %v6794_v13 = vcombine.high %v520_v2, %v524_v4  ;;  %v6796_v14 = vcombine.high %v521_v5, %v525_v6  ;;  %v6801_v22 = vcombine.high %v528_v11, %v532_v12  ;;  %v573_v4 = vunpack.c.h.s8.bf16 %v222_v60  ;;  %v224_v5 = vld [vmem:[%s10256_s3 + $0x444] sm:$0xff]  ;;  %v226_v6 = vld [vmem:[%s10256_s3 + $0x452] sm:$0xff] }
  0x8c   :  { %2522 = vmatprep.subr.bf16.mxu0 %v6752_v17  ;;  %2694 = vmatprep.subr.bf16.mxu1 %v6754_v18  ;;  %v204_v17 = vld [vmem:[%s10256_s3 + $0x3b8] sm:$0xff]  ;;  %v206_v18 = vld [vmem:[%s10256_s3 + $0x3c6] sm:$0xff]  ;;  %v6800_v31 = vcombine.low %v528_v11, %v532_v12  ;;  %v6802_v32 = vcombine.low %v529_v15, %v533_v16  ;;  %v580_v12 = vunpack.c.l.s8.bf16 %v226_v6 }
  0x8d   :  { %v537_v26 = vunpack.c.h.s8.bf16 %v204_v17 }
  0x8f   :  { %2523 = vmatpush1.bf16.msra.mxu0 %v6751_v23  ;;  %2695 = vmatpush1.bf16.msra.mxu1 %v6753_v24  ;;  %v536_v23 = vunpack.c.l.s8.bf16 %v204_v17  ;;  %v6803_v24 = vcombine.high %v529_v15, %v533_v16  ;;  %v228_v15 = vld [vmem:[%s10256_s3 + $0x460] sm:$0xff]  ;;  %v230_v16 = vld [vmem:[%s10256_s3 + $0x46e] sm:$0xff] }
  0x90   :  { %2524 = vmatprep.subr.bf16.mxu0 %v6759_v25  ;;  %2696 = vmatprep.subr.bf16.mxu1 %v6761_v27  ;;  %v540_v25 = vunpack.c.l.s8.bf16 %v206_v18  ;;  %v541_v27 = vunpack.c.h.s8.bf16 %v206_v18 }
  0x92   :  { %v6808_v35 = vcombine.high %v536_v23, %v540_v25  ;;  %v6810_v36 = vcombine.high %v537_v26, %v541_v27  ;;  %v6807_v41 = vcombine.low %v536_v23, %v540_v25  ;;  %v6809_v42 = vcombine.low %v537_v26, %v541_v27  ;;  %v232_v25 = vld [vmem:[%s10256_s3 + $0x47c] sm:$0xff]  ;;  %v234_v26 = vld [vmem:[%s10256_s3 + $0x48a] sm:$0xff] }
  0x93   :  { %2525 = vmatpush1.bf16.msra.mxu0 %v6758_v33  ;;  %2697 = vmatpush1.bf16.msra.mxu1 %v6760_v34  ;;  %v544_v33 = vunpack.c.l.s8.bf16 %v208_v28  ;;  %v548_v34 = vunpack.c.l.s8.bf16 %v210_v29  ;;  %v585_v23 = vunpack.c.h.s8.bf16 %v228_v15 }
  0x94   :  { %2526 = vmatprep.subr.bf16.mxu0 %v6766_v37  ;;  %2698 = vmatprep.subr.bf16.mxu1 %v6768_v38  ;;  %v545_v37 = vunpack.c.h.s8.bf16 %v208_v28  ;;  %v549_v38 = vunpack.c.h.s8.bf16 %v210_v29 }
  0x95   :  { %v6814_v51 = vcombine.low %v544_v33, %v548_v34 }
  0x96   :  { %v6817_v46 = vcombine.high %v545_v37, %v549_v38  ;;  %v6816_v52 = vcombine.low %v545_v37, %v549_v38 }
  0x97   :  { %2527 = vmatpush1.bf16.msra.mxu0 %v6765_v43  ;;  %2699 = vmatpush1.bf16.msra.mxu1 %v6767_v44  ;;  %v552_v43 = vunpack.c.l.s8.bf16 %v212_v39  ;;  %v556_v44 = vunpack.c.l.s8.bf16 %v214_v40 }
  0x98   :  { %2528 = vmatprep.subr.bf16.mxu0 %v6773_v45  ;;  %2700 = vmatprep.subr.bf16.mxu1 %v6775_v47  ;;  %v6815_v45 = vcombine.high %v544_v33, %v548_v34  ;;  %v553_v47 = vunpack.c.h.s8.bf16 %v212_v39  ;;  %v593_v33 = vunpack.c.h.s8.bf16 %v232_v25  ;;  %v597_v34 = vunpack.c.h.s8.bf16 %v234_v26 }
  0x99   :  { %v6821_v61 = vcombine.low %v552_v43, %v556_v44 }
  0x9a   :  { %v6824_v55 = vcombine.high %v553_v47, %v557_v48  ;;  %v6823_v62 = vcombine.low %v553_v47, %v557_v48  ;;  %v6858_v48 = vcombine.low %v593_v33, %v597_v34 }
  0x9b   :  { %2529 = vmatpush1.bf16.msra.mxu0 %v6772_v53  ;;  %2701 = vmatpush1.bf16.msra.mxu1 %v6774_v54  ;;  %v6822_v53 = vcombine.high %v552_v43, %v556_v44  ;;  %v560_v54 = vunpack.c.l.s8.bf16 %v216_v49 }
  0x9c   :  { %2530 = vmatprep.subr.bf16.mxu0 %v6780_v57  ;;  %2702 = vmatprep.subr.bf16.mxu1 %v6782_v58  ;;  %v561_v57 = vunpack.c.h.s8.bf16 %v216_v49  ;;  %v565_v58 = vunpack.c.h.s8.bf16 %v218_v50 }
  0x9d   :  { %v6828_v7 = vcombine.low %v560_v54, %v564_v56 }
  0x9e   :  { %v6831_v2 = vcombine.high %v561_v57, %v565_v58  ;;  %v6830_v8 = vcombine.low %v561_v57, %v565_v58 }
  0x9f   :  { %2531 = vmatpush1.bf16.msra.mxu0 %v6779_v63  ;;  %2703 = vmatpush1.bf16.msra.mxu1 %v6781_v0  ;;  %v568_v63 = vunpack.c.l.s8.bf16 %v220_v59  ;;  %v572_v0 = vunpack.c.l.s8.bf16 %v222_v60 }
  0xa0   :  { %2532 = vmatprep.subr.bf16.mxu0 %v6787_v1  ;;  %2704 = vmatprep.subr.bf16.mxu1 %v6789_v3  ;;  %v6829_v1 = vcombine.high %v560_v54, %v564_v56  ;;  %v569_v3 = vunpack.c.h.s8.bf16 %v220_v59  ;;  %v246_v56 = vld [vmem:[%s10256_s3 + $0x4de] sm:$0xff] }
  0xa1   :  { %v6835_v17 = vcombine.low %v568_v63, %v572_v0  ;;  %v620_v60 = vunpack.c.l.s8.bf16 %v246_v56 }
  0xa2   :  { %v6838_v11 = vcombine.high %v569_v3, %v573_v4  ;;  %v6837_v18 = vcombine.low %v569_v3, %v573_v4 }
  0xa3   :  { %2533 = vmatpush1.bf16.msra.mxu0 %v6786_v9  ;;  %2705 = vmatpush1.bf16.msra.mxu1 %v6788_v10  ;;  %v6836_v9 = vcombine.high %v568_v63, %v572_v0  ;;  %v576_v10 = vunpack.c.l.s8.bf16 %v224_v5  ;;  %v621_v0 = vunpack.c.h.s8.bf16 %v246_v56  ;;  %v8353_v56 = vld [vmem:[%s10256_s3 + $0x2ee] sm:$0x3f] }
  0xa4   :  { %2545 = vmatprep.subr.bf16.mxu0 %v6794_v13  ;;  %2717 = vmatprep.subr.bf16.mxu1 %v6796_v14  ;;  %v577_v13 = vunpack.c.h.s8.bf16 %v224_v5  ;;  %v581_v14 = vunpack.c.h.s8.bf16 %v226_v6 }
  0xa5   :  { %v6842_v27 = vcombine.low %v576_v10, %v580_v12 }
  0xa6   :  { %2535 = vmatmul.mubr.bf16.vlgmr.msra.gmra.mrb[0].mxu0 %v7597_v19  ;;  %2707 = vmatmul.mubr.bf16.vlgmr.msra.gmra.mrb[0].mxu1 %v7597_v19  ;;  %v584_v19 = vunpack.c.l.s8.bf16 %v228_v15  ;;  %v6844_v28 = vcombine.low %v577_v13, %v581_v14 }
  0xa7   :  { %2546 = vmatpush1.bf16.msra.mxu0 %v6793_v20  ;;  %2718 = vmatpush1.bf16.msra.mxu1 %v6795_v21  ;;  %v588_v20 = vunpack.c.l.s8.bf16 %v230_v16  ;;  %v6843_v21 = vcombine.high %v576_v10, %v580_v12 }
  0xa8   :  { %2547 = vmatprep.subr.bf16.mxu0 %v6801_v22  ;;  %2719 = vmatprep.subr.bf16.mxu1 %v6803_v24  ;;  %v6845_v22 = vcombine.high %v577_v13, %v581_v14  ;;  %v589_v24 = vunpack.c.h.s8.bf16 %v230_v16 }
  0xa9   :  { %2577 = vmatprep.mubr.bf16.mxu0 %v7598_v30  ;;  %2749 = vmatprep.mubr.bf16.mxu1 %v7598_v30  ;;  %v6850_v29 = vcombine.high %v584_v19, %v588_v20  ;;  %v592_v30 = vunpack.c.l.s8.bf16 %v232_v25  ;;  %v6849_v37 = vcombine.low %v584_v19, %v588_v20  ;;  %v8297_v25 = vld [vmem:[%s10256_s3 + $0x2b6] sm:$0x3f] }
  0xaa   :  { %v6851_v38 = vcombine.low %v585_v23, %v589_v24 }
  0xab   :  { %2548 = vmatpush1.bf16.msra.mxu0 %v6800_v31  ;;  %2720 = vmatpush1.bf16.msra.mxu1 %v6802_v32  ;;  %v6852_v31 = vcombine.high %v585_v23, %v589_v24  ;;  %v596_v32 = vunpack.c.l.s8.bf16 %v234_v26  ;;  %v8292_v24 = vld [vmem:[%s10256_s3 + $0x2a8] sm:$0x3f] }
  0xac   :  { %2549 = vmatprep.subr.bf16.mxu0 %v6808_v35  ;;  %2721 = vmatprep.subr.bf16.mxu1 %v6810_v36  ;;  %v236_v35 = vld [vmem:[%s10256_s3 + $0x498] sm:$0xff]  ;;  %v238_v36 = vld [vmem:[%s10256_s3 + $0x4a6] sm:$0xff] }
  0xad   :  { %v600_v39 = vunpack.c.l.s8.bf16 %v236_v35  ;;  %v604_v40 = vunpack.c.l.s8.bf16 %v238_v36  ;;  %v601_v43 = vunpack.c.h.s8.bf16 %v236_v35  ;;  %v605_v44 = vunpack.c.h.s8.bf16 %v238_v36  ;;  %v8304_v35 = vld [vmem:[%s10256_s3 + $0x540] sm:$0xff]  ;;  %v8309_v36 = vld [vmem:[%s10256_s3 + $0x54e] sm:$0xff] }
  0xae   :  { %v6856_v47 = vcombine.low %v592_v30, %v596_v32 }
  0xaf   :  { %2550 = vmatpush1.bf16.msra.mxu0 %v6807_v41  ;;  %2722 = vmatpush1.bf16.msra.mxu1 %v6809_v42  ;;  %v6857_v41 = vcombine.high %v592_v30, %v596_v32  ;;  %v6859_v42 = vcombine.high %v593_v33, %v597_v34  ;;  %v6864_v49 = vcombine.high %v600_v39, %v604_v40 }
  0xb0   :  { %2551 = vmatprep.subr.bf16.mxu0 %v6815_v45  ;;  %2723 = vmatprep.subr.bf16.mxu1 %v6817_v46  ;;  %v240_v45 = vld [vmem:[%s10256_s3 + $0x4b4] sm:$0xff]  ;;  %v242_v46 = vld [vmem:[%s10256_s3 + $0x4c2] sm:$0xff]  ;;  %v6863_v57 = vcombine.low %v600_v39, %v604_v40  ;;  %v6865_v58 = vcombine.low %v601_v43, %v605_v44 }
  0xb1   :  { %v608_v50 = vunpack.c.l.s8.bf16 %v240_v45  ;;  %v613_v54 = vunpack.c.h.s8.bf16 %v242_v46  ;;  %v8323_v40 = vld [vmem:[%s10256_s3 + $0xf6] sm:$0x3f] }
  0xb3   :  { %2552 = vmatpush1.bf16.msra.mxu0 %v6814_v51  ;;  %2724 = vmatpush1.bf16.msra.mxu1 %v6816_v52  ;;  %v6866_v51 = vcombine.high %v601_v43, %v605_v44  ;;  %v612_v52 = vunpack.c.l.s8.bf16 %v242_v46 }
  0xb4   :  { %2553 = vmatprep.subr.bf16.mxu0 %v6822_v53  ;;  %2725 = vmatprep.subr.bf16.mxu1 %v6824_v55  ;;  %v609_v53 = vunpack.c.h.s8.bf16 %v240_v45  ;;  %v244_v55 = vld [vmem:[%s10256_s3 + $0x4d0] sm:$0xff] }
  0xb5   :  { %v616_v59 = vunpack.c.l.s8.bf16 %v244_v55  ;;  %v617_v63 = vunpack.c.h.s8.bf16 %v244_v55  ;;  %v6870_v3 = vcombine.low %v608_v50, %v612_v52  ;;  %v8348_v55 = vld [vmem:[%s10256_s3 + $0x2e0] sm:$0x3f] }
  0xb6   :  { %v6872_v4 = vcombine.low %v609_v53, %v613_v54 }
  0xb7   :  { %2554 = vmatpush1.bf16.msra.mxu0 %v6821_v61  ;;  %2726 = vmatpush1.bf16.msra.mxu1 %v6823_v62  ;;  %v6871_v61 = vcombine.high %v608_v50, %v612_v52  ;;  %v6873_v62 = vcombine.high %v609_v53, %v613_v54  ;;  %v6878_v5 = vcombine.high %v616_v59, %v620_v60  ;;  %v652_v50 = vunpack.c.l.s8.bf16 %v8309_v36 }
  0xb8   :  { %2555 = vmatprep.subr.bf16.mxu0 %v6829_v1  ;;  %2727 = vmatprep.subr.bf16.mxu1 %v6831_v2  ;;  %v248_v1 = vld [vmem:[%s10256_s3 + $0x4ec] sm:$0xff]  ;;  %v250_v2 = vld [vmem:[%s10256_s3 + $0x4fa] sm:$0xff]  ;;  %v6877_v15 = vcombine.low %v616_v59, %v620_v60  ;;  %v6879_v16 = vcombine.low %v617_v63, %v621_v0  ;;  %v335_v52 = vunpack.c.h.s8.bf16 %v8323_v40  ;;  %v8363_v60 = vld [vmem:[%s10256_s3 + $0x104] sm:$0x3f] }
  0xb9   :  { %v624_v6 = vunpack.c.l.s8.bf16 %v248_v1  ;;  %v628_v10 = vunpack.c.l.s8.bf16 %v250_v2  ;;  %v629_v12 = vunpack.c.h.s8.bf16 %v250_v2  ;;  %v8358_v59 = vld [vmem:[%s10256_s3 + $0x8] sm:$0x3f]  ;;  %v653_v2 = vunpack.c.h.s8.bf16 %v8309_v36 }
  0xbb   :  { %2556 = vmatpush1.bf16.msra.mxu0 %v6828_v7  ;;  %2728 = vmatpush1.bf16.msra.mxu1 %v6830_v8  ;;  %v252_v7 = vld [vmem:[%s10256_s3 + $0x508] sm:$0xff]  ;;  %v254_v8 = vld [vmem:[%s10256_s3 + $0x516] sm:$0xff]  ;;  %v6884_v23 = vcombine.low %v624_v6, %v628_v10 }
  0xbc   :  { %2557 = vmatprep.subr.bf16.mxu0 %v6836_v9  ;;  %2729 = vmatprep.subr.bf16.mxu1 %v6838_v11  ;;  %v6880_v9 = vcombine.high %v617_v63, %v621_v0  ;;  %v625_v11 = vunpack.c.h.s8.bf16 %v248_v1  ;;  %v632_v13 = vunpack.c.l.s8.bf16 %v252_v7  ;;  %v636_v14 = vunpack.c.l.s8.bf16 %v254_v8 }
  0xbd   :  { %v633_v19 = vunpack.c.h.s8.bf16 %v252_v7  ;;  %v637_v20 = vunpack.c.h.s8.bf16 %v254_v8  ;;  %v478_v63 = vunpack.c.l.s8.bf16 %v8353_v56  ;;  %v649_v1 = vunpack.c.h.s8.bf16 %v8304_v35 }
  0xbe   :  { %v6886_v26 = vcombine.low %v625_v11, %v629_v12  ;;  %v6891_v43 = vcombine.low %v632_v13, %v636_v14 }
  0xbf   :  { %2558 = vmatpush1.bf16.msra.mxu0 %v6835_v17  ;;  %2730 = vmatpush1.bf16.msra.mxu1 %v6837_v18  ;;  %v6885_v17 = vcombine.high %v624_v6, %v628_v10  ;;  %v6887_v18 = vcombine.high %v625_v11, %v629_v12  ;;  %v6894_v34 = vcombine.high %v633_v19, %v637_v20  ;;  %v339_v10 = vunpack.c.h.s8.bf16 %v8363_v60  ;;  %v8395_v12 = vld [vmem:[%s10256_s3 + $0x2fc] sm:$0x3f] }
  0xc0   :  { %2559 = vmatprep.subr.bf16.mxu0 %v6843_v21  ;;  %2731 = vmatprep.subr.bf16.mxu1 %v6845_v22  ;;  %v256_v21 = vld [vmem:[%s10256_s3 + $0x524] sm:$0xff]  ;;  %v258_v22 = vld [vmem:[%s10256_s3 + $0x532] sm:$0xff]  ;;  %v6893_v44 = vcombine.low %v633_v19, %v637_v20  ;;  %v6908_v20 = vcombine.high %v649_v1, %v653_v2 }
  0xc1   :  { %v640_v30 = vunpack.c.l.s8.bf16 %v256_v21  ;;  %v641_v32 = vunpack.c.h.s8.bf16 %v256_v21  ;;  %v645_v33 = vunpack.c.h.s8.bf16 %v258_v22  ;;  %v8426_v21 = vld [vmem:[%s10256_s3 + $0x32] sm:$0x3f] }
  0xc3   :  { %2560 = vmatpush1.bf16.msra.mxu0 %v6842_v27  ;;  %2732 = vmatpush1.bf16.msra.mxu1 %v6844_v28  ;;  %v6892_v27 = vcombine.high %v632_v13, %v636_v14  ;;  %v458_v28 = vunpack.c.l.s8.bf16 %v8292_v24  ;;  %v8400_v13 = vld [vmem:[%s10256_s3 + $0x30a] sm:$0x3f]  ;;  %v8405_v14 = vld [vmem:[%s10256_s3 + $0x24] sm:$0x3f] }
  0xc4   :  { %2561 = vmatprep.subr.bf16.mxu0 %v6850_v29  ;;  %2733 = vmatprep.subr.bf16.mxu1 %v6852_v31  ;;  %v462_v29 = vunpack.c.l.s8.bf16 %v8297_v25  ;;  %v644_v31 = vunpack.c.l.s8.bf16 %v258_v22  ;;  %v275_v22 = vunpack.c.h.s8.bf16 %v8405_v14 }
  0xc6   :  { %v8318_v39 = vcombine.low %v458_v28, %v462_v29 }
  0xc7   :  { %2562 = vmatpush1.bf16.msra.mxu0 %v6849_v37  ;;  %2734 = vmatpush1.bf16.msra.mxu1 %v6851_v38  ;;  %v8314_v37 = vld [vmem:[%s10256_s3 + $0xe8] sm:$0x3f]  ;;  %v8316_v38 = vcombine.high %v458_v28, %v462_v29 }
  0xc8   :  { %2563 = vmatprep.subr.bf16.mxu0 %v6857_v41  ;;  %2735 = vmatprep.subr.bf16.mxu1 %v6859_v42  ;;  %10279 = vst [vmem:[#allocation9_spill] sm:$0xff] %v8318_v39  ;;  %v8328_v41 = vld [vmem:[%s10256_s3 + $0x2c4] sm:$0x3f]  ;;  %v8333_v42 = vld [vmem:[%s10256_s3 + $0x2d2] sm:$0x3f] }
  0xc9   :  { %10278 = vst [vmem:[#allocation8_spill] sm:$0xff] %v8316_v38  ;;  %v466_v45 = vunpack.c.l.s8.bf16 %v8328_v41  ;;  %v470_v46 = vunpack.c.l.s8.bf16 %v8333_v42  ;;  %v8628_v39 = vld [vmem:[%s10256_s3 + $0x388] sm:$0x3f]  ;;  %v8656_v38 = vld [vmem:[%s10256_s3 + $0xb0] sm:$0x3f] }
  0xcb   :  { %2564 = vmatpush1.bf16.msra.mxu0 %v6856_v47  ;;  %2736 = vmatpush1.bf16.msra.mxu1 %v6858_v48  ;;  %v6899_v47 = vcombine.high %v640_v30, %v644_v31  ;;  %v6901_v48 = vcombine.high %v641_v32, %v645_v33  ;;  %v8341_v53 = vcombine.high %v466_v45, %v470_v46 }
  0xcc   :  { %2565 = vmatprep.subr.bf16.mxu0 %v6864_v49  ;;  %2737 = vmatprep.subr.bf16.mxu1 %v6866_v51  ;;  %v648_v49 = vunpack.c.l.s8.bf16 %v8304_v35  ;;  %v331_v51 = vunpack.c.h.s8.bf16 %v8314_v37  ;;  %v8343_v54 = vcombine.low %v466_v45, %v470_v46 }
  0xcd   :  { %10280 = vst [vmem:[#allocation10_spill] sm:$0xff] %v8341_v53 }
  0xce   :  { %10281 = vst [vmem:[#allocation11_spill] sm:$0xff] %v8343_v54  ;;  %v6906_v0 = vcombine.high %v648_v49, %v652_v50  ;;  %v6631_v6 = vcombine.low %v331_v51, %v335_v52  ;;  %v6905_v19 = vcombine.low %v648_v49, %v652_v50 }
  0xcf   :  { %2566 = vmatpush1.bf16.msra.mxu0 %v6863_v57  ;;  %2738 = vmatpush1.bf16.msra.mxu1 %v6865_v58  ;;  %v6898_v57 = vcombine.low %v640_v30, %v644_v31  ;;  %v6900_v58 = vcombine.low %v641_v32, %v645_v33  ;;  %v8439_v32 = vld [vmem:[%s10256_s3 + $0x318] sm:$0x3f]  ;;  %v8444_v33 = vld [vmem:[%s10256_s3 + $0x326] sm:$0x3f] }
  0xd0   :  { %2567 = vmatprep.subr.bf16.mxu0 %v6871_v61  ;;  %2739 = vmatprep.subr.bf16.mxu1 %v6873_v62  ;;  %v8368_v61 = vld [vmem:[%s10256_s3 + $0x112] sm:$0x3f]  ;;  %v474_v62 = vunpack.c.l.s8.bf16 %v8348_v55  ;;  %v490_v45 = vunpack.c.l.s8.bf16 %v8439_v32  ;;  %v494_v46 = vunpack.c.l.s8.bf16 %v8444_v33 }
  0xd1   :  { %v343_v11 = vunpack.c.h.s8.bf16 %v8368_v61 }
  0xd2   :  { %v8381_v7 = vcombine.high %v474_v62, %v478_v63  ;;  %v8383_v8 = vcombine.low %v474_v62, %v478_v63  ;;  %v8473_v52 = vcombine.high %v490_v45, %v494_v46 }
  0xd3   :  { %2568 = vmatpush1.bf16.msra.mxu0 %v6870_v3  ;;  %2740 = vmatpush1.bf16.msra.mxu1 %v6872_v4  ;;  %v8377_v3 = vld [vmem:[%s10256_s3 + $0x16] sm:$0x3f]  ;;  %v267_v4 = vunpack.c.h.s8.bf16 %v8358_v59  ;;  %v6638_v29 = vcombine.low %v339_v10, %v343_v11  ;;  %v8508_v11 = vld [vmem:[%s10256_s3 + $0x166] sm:$0x3f] }
  0xd4   :  { %2569 = vmatprep.subr.bf16.mxu0 %v6878_v5  ;;  %2741 = vmatprep.subr.bf16.mxu1 %v6880_v9  ;;  %v271_v5 = vunpack.c.h.s8.bf16 %v8377_v3  ;;  %10282 = vst [vmem:[#allocation12_spill] sm:$0xff] %v8381_v7  ;;  %10283 = vst [vmem:[#allocation13_spill] sm:$0xff] %v8383_v8  ;;  %v8388_v9 = vld [vmem:[%s10254_s1 + $0x10] ss:$28 sps:$4 sm:$0xff]   ;;  %v8503_v10 = vld [vmem:[%s10256_s3 + $0x158] sm:$0x3f] }
  0xd5   :  { %10284 = vst [vmem:[#allocation14_spill] sm:$0xff] %v8388_v9  ;;  %10287 = vst [vmem:[#allocation17_spill] sm:$0xff] %v8473_v52 }
  0xd7   :  { %2570 = vmatpush1.bf16.msra.mxu0 %v6877_v15  ;;  %2742 = vmatpush1.bf16.msra.mxu1 %v6879_v16  ;;  %v8410_v15 = vld [vmem:[%s10256_s3 + $0x120] sm:$0x3f]  ;;  %v8415_v16 = vld [vmem:[%s10256_s3 + $0x12e] sm:$0x3f] }
  0xd8   :  { %2571 = vmatprep.subr.bf16.mxu0 %v6885_v17  ;;  %2743 = vmatprep.subr.bf16.mxu1 %v6887_v18  ;;  %v482_v17 = vunpack.c.l.s8.bf16 %v8395_v12  ;;  %v486_v18 = vunpack.c.l.s8.bf16 %v8400_v13  ;;  %v347_v30 = vunpack.c.h.s8.bf16 %v8410_v15  ;;  %v351_v31 = vunpack.c.h.s8.bf16 %v8415_v16 }
  0xda   :  { %v8432_v28 = vcombine.low %v482_v17, %v486_v18 }
  0xdb   :  { %2572 = vmatpush1.bf16.msra.mxu0 %v6884_v23  ;;  %2744 = vmatpush1.bf16.msra.mxu1 %v6886_v26  ;;  %v279_v23 = vunpack.c.h.s8.bf16 %v8426_v21  ;;  %v6575_v26 = vcombine.low %v267_v4, %v271_v5  ;;  %v8488_v4 = vld [vmem:[%s10256_s3 + $0x334] sm:$0x3f]  ;;  %v8493_v5 = vld [vmem:[%s10256_s3 + $0x342] sm:$0x3f] }
  0xdc   :  { %2573 = vmatprep.subr.bf16.mxu0 %v6892_v27  ;;  %2745 = vmatprep.subr.bf16.mxu1 %v6894_v34  ;;  %v8430_v27 = vcombine.high %v482_v17, %v486_v18  ;;  %10286 = vst [vmem:[#allocation16_spill] sm:$0xff] %v8432_v28  ;;  %v8451_v34 = vld [vmem:[%s10256_s3 + $0x40] sm:$0x3f]  ;;  %v498_v17 = vunpack.c.l.s8.bf16 %v8488_v4  ;;  %v502_v18 = vunpack.c.l.s8.bf16 %v8493_v5 }
  0xdd   :  { %v283_v49 = vunpack.c.h.s8.bf16 %v8451_v34  ;;  %v6582_v51 = vcombine.low %v275_v22, %v279_v23  ;;  %v8517_v22 = vld [vmem:[%s10256_s3 + $0x6a] sm:$0x3f] }
  0xde   :  { %10285 = vst [vmem:[#allocation15_spill] sm:$0xff] %v8430_v27 }
  0xdf   :  { %2574 = vmatpush1.bf16.msra.mxu0 %v6891_v43  ;;  %2746 = vmatpush1.bf16.msra.mxu1 %v6893_v44  ;;  %v8456_v43 = vld [vmem:[%s10256_s3 + $0x13c] sm:$0x3f]  ;;  %v8461_v44 = vld [vmem:[%s10256_s3 + $0x14a] sm:$0x3f] }
  0xe0   :  { %2575 = vmatprep.subr.bf16.mxu0 %v6899_v47  ;;  %2747 = vmatprep.subr.bf16.mxu1 %v6901_v48  ;;  %v10262_v47 = vmov 0   ;;  %v8469_v48 = vld [vmem:[%s10256_s3 + $0x4e] sm:$0x3f]  ;;  %v355_v62 = vunpack.c.h.s8.bf16 %v8456_v43  ;;  %v359_v63 = vunpack.c.h.s8.bf16 %v8461_v44 }
  0xe1   :  { %v287_v50 = vunpack.c.h.s8.bf16 %v8469_v48 }
  0xe3   :  { %2576 = vmatpush1.bf16.msra.mxu0 %v6898_v57  ;;  %2748 = vmatpush1.bf16.msra.mxu1 %v6900_v58  ;;  %v8475_v57 = vcombine.low %v490_v45, %v494_v46  ;;  %v6645_v58 = vcombine.low %v347_v30, %v351_v31  ;;  %v8521_v30 = vcombine.high %v498_v17, %v502_v18  ;;  %v8528_v45 = vld [vmem:[%s10254_s1 + $0x18] ss:$28 sps:$4 sm:$0xff]  }
  0xe4   :  { %2588 = vmatprep.subr.bf16.mxu0 %v6906_v0  ;;  %7265 = vmatprep.subr.bf16.mxu1 %v6631_v6  ;;  %v8482_v0 = vld [vmem:[%s10254_s1 + $0x4] ss:$28 sps:$4 sm:$0xff]   ;;  %v8523_v31 = vcombine.low %v498_v17, %v502_v18  ;;  %10291 = vst [vmem:[#allocation21_spill] sm:$0xff] %v8528_v45  ;;  %v6652_v46 = vcombine.low %v355_v62, %v359_v63 }
  0xe5   :  { %10288 = vst [vmem:[#allocation18_spill] sm:$0xff] %v8475_v57  ;;  %v8498_v6 = vld [vmem:[%s10256_s3 + $0x5c] sm:$0x3f]  ;;  %10289 = vst [vmem:[#allocation19_spill] sm:$0xff] %v8521_v30  ;;  %v8555_v62 = vld [vmem:[%s10256_s3 + $0x182] sm:$0x3f]  ;;  %v6907_v18 = vcombine.low %v649_v1, %v653_v2 }
  0xe6   :  { %2578 = vmatmul.mubr.bf16.vlgmr.msra.gmra.mrb[0].mxu0 %v8388_v9  ;;  %2750 = vmatmul.mubr.bf16.vlgmr.msra.gmra.mrb[0].mxu1 %v8388_v9  ;;  %v291_v23 = vunpack.c.h.s8.bf16 %v8498_v6  ;;  %10290 = vst [vmem:[#allocation20_spill] sm:$0xff] %v8523_v31  ;;  %10292 = vst [vmem:[#allocation22_spill] sm:$0xff] %v8555_v62  ;;  %v10293_v31 = vunpack.c.l.s8.bf16 %v8358_v59  ;;  %v8570_v57 = vld [vmem:[%s10256_s3 + $0x86] sm:$0x3f]  ;;  %v8661_v9 = vld [vmem:[%s10256_s3 + $0xbe] sm:$0x3f] }
  0xe7   :  { %2589 = vmatpush1.bf16.msra.mxu0 %v6905_v19  ;;  %2620 = vmatprep.mubr.bf16.mxu0 %v10262_v47  ;;  %v363_v47 = vunpack.c.h.s8.bf16 %v8503_v10  ;;  %v367_v19 = vunpack.c.h.s8.bf16 %v8508_v11  ;;  %v303_v28 = vunpack.c.h.s8.bf16 %v8570_v57 }
  0xe8   :  { %2760 = vmatprep.subr.bf16.mxu0 %v6908_v20  ;;  %7266 = vmatpush3.bf16.msra.mxu1 %v6575_v26  ;;  %v10264_v20 = vunpack.c.l.s8.bf16 %v8377_v3  ;;  %v295_v26 = vunpack.c.h.s8.bf16 %v8517_v22 }
  0xe9   :  { %7267 = vmatprep.subr.bf16.mxu1 %v6638_v29  ;;  %3007 = vmatprep.mubr.bf16.mxu1 %v8482_v0  ;;  %v6589_v29 = vcombine.low %v283_v49, %v287_v50  ;;  %v8540_v49 = vld [vmem:[%s10256_s3 + $0x35e] sm:$0x3f]  ;;  %v8545_v50 = vld [vmem:[%s10256_s3 + $0x78] sm:$0x3f]  ;;  %v6659_v1 = vcombine.low %v363_v47, %v367_v19  ;;  %v8600_v19 = vld [vmem:[%s10256_s3 + $0x190] sm:$0x3f] }
  0xea   :  { %v510_v17 = vunpack.c.l.s8.bf16 %v8540_v49  ;;  %v6574_v30 = vcombine.high %v10293_v31, %v10264_v20  ;;  %v299_v52 = vunpack.c.h.s8.bf16 %v8545_v50  ;;  %v6596_v27 = vcombine.low %v291_v23, %v295_v26  ;;  %v8583_v20 = vld [vmem:[%s10256_s3 + $0x36c] sm:$0x3f]  ;;  %v8595_v47 = vld [vmem:[%s10256_s3 + $0x94] sm:$0x3f]  ;;  %10296 = vst [vmem:[#allocation25_spill] sm:$0xff] %v8600_v19 }
  0xeb   :  { %v375_v31 = vunpack.c.h.s8.bf16 %v8555_v62  ;;  %v8605_v23 = vld [vmem:[%s10256_s3 + $0x19e] sm:$0x3f]  ;;  %v514_v26 = vunpack.c.l.s8.bf16 %v8583_v20  ;;  %v307_v8 = vunpack.c.h.s8.bf16 %v8595_v47  ;;  %v8677_v62 = vld [vmem:[%s10256_s3 + $0x3b2] sm:$0x3f] }
  0xec   :  { %7268 = vmatpush3.bf16.msra.mxu1 %v6582_v51  ;;  %v8535_v51 = vld [vmem:[%s10256_s3 + $0x350] sm:$0x3f]  ;;  %10297 = vst [vmem:[#allocation26_spill] sm:$0xff] %v8605_v23  ;;  %v6603_v54 = vcombine.low %v299_v52, %v303_v28  ;;  %v8643_v52 = vld [vmem:[%s10256_s3 + $0x1ba] sm:$0x3f] }
  0xed   :  { %7269 = vmatprep.subr.bf16.mxu1 %v6645_v58  ;;  %v8550_v58 = vld [vmem:[%s10256_s3 + $0x174] sm:$0x3f]  ;;  %v506_v63 = vunpack.c.l.s8.bf16 %v8535_v51  ;;  %v8638_v28 = vld [vmem:[%s10256_s3 + $0x1ac] sm:$0x3f]  ;;  %10301 = vst [vmem:[#allocation29_spill] sm:$0xff] %v8643_v52 }
  0xee   :  { %v371_v2 = vunpack.c.h.s8.bf16 %v8550_v58 }
  0xef   :  { %v8574_v36 = vcombine.high %v506_v63, %v510_v17  ;;  %v8576_v35 = vcombine.low %v506_v63, %v510_v17  ;;  %v10298_v63 = vmov 0   ;;  %v274_v17 = vunpack.c.l.s8.bf16 %v8405_v14 }
  0xf0   :  { %7270 = vmatpush3.bf16.msra.mxu1 %v6589_v29  ;;  %v8588_v29 = vld [vmem:[%s10256_s3 + $0x37a] sm:$0x3f]  ;;  %v6666_v14 = vcombine.low %v371_v2, %v375_v31  ;;  %v10302_v2 = vunpack.c.l.s8.bf16 %v8377_v3  ;;  %v10303_v31 = vunpack.c.l.s8.bf16 %v8358_v59  ;;  %v315_v3 = vunpack.c.h.s8.bf16 %v8656_v38 }
  0xf1   :  { %10294 = vst [vmem:[#allocation23_spill] sm:$0xff] %v8574_v36  ;;  %10295 = vst [vmem:[#allocation24_spill] sm:$0xff] %v8576_v35  ;;  %7271 = vmatprep.subr.bf16.mxu1 %v6652_v46  ;;  %v518_v46 = vunpack.c.l.s8.bf16 %v8588_v29  ;;  %v278_v35 = vunpack.c.l.s8.bf16 %v8426_v21  ;;  %v8615_v36 = vld [vmem:[%s10256_s3 + $0xa2] sm:$0x3f]  ;;  %v379_v21 = vunpack.c.h.s8.bf16 %v8600_v19  ;;  %v319_v59 = vunpack.c.h.s8.bf16 %v8661_v9 }
  0xf2   :  { %6912 = vmatmul.mubr.msk.bf16.vlgmr.msra.gmra.mrb[0].mxu0 %vm2455_vm0, %v8528_v45  ;;  %v311_v7 = vunpack.c.h.s8.bf16 %v8615_v36  ;;  %v8672_v19 = vld [vmem:[%s10256_s3 + $0x3a4] sm:$0x3f] }
  0xf3   :  { %2761 = vmatpush1.bf16.msra.mxu0 %v6907_v18  ;;  %2792 = vmatprep.mubr.bf16.mxu0 %v10298_v63  ;;  %v8619_v53 = vcombine.high %v514_v26, %v518_v46  ;;  %v8621_v18 = vcombine.low %v514_v26, %v518_v46  ;;  %v383_v63 = vunpack.c.h.s8.bf16 %v8605_v23  ;;  %v6573_v26 = vcombine.low %v10303_v31, %v10302_v2 }
  0xf4   :  { %2803 = vmatprep.subr.bf16.mxu0 %v6574_v30  ;;  %7272 = vmatpush3.bf16.msra.mxu1 %v6596_v27  ;;  %v8633_v27 = vld [vmem:[%s10256_s3 + $0x396] sm:$0x3f]  ;;  %v522_v30 = vunpack.c.l.s8.bf16 %v8628_v39  ;;  %v6581_v46 = vcombine.high %v274_v17, %v278_v35  ;;  %v6610_v2 = vcombine.low %v307_v8, %v311_v7  ;;  %v391_v23 = vunpack.c.h.s8.bf16 %v8643_v52  ;;  %v8686_v8 = vld [vmem:[%s10256_s3 + $0xcc] sm:$0x3f] }
  0xf5   :  { %10299 = vst [vmem:[#allocation27_spill] sm:$0xff] %v8619_v53  ;;  %10300 = vst [vmem:[#allocation28_spill] sm:$0xff] %v8621_v18  ;;  %7273 = vmatprep.subr.bf16.mxu1 %v6659_v1  ;;  %v526_v1 = vunpack.c.l.s8.bf16 %v8633_v27  ;;  %v282_v18 = vunpack.c.l.s8.bf16 %v8451_v34  ;;  %v286_v53 = vunpack.c.l.s8.bf16 %v8469_v48  ;;  %v6673_v34 = vcombine.low %v379_v21, %v383_v63 }
  0xf6   :  { %v387_v48 = vunpack.c.h.s8.bf16 %v8638_v28  ;;  %v6580_v7 = vcombine.low %v274_v17, %v278_v35  ;;  %v530_v63 = vunpack.c.l.s8.bf16 %v8672_v19  ;;  %v323_v35 = vunpack.c.h.s8.bf16 %v8686_v8 }
  0xf7   :  { %v8665_v31 = vcombine.high %v522_v30, %v526_v1  ;;  %v6588_v21 = vcombine.high %v282_v18, %v286_v53  ;;  %v6587_v52 = vcombine.low %v282_v18, %v286_v53  ;;  %v8735_v53 = vld [vmem:[%s10256_s3 + $0x1e4] sm:$0x3f] }
  0xf8   :  { %7274 = vmatpush3.bf16.msra.mxu1 %v6603_v54  ;;  %v8679_v54 = vcombine.low %v522_v30, %v526_v1  ;;  %v294_v30 = vunpack.c.l.s8.bf16 %v8517_v22  ;;  %v8695_v1 = vld [vmem:[%s10256_s3 + $0xda] sm:$0x3f] }
  0xf9   :  { %10304 = vst [vmem:[#allocation30_spill] sm:$0xff] %v8665_v31  ;;  %7275 = vmatprep.subr.bf16.mxu1 %v6666_v14  ;;  %v534_v14 = vunpack.c.l.s8.bf16 %v8677_v62  ;;  %v290_v31 = vunpack.c.l.s8.bf16 %v8498_v6  ;;  %v327_v17 = vunpack.c.h.s8.bf16 %v8695_v1  ;;  %v8703_v6 = vld [vmem:[%s10256_s3 + $0x1c8] sm:$0x3f]  ;;  %v8708_v22 = vld [vmem:[%s10256_s3 + $0x1d6] sm:$0x3f] }
  0xfa   :  { %10305 = vst [vmem:[#allocation31_spill] sm:$0xff] %v8679_v54  ;;  %6913 = vmatmul.mubr.msk.bf16.vlgmr.msra.gmra.mrb[4].mxu0 %vm2455_vm0, %v8528_v45  ;;  %v6617_v54 = vcombine.low %v315_v3, %v319_v59  ;;  %v463_v3 = vunpack.c.h.s8.bf16 %v8297_v25  ;;  %v8719_v59 = vld [vmem:[%s10256_s3 + $0x3c0] sm:$0x3f]  ;;  %v302_v25 = vunpack.c.l.s8.bf16 %v8570_v57  ;;  %v467_v57 = vunpack.c.h.s8.bf16 %v8328_v41 }
  0xfb   :  { %2804 = vmatpush1.bf16.msra.mxu0 %v6573_v26  ;;  %2835 = vmatprep.mubr.bf16.mxu0 %v8482_v0  ;;  %v8710_v26 = vcombine.high %v530_v63, %v534_v14  ;;  %v8712_v45 = vcombine.low %v530_v63, %v534_v14  ;;  %v6680_v0 = vcombine.low %v387_v48, %v391_v23  ;;  %v298_v63 = vunpack.c.l.s8.bf16 %v8545_v50 }
  0xfc   :  { %2805 = vmatprep.subr.bf16.mxu0 %v6581_v46  ;;  %7276 = vmatpush3.bf16.msra.mxu1 %v6610_v2  ;;  %v459_v46 = vunpack.c.h.s8.bf16 %v8292_v24  ;;  %v8724_v2 = vld [vmem:[%s10256_s3 + $0x3ce] sm:$0x3f]  ;;  %v6595_v24 = vcombine.high %v290_v31, %v294_v30  ;;  %v395_v48 = vunpack.c.h.s8.bf16 %v8703_v6  ;;  %v399_v14 = vunpack.c.h.s8.bf16 %v8708_v22 }
  0xfd   :  { %10306 = vst [vmem:[#allocation32_spill] sm:$0xff] %v8710_v26  ;;  %10307 = vst [vmem:[#allocation33_spill] sm:$0xff] %v8712_v45  ;;  %7277 = vmatprep.subr.bf16.mxu1 %v6673_v34  ;;  %v538_v34 = vunpack.c.l.s8.bf16 %v8719_v59  ;;  %v542_v23 = vunpack.c.l.s8.bf16 %v8724_v2  ;;  %v6624_v45 = vcombine.low %v323_v35, %v327_v17  ;;  %v471_v26 = vunpack.c.h.s8.bf16 %v8333_v42  ;;  %v8756_v35 = vld [vmem:[%s10256_s3 + $0x3ea] sm:$0x3f] }
  0xfe   :  { %v6594_v17 = vcombine.low %v290_v31, %v294_v30  ;;  %v550_v42 = vunpack.c.l.s8.bf16 %v8756_v35  ;;  %v8767_v31 = vld [vmem:[%s10256_s3 + $0x200] sm:$0x3f]  ;;  %v475_v30 = vunpack.c.h.s8.bf16 %v8348_v55 }
  0xff   :  { %2806 = vmatpush1.bf16.msra.mxu0 %v6580_v7  ;;  %v8737_v50 = vcombine.high %v538_v34, %v542_v23  ;;  %v8739_v18 = vcombine.low %v538_v34, %v542_v23  ;;  %v6743_v7 = vcombine.low %v459_v46, %v463_v3  ;;  %v306_v46 = vunpack.c.l.s8.bf16 %v8595_v47 }
 0x100   :  { %2807 = vmatprep.subr.bf16.mxu0 %v6588_v21  ;;  %7278 = vmatpush3.bf16.msra.mxu1 %v6617_v54  ;;  %v8746_v54 = vld [vmem:[%s10256_s3 + $0x1f2] sm:$0x3f]  ;;  %v8751_v21 = vld [vmem:[%s10256_s3 + $0x3dc] sm:$0x3f]  ;;  %v310_v3 = vunpack.c.l.s8.bf16 %v8615_v36  ;;  %v6687_v34 = vcombine.low %v395_v48, %v399_v14  ;;  %v403_v23 = vunpack.c.h.s8.bf16 %v8735_v53  ;;  %v8788_v14 = vld [vmem:[%s10256_s3 + $0x406] sm:$0x3f] }
 0x101   :  { %10308 = vst [vmem:[#allocation34_spill] sm:$0xff] %v8737_v50  ;;  %10309 = vst [vmem:[#allocation35_spill] sm:$0xff] %v8739_v18  ;;  %7279 = vmatprep.subr.bf16.mxu1 %v6680_v0  ;;  %v546_v41 = vunpack.c.l.s8.bf16 %v8751_v21  ;;  %v6602_v0 = vcombine.high %v298_v63, %v302_v25  ;;  %v407_v18 = vunpack.c.h.s8.bf16 %v8746_v54  ;;  %v8783_v48 = vld [vmem:[%s10256_s3 + $0x3f8] sm:$0x3f]  ;;  %v6601_v50 = vcombine.low %v298_v63, %v302_v25 }
 0x102   :  { %v6609_v55 = vcombine.high %v306_v46, %v310_v3  ;;  %v8805_v25 = vld [vmem:[%s10256_s3 + $0x21c] sm:$0x3f] }
 0x103   :  { %2808 = vmatpush1.bf16.msra.mxu0 %v6587_v52  ;;  %v8772_v52 = vld [vmem:[%s10256_s3 + $0x20e] sm:$0x3f]  ;;  %v8774_v47 = vcombine.high %v546_v41, %v550_v42  ;;  %v8776_v36 = vcombine.low %v546_v41, %v550_v42  ;;  %v314_v41 = vunpack.c.l.s8.bf16 %v8656_v38  ;;  %v411_v42 = vunpack.c.h.s8.bf16 %v8767_v31 }
 0x104   :  { %2809 = vmatprep.subr.bf16.mxu0 %v6595_v24  ;;  %7280 = vmatpush3.bf16.msra.mxu1 %v6624_v45  ;;  %v6750_v45 = vcombine.low %v467_v57, %v471_v26  ;;  %v479_v24 = vunpack.c.h.s8.bf16 %v8353_v56  ;;  %v558_v26 = vunpack.c.l.s8.bf16 %v8788_v14  ;;  %v318_v56 = vunpack.c.l.s8.bf16 %v8661_v9  ;;  %v8797_v57 = vld [vmem:[%s10254_s1] ss:$28 sps:$4 sm:$0xff]  }
 0x105   :  { %10310 = vst [vmem:[#allocation36_spill] sm:$0xff] %v8774_v47  ;;  %10311 = vst [vmem:[#allocation37_spill] sm:$0xff] %v8776_v36  ;;  %7287 = vmatprep.subr.bf16.mxu1 %v6743_v7  ;;  %v554_v7 = vunpack.c.l.s8.bf16 %v8783_v48  ;;  %v415_v63 = vunpack.c.h.s8.bf16 %v8772_v52  ;;  %v6694_v38 = vcombine.low %v403_v23, %v407_v18  ;;  %v483_v47 = vunpack.c.h.s8.bf16 %v8395_v12  ;;  %v8821_v18 = vld [vmem:[%s10254_s1 + $0xc] ss:$28 sps:$4 sm:$0xff]   ;;  %v8832_v12 = vld [vmem:[%s10256_s3 + $0x422] sm:$0x3f] }
 0x106   :  { %10312 = vst [vmem:[#allocation38_spill] sm:$0xff] %v8797_v57  ;;  %v6757_v36 = vcombine.low %v475_v30, %v479_v24  ;;  %v326_v23 = vunpack.c.l.s8.bf16 %v8695_v1  ;;  %v566_v30 = vunpack.c.l.s8.bf16 %v8832_v12  ;;  %v6608_v24 = vcombine.low %v306_v46, %v310_v3  ;;  %v8848_v1 = vld [vmem:[%s10256_s3 + $0x246] sm:$0x3f] }
 0x107   :  { %2810 = vmatpush1.bf16.msra.mxu0 %v6594_v17  ;;  %3008 = vmatmul.mubr.bf16.vlgmr.msra.gmra.mrb[4].mxu1 %v8797_v57  ;;  %v8807_v9 = vcombine.high %v554_v7, %v558_v26  ;;  %v8809_v17 = vcombine.low %v554_v7, %v558_v26  ;;  %v487_v57 = vunpack.c.h.s8.bf16 %v8400_v13  ;;  %v322_v13 = vunpack.c.l.s8.bf16 %v8686_v8  ;;  %v8843_v8 = vld [vmem:[%s10256_s3 + $0x238] sm:$0x3f]  ;;  %10316 = vst [vmem:[#allocation42_spill] sm:$0xff] %v8848_v1 }
 0x108   :  { %2811 = vmatprep.subr.bf16.mxu0 %v6602_v0  ;;  %7288 = vmatpush3.bf16.msra.mxu1 %v6687_v34  ;;  %v8816_v0 = vld [vmem:[%s10256_s3 + $0x22a] sm:$0x3f]  ;;  %v8827_v34 = vld [vmem:[%s10256_s3 + $0x414] sm:$0x3f]  ;;  %v6616_v7 = vcombine.high %v314_v41, %v318_v56  ;;  %v6701_v26 = vcombine.low %v411_v42, %v415_v63  ;;  %v495_v42 = vunpack.c.h.s8.bf16 %v8444_v33  ;;  %v334_v33 = vunpack.c.l.s8.bf16 %v8323_v40 }
 0x109   :  { %10313 = vst [vmem:[#allocation39_spill] sm:$0xff] %v8807_v9  ;;  %10314 = vst [vmem:[#allocation40_spill] sm:$0xff] %v8809_v17  ;;  %7289 = vmatprep.subr.bf16.mxu1 %v6750_v45  ;;  %3048 = vmatprep.mubr.bf16.mxu1 %v8821_v18  ;;  %v562_v45 = vunpack.c.l.s8.bf16 %v8827_v34  ;;  %v419_v17 = vunpack.c.h.s8.bf16 %v8805_v25  ;;  %v423_v9 = vunpack.c.h.s8.bf16 %v8816_v0  ;;  %v6764_v3 = vcombine.low %v483_v47, %v487_v57  ;;  %v8859_v63 = vld [vmem:[%s10256_s3 + $0x430] sm:$0x3f] }
 0x10a   :  { %10315 = vst [vmem:[#allocation41_spill] sm:$0xff] %v8816_v0  ;;  %v6615_v0 = vcombine.low %v314_v41, %v318_v56  ;;  %v431_v57 = vunpack.c.h.s8.bf16 %v8848_v1  ;;  %v8875_v41 = vld [vmem:[%s10256_s3 + $0x254] sm:$0x3f]  ;;  %v499_v40 = vunpack.c.h.s8.bf16 %v8488_v4  ;;  %v511_v1 = vunpack.c.h.s8.bf16 %v8540_v49 }
 0x10b   :  { %2812 = vmatpush1.bf16.msra.mxu0 %v6601_v50  ;;  %v8850_v50 = vcombine.high %v562_v45, %v566_v30  ;;  %v8852_v46 = vcombine.low %v562_v45, %v566_v30  ;;  %v570_v45 = vunpack.c.l.s8.bf16 %v8859_v63  ;;  %v6708_v30 = vcombine.low %v419_v17, %v423_v9  ;;  %v8891_v9 = vld [vmem:[%s10256_s3 + $0x44c] sm:$0x3f]  ;;  %v8896_v17 = vld [vmem:[%s10256_s3 + $0x45a] sm:$0x3f] }
 0x10c   :  { %2813 = vmatprep.subr.bf16.mxu0 %v6609_v55  ;;  %7290 = vmatpush3.bf16.msra.mxu1 %v6694_v38  ;;  %v491_v55 = vunpack.c.h.s8.bf16 %v8439_v32  ;;  %v8864_v38 = vld [vmem:[%s10256_s3 + $0x43e] sm:$0x3f]  ;;  %v330_v32 = vunpack.c.l.s8.bf16 %v8314_v37  ;;  %v578_v4 = vunpack.c.l.s8.bf16 %v8891_v9 }
 0x10d   :  { %10317 = vst [vmem:[#allocation43_spill] sm:$0xff] %v8850_v50  ;;  %10318 = vst [vmem:[#allocation44_spill] sm:$0xff] %v8852_v46  ;;  %7291 = vmatprep.subr.bf16.mxu1 %v6757_v36  ;;  %v6623_v50 = vcombine.high %v322_v13, %v326_v23  ;;  %v574_v47 = vunpack.c.l.s8.bf16 %v8864_v38  ;;  %v427_v36 = vunpack.c.h.s8.bf16 %v8843_v8 }
 0x10e   :  { %v6771_v37 = vcombine.low %v491_v55, %v495_v42  ;;  %v338_v55 = vunpack.c.l.s8.bf16 %v8363_v60  ;;  %v342_v42 = vunpack.c.l.s8.bf16 %v8368_v61  ;;  %v8913_v60 = vld [vmem:[%s10256_s3 + $0x270] sm:$0x3f]  ;;  %v8918_v61 = vld [vmem:[%s10256_s3 + $0x27e] sm:$0x3f] }
 0x10f   :  { %2814 = vmatpush1.bf16.msra.mxu0 %v6608_v24  ;;  %v8877_v56 = vcombine.high %v570_v45, %v574_v47  ;;  %v8879_v46 = vcombine.low %v570_v45, %v574_v47  ;;  %v503_v24 = vunpack.c.h.s8.bf16 %v8493_v5  ;;  %v582_v5 = vunpack.c.l.s8.bf16 %v8896_v17 }
 0x110   :  { %2815 = vmatprep.subr.bf16.mxu0 %v6616_v7  ;;  %7292 = vmatpush3.bf16.msra.mxu1 %v6701_v26  ;;  %v8886_v7 = vld [vmem:[%s10256_s3 + $0x262] sm:$0x3f]  ;;  %v6622_v26 = vcombine.low %v322_v13, %v326_v23  ;;  %v6715_v45 = vcombine.low %v427_v36, %v431_v57  ;;  %v435_v47 = vunpack.c.h.s8.bf16 %v8875_v41  ;;  %v346_v36 = vunpack.c.l.s8.bf16 %v8410_v15  ;;  %v8929_v15 = vld [vmem:[%s10256_s3 + $0x28c] sm:$0x3f] }
 0x111   :  { %10319 = vst [vmem:[#allocation45_spill] sm:$0xff] %v8877_v56  ;;  %10320 = vst [vmem:[#allocation46_spill] sm:$0xff] %v8879_v46  ;;  %7293 = vmatprep.subr.bf16.mxu1 %v6764_v3  ;;  %v6630_v3 = vcombine.high %v330_v32, %v334_v33  ;;  %v439_v46 = vunpack.c.h.s8.bf16 %v8886_v7  ;;  %v8904_v56 = vcombine.high %v578_v4, %v582_v5  ;;  %v350_v57 = vunpack.c.l.s8.bf16 %v8415_v16  ;;  %v8934_v16 = vld [vmem:[%s10256_s3 + $0x29a] sm:$0x3f] }
 0x112   :  { %v8906_v13 = vcombine.low %v578_v4, %v582_v5  ;;  %v6778_v23 = vcombine.low %v499_v40, %v503_v24  ;;  %v515_v24 = vunpack.c.h.s8.bf16 %v8583_v20  ;;  %v519_v4 = vunpack.c.h.s8.bf16 %v8588_v29  ;;  %v8944_v20 = vld [vmem:[%s10256_s3 + $0x476] sm:$0x3f] }
 0x113   :  { %2816 = vmatpush1.bf16.msra.mxu0 %v6615_v0  ;;  %v507_v0 = vunpack.c.h.s8.bf16 %v8535_v51  ;;  %v6637_v51 = vcombine.high %v338_v55, %v342_v42  ;;  %v6722_v49 = vcombine.low %v435_v47, %v439_v46  ;;  %v8939_v46 = vld [vmem:[%s10256_s3 + $0x468] sm:$0x3f]  ;;  %v6636_v29 = vcombine.low %v338_v55, %v342_v42 }
 0x114   :  { %2817 = vmatprep.subr.bf16.mxu0 %v6623_v50  ;;  %7294 = vmatpush3.bf16.msra.mxu1 %v6708_v30  ;;  %v6629_v50 = vcombine.low %v330_v32, %v334_v33  ;;  %v443_v30 = vunpack.c.h.s8.bf16 %v8913_v60  ;;  %v354_v32 = vunpack.c.l.s8.bf16 %v8456_v43  ;;  %v358_v33 = vunpack.c.l.s8.bf16 %v8461_v44  ;;  %v8955_v55 = vld [vmem:[%s10256_s3 + $0x484] sm:$0x3f]  ;;  %v8960_v43 = vld [vmem:[%s10256_s3 + $0x492] sm:$0x3f] }
 0x115   :  { %7295 = vmatprep.subr.bf16.mxu1 %v6771_v37  ;;  %v447_v37 = vunpack.c.h.s8.bf16 %v8918_v61  ;;  %v6785_v40 = vcombine.low %v507_v0, %v511_v1  ;;  %v6644_v1 = vcombine.high %v346_v36, %v350_v57  ;;  %v451_v5 = vunpack.c.h.s8.bf16 %v8929_v15 }
 0x116   :  { %v587_v47 = vunpack.c.h.s8.bf16 %v8939_v46  ;;  %v6643_v44 = vcombine.low %v346_v36, %v350_v57  ;;  %v362_v42 = vunpack.c.l.s8.bf16 %v8503_v10  ;;  %v366_v0 = vunpack.c.l.s8.bf16 %v8508_v11  ;;  %v8971_v10 = vld [vmem:[%s10256_s3 + $0x4a0] sm:$0x3f]  ;;  %v8976_v11 = vld [vmem:[%s10256_s3 + $0x4ae] sm:$0x3f]  ;;  %v10321_v57 = vld [vmem:[#allocation22_spill] sm:$0xff] }
 0x117   :  { %2818 = vmatpush1.bf16.msra.mxu0 %v6622_v26  ;;  %v6729_v26 = vcombine.low %v443_v30, %v447_v37  ;;  %v527_v30 = vunpack.c.h.s8.bf16 %v8633_v27  ;;  %v370_v27 = vunpack.c.l.s8.bf16 %v8550_v58  ;;  %v8992_v58 = vld [vmem:[%s10256_s3 + $0x4ca] sm:$0x3f] }
 0x118   :  { %2819 = vmatprep.subr.bf16.mxu0 %v6630_v3  ;;  %7296 = vmatpush3.bf16.msra.mxu1 %v6715_v45  ;;  %v455_v3 = vunpack.c.h.s8.bf16 %v8934_v16  ;;  %v6792_v45 = vcombine.low %v515_v24, %v519_v4  ;;  %v599_v24 = vunpack.c.h.s8.bf16 %v8960_v43  ;;  %v6658_v36 = vcombine.high %v362_v42, %v366_v0 }
 0x119   :  { %7297 = vmatprep.subr.bf16.mxu1 %v6778_v23  ;;  %v591_v23 = vunpack.c.h.s8.bf16 %v8944_v20  ;;  %v374_v4 = vunpack.c.l.s8.bf16 %v10321_v57  ;;  %v10324_v57 = vld [vmem:[#allocation29_spill] sm:$0xff] }
 0x11b   :  { %2820 = vmatpush1.bf16.msra.mxu0 %v6629_v50  ;;  %v6651_v50 = vcombine.high %v354_v32, %v358_v33  ;;  %v6855_v37 = vcombine.low %v587_v47, %v591_v23  ;;  %v10323_v47 = vld [vmem:[#allocation26_spill] sm:$0xff] }
 0x11c   :  { %2821 = vmatprep.subr.bf16.mxu0 %v6637_v51  ;;  %7298 = vmatpush3.bf16.msra.mxu1 %v6722_v49  ;;  %v6736_v51 = vcombine.low %v451_v5, %v455_v3  ;;  %v523_v49 = vunpack.c.h.s8.bf16 %v8628_v39  ;;  %v6650_v39 = vcombine.low %v354_v32, %v358_v33  ;;  %v603_v3 = vunpack.c.h.s8.bf16 %v8971_v10  ;;  %v8987_v32 = vld [vmem:[%s10256_s3 + $0x4bc] sm:$0x3f]  ;;  %v10322_v33 = vld [vmem:[#allocation25_spill] sm:$0xff] }
 0x11d   :  { %7299 = vmatprep.subr.bf16.mxu1 %v6785_v40  ;;  %v595_v40 = vunpack.c.h.s8.bf16 %v8955_v55  ;;  %v382_v23 = vunpack.c.l.s8.bf16 %v10323_v47 }
 0x11f   :  { %2822 = vmatpush1.bf16.msra.mxu0 %v6636_v29  ;;  %v6799_v29 = vcombine.low %v523_v49, %v527_v30  ;;  %v6862_v5 = vcombine.low %v595_v40, %v599_v24  ;;  %v539_v49 = vunpack.c.h.s8.bf16 %v8719_v59  ;;  %v543_v30 = vunpack.c.h.s8.bf16 %v8724_v2  ;;  %v9009_v40 = vld [vmem:[%s10254_s1 + $0x14] ss:$28 sps:$4 sm:$0xff]   ;;  %v9015_v24 = vld [vmem:[%s10256_s3 + $0x4d8] sm:$0x3f]  ;;  %v9020_v59 = vld [vmem:[%s10256_s3 + $0x4e6] sm:$0x3f] }
 0x120   :  { %2823 = vmatprep.subr.bf16.mxu0 %v6644_v1  ;;  %7300 = vmatpush3.bf16.msra.mxu1 %v6729_v26  ;;  %v531_v1 = vunpack.c.h.s8.bf16 %v8672_v19  ;;  %v535_v26 = vunpack.c.h.s8.bf16 %v8677_v62  ;;  %v6657_v19 = vcombine.low %v362_v42, %v366_v0  ;;  %v378_v62 = vunpack.c.l.s8.bf16 %v10322_v33 }
 0x121   :  { %7301 = vmatprep.subr.bf16.mxu1 %v6792_v45  ;;  %v607_v45 = vunpack.c.h.s8.bf16 %v8976_v11  ;;  %v611_v0 = vunpack.c.h.s8.bf16 %v8987_v32  ;;  %v6664_v2 = vcombine.low %v370_v27, %v374_v4  ;;  %v623_v33 = vunpack.c.h.s8.bf16 %v9020_v59 }
 0x123   :  { %2824 = vmatpush1.bf16.msra.mxu0 %v6643_v44  ;;  %v8999_v44 = vld [vmem:[%s10254_s1 + $0x8] ss:$28 sps:$4 sm:$0xff]   ;;  %v6869_v42 = vcombine.low %v603_v3, %v607_v45  ;;  %v619_v45 = vunpack.c.h.s8.bf16 %v9015_v24 }
 0x124   :  { %2825 = vmatprep.subr.bf16.mxu0 %v6651_v50  ;;  %7302 = vmatpush3.bf16.msra.mxu1 %v6736_v51  ;;  %v6665_v50 = vcombine.high %v370_v27, %v374_v4  ;;  %v6806_v51 = vcombine.low %v531_v1, %v535_v26  ;;  %v6813_v1 = vcombine.low %v539_v49, %v543_v30  ;;  %v547_v26 = vunpack.c.h.s8.bf16 %v8751_v21  ;;  %v9031_v27 = vld [vmem:[%s10256_s3 + $0x4f4] sm:$0x3f] }
 0x125   :  { %7309 = vmatprep.subr.bf16.mxu1 %v6855_v37  ;;  %v615_v37 = vunpack.c.h.s8.bf16 %v8992_v58  ;;  %v6671_v21 = vcombine.low %v378_v62, %v382_v23  ;;  %v398_v4 = vunpack.c.l.s8.bf16 %v8708_v22  ;;  %v6883_v49 = vcombine.low %v619_v45, %v623_v33  ;;  %v9052_v22 = vld [vmem:[%s10256_s3 + $0x51e] sm:$0x3f] }
 0x126   :  { %v627_v30 = vunpack.c.h.s8.bf16 %v9031_v27 }
 0x127   :  { %2826 = vmatpush1.bf16.msra.mxu0 %v6650_v39  ;;  %3049 = vmatmul.mubr.bf16.vlgmr.msra.gmra.mrb[8].mxu1 %v8999_v44  ;;  %v6672_v39 = vcombine.high %v378_v62, %v382_v23  ;;  %v6876_v3 = vcombine.low %v611_v0, %v615_v37  ;;  %v406_v23 = vunpack.c.l.s8.bf16 %v8746_v54  ;;  %v563_v37 = vunpack.c.h.s8.bf16 %v8827_v34 }
 0x128   :  { %2827 = vmatprep.subr.bf16.mxu0 %v6658_v36  ;;  %7310 = vmatpush3.bf16.msra.mxu1 %v6799_v29  ;;  %v386_v36 = vunpack.c.l.s8.bf16 %v8638_v28  ;;  %v390_v29 = vunpack.c.l.s8.bf16 %v10324_v57  ;;  %v9036_v28 = vld [vmem:[%s10256_s3 + $0x502] sm:$0x3f]  ;;  %v410_v34 = vunpack.c.l.s8.bf16 %v8767_v31 }
 0x129   :  { %7311 = vmatprep.subr.bf16.mxu1 %v6862_v5  ;;  %3089 = vmatprep.mubr.bf16.mxu1 %v9009_v40  ;;  %v551_v5 = vunpack.c.h.s8.bf16 %v8756_v35  ;;  %v394_v35 = vunpack.c.l.s8.bf16 %v8703_v6  ;;  %v9047_v6 = vld [vmem:[%s10256_s3 + $0x510] sm:$0x3f] }
 0x12a   :  { %v635_v57 = vunpack.c.h.s8.bf16 %v9047_v6 }
 0x12b   :  { %2828 = vmatpush1.bf16.msra.mxu0 %v6657_v19  ;;  %v6679_v19 = vcombine.high %v386_v36, %v390_v29  ;;  %v6820_v47 = vcombine.low %v547_v26, %v551_v5  ;;  %v6686_v62 = vcombine.high %v394_v35, %v398_v4  ;;  %v6685_v54 = vcombine.low %v394_v35, %v398_v4  ;;  %v10326_v4 = vld [vmem:[#allocation41_spill] sm:$0xff] }
 0x12c   :  { %2829 = vmatprep.subr.bf16.mxu0 %v6665_v50  ;;  %7312 = vmatpush3.bf16.msra.mxu1 %v6806_v51  ;;  %v555_v50 = vunpack.c.h.s8.bf16 %v8783_v48  ;;  %v559_v51 = vunpack.c.h.s8.bf16 %v8788_v14  ;;  %v6678_v48 = vcombine.low %v386_v36, %v390_v29  ;;  %v402_v14 = vunpack.c.l.s8.bf16 %v8735_v53  ;;  %v9063_v36 = vld [vmem:[%s10256_s3 + $0x52c] sm:$0x3f]  ;;  %v9068_v53 = vld [vmem:[%s10256_s3 + $0x53a] sm:$0x3f] }
 0x12d   :  { %7313 = vmatprep.subr.bf16.mxu1 %v6869_v42  ;;  %v631_v42 = vunpack.c.h.s8.bf16 %v9036_v28  ;;  %v571_v5 = vunpack.c.h.s8.bf16 %v8859_v63  ;;  %v643_v33 = vunpack.c.h.s8.bf16 %v9063_v36  ;;  %v422_v63 = vunpack.c.l.s8.bf16 %v10326_v4 }
 0x12e   :  { %v6827_v0 = vcombine.low %v555_v50, %v559_v51  ;;  %v6693_v29 = vcombine.high %v402_v14, %v406_v23  ;;  %v6692_v31 = vcombine.low %v402_v14, %v406_v23  ;;  %v583_v50 = vunpack.c.h.s8.bf16 %v8896_v17  ;;  %v9085_v51 = vld [vmem:[%s10257_s4] sm:$0xff] }
 0x12f   :  { %2830 = vmatpush1.bf16.msra.mxu0 %v6664_v2  ;;  %v567_v2 = vunpack.c.h.s8.bf16 %v8832_v12  ;;  %v414_v12 = vunpack.c.l.s8.bf16 %v8772_v52  ;;  %v418_v52 = vunpack.c.l.s8.bf16 %v8805_v25  ;;  %v9090_v25 = vld [vmem:[%s10257_s4 + $0x8] sm:$0xff]  ;;  %v3402_v17 = vunpack.c.h.s8.bf16 %v9085_v51 }
 0x130   :  { %2831 = vmatprep.subr.bf16.mxu0 %v6672_v39  ;;  %7314 = vmatpush3.bf16.msra.mxu1 %v6813_v1  ;;  %v6890_v39 = vcombine.low %v627_v30, %v631_v42  ;;  %v639_v1 = vunpack.c.h.s8.bf16 %v9052_v22  ;;  %v3404_v30 = vunpack.c.h.s8.bf16 %v9090_v25 }
 0x131   :  { %7315 = vmatprep.subr.bf16.mxu1 %v6876_v3  ;;  %v6834_v26 = vcombine.low %v563_v37, %v567_v2  ;;  %v575_v3 = vunpack.c.h.s8.bf16 %v8864_v38  ;;  %v6700_v35 = vcombine.high %v410_v34, %v414_v12  ;;  %v6699_v42 = vcombine.low %v410_v34, %v414_v12 }
 0x132   :  { %v6897_v45 = vcombine.low %v635_v57, %v639_v1  ;;  %v9106_v23 = vcombine.high %v3402_v17, %v3404_v30  ;;  %v3401_v57 = vunpack.c.l.s8.bf16 %v9085_v51  ;;  %v3403_v1 = vunpack.c.l.s8.bf16 %v9090_v25 }
 0x133   :  { %2832 = vmatpush1.bf16.msra.mxu0 %v6671_v21  ;;  %v647_v21 = vunpack.c.h.s8.bf16 %v9068_v53  ;;  %v6841_v38 = vcombine.low %v571_v5, %v575_v3  ;;  %v434_v34 = vunpack.c.l.s8.bf16 %v8875_v41  ;;  %v438_v12 = vunpack.c.l.s8.bf16 %v8886_v7 }
 0x134   :  { %2833 = vmatprep.subr.bf16.mxu0 %v6679_v19  ;;  %7316 = vmatpush3.bf16.msra.mxu1 %v6820_v47  ;;  %v10325_v19 = vld [vmem:[#allocation38_spill] sm:$0xff]  ;;  %v579_v47 = vunpack.c.h.s8.bf16 %v8891_v9  ;;  %v10274_v5 = vmov 0.0   ;;  %v6931_v3 = vcombine.high %v3401_v57, %v3403_v1 }
 0x135   :  { %7317 = vmatprep.subr.bf16.mxu1 %v6883_v49  ;;  %v9095_v49 = vld [vmem:[%s10256_s3 + $0x548] sm:$0x3f]  ;;  %v9100_v9 = vld [vmem:[%s10256_s3 + $0x556] sm:$0x3f]  ;;  %v6720_v25 = vcombine.low %v434_v34, %v438_v12 }
 0x136   :  { %v6848_v37 = vcombine.low %v579_v47, %v583_v50  ;;  %v651_v2 = vunpack.c.h.s8.bf16 %v9095_v49 }
 0x137   :  { %2834 = vmatpush1.bf16.msra.mxu0 %v6678_v48  ;;  %v426_v48 = vunpack.c.l.s8.bf16 %v8843_v8 }
 0x138   :  { %2846 = vmatprep.subr.bf16.mxu0 %v6686_v62  ;;  %7318 = vmatpush3.bf16.msra.mxu1 %v6827_v0  ;;  %v10327_v62 = vld [vmem:[#allocation42_spill] sm:$0xff]  ;;  %v6707_v0 = vcombine.high %v418_v52, %v422_v63 }
 0x139   :  { %7319 = vmatprep.subr.bf16.mxu1 %v6890_v39  ;;  %v430_v14 = vunpack.c.l.s8.bf16 %v10327_v62  ;;  %v655_v39 = vunpack.c.h.s8.bf16 %v9100_v9 }
 0x13a   :  { %2836 = vmatmul.mubr.bf16.vlgmr.msra.gmra.mrb[8].mxu0 %v10325_v19  ;;  %v442_v19 = vunpack.c.l.s8.bf16 %v8913_v60  ;;  %v3307_v60 = vld [vmem:[%s10257_s4 + $0x20] sm:$0xff] }
 0x13b   :  { %2847 = vmatpush1.bf16.msra.mxu0 %v6685_v54  ;;  %2878 = vmatprep.mubr.bf16.mxu0 %v8821_v18  ;;  %v6904_v18 = vcombine.low %v643_v33, %v647_v21  ;;  %v6706_v54 = vcombine.low %v418_v52, %v422_v63  ;;  %v6714_v8 = vcombine.high %v426_v48, %v430_v14  ;;  %v3306_v33 = vld [vmem:[%s10257_s4 + $0x18] sm:$0xff]  ;;  %v3410_v50 = vunpack.c.h.s8.bf16 %v3307_v60 }
 0x13c   :  { %2848 = vmatprep.subr.bf16.mxu0 %v6693_v29  ;;  %7320 = vmatpush3.bf16.msra.mxu1 %v6834_v26  ;;  %v6911_v29 = vcombine.low %v651_v2, %v655_v39  ;;  %v9114_v26 = vcombine.low %v3402_v17, %v3404_v30  ;;  %v3408_v41 = vunpack.c.h.s8.bf16 %v3306_v33  ;;  %v6713_v7 = vcombine.low %v426_v48, %v430_v14  ;;  %v3309_v2 = vld [vmem:[%s10257_s4 + $0x30] sm:$0xff]  ;;  %v3310_v39 = vld [vmem:[%s10257_s4 + $0x38] sm:$0xff] }
 0x13d   :  { %7321 = vmatprep.subr.bf16.mxu1 %v6897_v45  ;;  %v3305_v45 = vld [vmem:[%s10257_s4 + $0x10] sm:$0xff]  ;;  %v6721_v52 = vcombine.high %v434_v34, %v438_v12  ;;  %v450_v17 = vunpack.c.l.s8.bf16 %v8929_v15  ;;  %v454_v30 = vunpack.c.l.s8.bf16 %v8934_v16  ;;  %v3409_v14 = vunpack.c.l.s8.bf16 %v3307_v60  ;;  %v3314_v60 = vld [vmem:[%s10257_s4 + $0x58] sm:$0xff] }
 0x13e   :  { %v3406_v21 = vunpack.c.h.s8.bf16 %v3305_v45  ;;  %v3405_v63 = vunpack.c.l.s8.bf16 %v3305_v45  ;;  %v3413_v12 = vunpack.c.l.s8.bf16 %v3309_v2  ;;  %v3312_v45 = vld [vmem:[%s10257_s4 + $0x48] sm:$0xff] }
 0x13f   :  { %2849 = vmatpush1.bf16.msra.mxu0 %v6692_v31  ;;  %v446_v31 = vunpack.c.l.s8.bf16 %v8918_v61  ;;  %v3308_v61 = vld [vmem:[%s10257_s4 + $0x28] sm:$0xff]  ;;  %v6735_v16 = vcombine.high %v450_v17, %v454_v30 }
 0x140   :  { %2850 = vmatprep.subr.bf16.mxu0 %v6700_v35  ;;  %7322 = vmatpush3.bf16.msra.mxu1 %v6841_v38  ;;  %v10328_v35 = vld [vmem:[#allocation14_spill] sm:$0xff]  ;;  %v9126_v4 = vcombine.high %v3406_v21, %v3408_v41  ;;  %v3407_v38 = vunpack.c.l.s8.bf16 %v3306_v33  ;;  %v9136_v47 = vcombine.low %v3406_v21, %v3408_v41  ;;  %v3412_v51 = vunpack.c.h.s8.bf16 %v3308_v61 }
 0x141   :  { %7323 = vmatprep.subr.bf16.mxu1 %v6904_v18  ;;  %v6728_v18 = vcombine.high %v442_v19, %v446_v31  ;;  %v6727_v15 = vcombine.low %v442_v19, %v446_v31  ;;  %v6734_v21 = vcombine.low %v450_v17, %v454_v30  ;;  %v3420_v31 = vunpack.c.h.s8.bf16 %v3312_v45 }
 0x142   :  { %v9140_v48 = vcombine.high %v3410_v50, %v3412_v51  ;;  %v6935_v62 = vcombine.high %v3405_v63, %v3407_v38  ;;  %v3424_v17 = vunpack.c.h.s8.bf16 %v3314_v60 }
 0x143   :  { %2851 = vmatpush1.bf16.msra.mxu0 %v6699_v42  ;;  %v6930_v42 = vcombine.low %v3401_v57, %v3403_v1  ;;  %v6934_v57 = vcombine.low %v3405_v63, %v3407_v38  ;;  %v3414_v1 = vunpack.c.h.s8.bf16 %v3309_v2  ;;  %v3419_v63 = vunpack.c.l.s8.bf16 %v3312_v45  ;;  %v3313_v38 = vld [vmem:[%s10257_s4 + $0x50] sm:$0xff] }
 0x144   :  { %2852 = vmatprep.subr.bf16.mxu0 %v6707_v0  ;;  %7324 = vmatpush3.bf16.msra.mxu1 %v6848_v37  ;;  %v3411_v0 = vunpack.c.l.s8.bf16 %v3308_v61  ;;  %v9142_v37 = vcombine.low %v3410_v50, %v3412_v51  ;;  %v10330_v51 = vld [vmem:[#allocation8_spill] sm:$0xff] }
 0x145   :  { %7401 = vmatprep.subr.bf16.mxu1 %v10274_v5 }
 0x146   :  { %v6939_v34 = vcombine.high %v3409_v14, %v3411_v0 }
 0x147   :  { %2853 = vmatpush1.bf16.msra.mxu0 %v6706_v54  ;;  %3090 = vmatmul.mubr.bf16.vlgmr.msra.gmra.mrb[12].mxu1 %v10328_v35  ;;  %v10329_v54 = vld [vmem:[#allocation21_spill] sm:$0xff] }
 0x148   :  { %2854 = vmatprep.subr.bf16.mxu0 %v6714_v8  ;;  %7402 = vmatpush3.bf16.msra.mxu1 %v6911_v29  ;;  %v3416_v8 = vunpack.c.h.s8.bf16 %v3310_v39  ;;  %v3415_v29 = vunpack.c.l.s8.bf16 %v3310_v39  ;;  %v10331_v39 = vld [vmem:[#allocation9_spill] sm:$0xff] }
 0x149   :  { %7403 = vmatprep.mubr.msk.bf16.mxu1 %vm7925_vm1, %v10274_v5  ;;  %4587 = vmatprep.subr.bf16.mxu1 %v6931_v3  ;;  %v3311_v3 = vld [vmem:[%s10257_s4 + $0x40] sm:$0xff] }
 0x14a   :  { %v9158_v33 = vcombine.high %v3414_v1, %v3416_v8  ;;  %v9160_v41 = vcombine.low %v3414_v1, %v3416_v8  ;;  %v3418_v19 = vunpack.c.h.s8.bf16 %v3311_v3  ;;  %v6943_v35 = vcombine.high %v3413_v12, %v3415_v29 }
 0x14b   :  { %2855 = vmatpush1.bf16.msra.mxu0 %v6713_v7  ;;  %v6938_v7 = vcombine.low %v3409_v14, %v3411_v0  ;;  %v3315_v14 = vld [vmem:[%s10257_s4 + $0x60] sm:$0xff]  ;;  %v3316_v0 = vld [vmem:[%s10257_s4 + $0x68] sm:$0xff] }
 0x14c   :  { %2856 = vmatprep.subr.bf16.mxu0 %v6721_v52  ;;  %v3417_v52 = vunpack.c.l.s8.bf16 %v3311_v3  ;;  %v9168_v61 = vcombine.high %v3418_v19, %v3420_v31  ;;  %v9170_v50 = vcombine.low %v3418_v19, %v3420_v31  ;;  %v3428_v1 = vunpack.c.h.s8.bf16 %v3316_v0  ;;  %v3318_v3 = vld [vmem:[%s10257_s4 + $0x78] sm:$0xff]  ;;  %v10334_v19 = vld [vmem:[#allocation12_spill] sm:$0xff] }
 0x14e   :  { %v6947_v30 = vcombine.high %v3417_v52, %v3419_v63 }
 0x14f   :  { %2857 = vmatpush1.bf16.msra.mxu0 %v6720_v25  ;;  %7404 = vmatmul.mubr.msk.bf16.vlgmr.msra.gmra.mrb[16].mxu1 %vm2455_vm0, %v10329_v54  ;;  %v6942_v25 = vcombine.low %v3413_v12, %v3415_v29  ;;  %v10332_v54 = vld [vmem:[#allocation10_spill] sm:$0xff]  ;;  %v3427_v12 = vunpack.c.l.s8.bf16 %v3316_v0  ;;  %v3317_v29 = vld [vmem:[%s10257_s4 + $0x70] sm:$0xff] }
 0x150   :  { %2858 = vmatprep.subr.bf16.mxu0 %v6728_v18  ;;  %4588 = vmatpush1.bf16.msra.mxu1 %v6930_v42  ;;  %v3422_v18 = vunpack.c.h.s8.bf16 %v3313_v38  ;;  %v3421_v42 = vunpack.c.l.s8.bf16 %v3313_v38  ;;  %v3429_v38 = vunpack.c.l.s8.bf16 %v3317_v29 }
 0x151   :  { %4589 = vmatprep.subr.bf16.mxu1 %v6935_v62  ;;  %v3423_v62 = vunpack.c.l.s8.bf16 %v3314_v60  ;;  %v3431_v60 = vunpack.c.l.s8.bf16 %v3318_v3 }
 0x152   :  { %v9179_v2 = vcombine.high %v3422_v18, %v3424_v17 }
 0x153   :  { %2859 = vmatpush1.bf16.msra.mxu0 %v6727_v15  ;;  %v9182_v15 = vcombine.low %v3422_v18, %v3424_v17  ;;  %v6951_v8 = vcombine.high %v3421_v42, %v3423_v62  ;;  %v6950_v31 = vcombine.low %v3421_v42, %v3423_v62  ;;  %v10335_v17 = vld [vmem:[#allocation13_spill] sm:$0xff]  ;;  %v10336_v42 = vld [vmem:[#allocation15_spill] sm:$0xff] }
 0x154   :  { %2860 = vmatprep.subr.bf16.mxu0 %v6735_v16  ;;  %4590 = vmatpush1.bf16.msra.mxu1 %v6934_v57  ;;  %v6946_v16 = vcombine.low %v3417_v52, %v3419_v63  ;;  %v3426_v57 = vunpack.c.h.s8.bf16 %v3315_v14  ;;  %v3432_v52 = vunpack.c.h.s8.bf16 %v3318_v3 }
 0x155   :  { %4591 = vmatprep.subr.bf16.mxu1 %v6939_v34  ;;  %v3425_v34 = vunpack.c.l.s8.bf16 %v3315_v14 }
 0x156   :  { %v9191_v45 = vcombine.high %v3426_v57, %v3428_v1 }
 0x157   :  { %2861 = vmatpush1.bf16.msra.mxu0 %v6734_v21  ;;  %v10333_v21 = vld [vmem:[#allocation11_spill] sm:$0xff]  ;;  %v6955_v63 = vcombine.high %v3425_v34, %v3427_v12  ;;  %v6954_v62 = vcombine.low %v3425_v34, %v3427_v12  ;;  %v10339_v34 = vld [vmem:[#allocation17_spill] sm:$0xff]  ;;  %v6958_v12 = vcombine.low %v3429_v38, %v3431_v60 }
 0x158   :  { %2862 = vmatprep.subr.bf16.mxu0 %v10330_v51  ;;  %4592 = vmatpush1.bf16.msra.mxu1 %v6938_v7  ;;  %v9194_v7 = vcombine.low %v3426_v57, %v3428_v1  ;;  %v3319_v51 = vld [vmem:[%s10257_s4 + $0x80] sm:$0xff]  ;;  %v3321_v57 = vld [vmem:[%s10257_s4 + $0x90] sm:$0xff]  ;;  %v3322_v1 = vld [vmem:[%s10257_s4 + $0x98] sm:$0xff] }
 0x159   :  { %4593 = vmatprep.subr.bf16.mxu1 %v6943_v35  ;;  %v3430_v35 = vunpack.c.h.s8.bf16 %v3317_v29  ;;  %v3434_v14 = vunpack.c.h.s8.bf16 %v3319_v51  ;;  %v10337_v29 = vld [vmem:[#allocation16_spill] sm:$0xff] }
 0x15b   :  { %2863 = vmatpush1.bf16.msra.mxu0 %v10331_v39  ;;  %v9203_v18 = vcombine.high %v3430_v35, %v3432_v52  ;;  %v6959_v39 = vcombine.high %v3429_v38, %v3431_v60  ;;  %v9232_v38 = vld [vmem:[%s10257_s4 + $0x100] sm:$0xff]  ;;  %v9237_v60 = vld [vmem:[%s10257_s4 + $0x108] sm:$0xff] }
 0x15c   :  { %2864 = vmatprep.subr.bf16.mxu0 %v10332_v54  ;;  %4594 = vmatpush1.bf16.msra.mxu1 %v6942_v25  ;;  %v3320_v25 = vld [vmem:[%s10257_s4 + $0x88] sm:$0xff]  ;;  %v3433_v54 = vunpack.c.l.s8.bf16 %v3319_v51 }
 0x15d   :  { %4595 = vmatprep.subr.bf16.mxu1 %v6947_v30  ;;  %v9206_v30 = vcombine.low %v3430_v35, %v3432_v52  ;;  %v3436_v0 = vunpack.c.h.s8.bf16 %v3320_v25  ;;  %v3437_v35 = vunpack.c.l.s8.bf16 %v3321_v57  ;;  %v3439_v52 = vunpack.c.l.s8.bf16 %v3322_v1  ;;  %v3324_v51 = vld [vmem:[%s10257_s4 + $0xa8] sm:$0xff] }
 0x15e   :  { %v3443_v5 = vunpack.c.l.s8.bf16 %v3324_v51 }
 0x15f   :  { %2865 = vmatpush1.bf16.msra.mxu0 %v10333_v21  ;;  %v9218_v3 = vcombine.low %v3434_v14, %v3436_v0  ;;  %v3438_v21 = vunpack.c.h.s8.bf16 %v3321_v57 }
 0x160   :  { %2866 = vmatprep.subr.bf16.mxu0 %v10334_v19  ;;  %4596 = vmatpush1.bf16.msra.mxu1 %v6946_v16  ;;  %v3435_v16 = vunpack.c.l.s8.bf16 %v3320_v25  ;;  %v3440_v19 = vunpack.c.h.s8.bf16 %v3322_v1  ;;  %v3444_v1 = vunpack.c.h.s8.bf16 %v3324_v51 }
 0x161   :  { %4597 = vmatprep.subr.bf16.mxu1 %v6951_v8  ;;  %v9215_v8 = vcombine.high %v3434_v14, %v3436_v0  ;;  %10338 = vst [vmem:[#allocation22_spill] sm:$0xff] %v9218_v3  ;;  %v10277_v14 = vunpack.c.l.s8.bf16 %v9237_v60  ;;  %v10343_v0 = vld [vmem:[#allocation19_spill] sm:$0xff] }
 0x162   :  { %v9227_v25 = vcombine.high %v3438_v21, %v3440_v19 }
 0x163   :  { %2867 = vmatpush1.bf16.msra.mxu0 %v10335_v17  ;;  %v10341_v17 = vld [vmem:[#allocation18_spill] sm:$0xff] }
 0x164   :  { %2868 = vmatprep.subr.bf16.mxu0 %v10336_v42  ;;  %4598 = vmatpush1.bf16.msra.mxu1 %v6950_v31  ;;  %v6963_v31 = vcombine.high %v3433_v54, %v3435_v16  ;;  %10340 = vst [vmem:[#allocation25_spill] sm:$0xff] %v9227_v25  ;;  %v9240_v42 = vcombine.low %v3438_v21, %v3440_v19  ;;  %v3326_v21 = vld [vmem:[%s10257_s4 + $0xb8] sm:$0xff] }
 0x165   :  { %4599 = vmatprep.subr.bf16.mxu1 %v6955_v63  ;;  %v3323_v63 = vld [vmem:[%s10257_s4 + $0xa0] sm:$0xff]  ;;  %v3447_v3 = vunpack.c.l.s8.bf16 %v3326_v21 }
 0x166   :  { %10342 = vst [vmem:[#allocation26_spill] sm:$0xff] %v9240_v42  ;;  %v3442_v57 = vunpack.c.h.s8.bf16 %v3323_v63 }
 0x167   :  { %2869 = vmatpush1.bf16.msra.mxu0 %v10337_v29  ;;  %v6967_v29 = vcombine.high %v3437_v35, %v3439_v52 }
 0x168   :  { %2870 = vmatprep.subr.bf16.mxu0 %v10339_v34  ;;  %4600 = vmatpush1.bf16.msra.mxu1 %v6954_v62  ;;  %v10276_v62 = vunpack.c.l.s8.bf16 %v9232_v38  ;;  %v3441_v34 = vunpack.c.l.s8.bf16 %v3323_v63  ;;  %v9260_v19 = vcombine.low %v3442_v57, %v3444_v1  ;;  %v6966_v63 = vcombine.low %v3437_v35, %v3439_v52  ;;  %v10350_v35 = vld [vmem:[#allocation27_spill] sm:$0xff] }
 0x169   :  { %4601 = vmatprep.subr.bf16.mxu1 %v6959_v39  ;;  %v6962_v39 = vcombine.low %v3433_v54, %v3435_v16  ;;  %v9257_v54 = vcombine.high %v3442_v57, %v3444_v1  ;;  %v10344_v16 = vld [vmem:[#allocation20_spill] sm:$0xff] }
 0x16a   :  { %10345 = vst [vmem:[#allocation29_spill] sm:$0xff] %v9260_v19  ;;  %v6971_v42 = vcombine.high %v3441_v34, %v3443_v5  ;;  %v6970_v52 = vcombine.low %v3441_v34, %v3443_v5  ;;  %v3329_v19 = vld [vmem:[%s10257_s4 + $0xd0] sm:$0xff]  ;;  %v10354_v5 = vld [vmem:[#allocation30_spill] sm:$0xff] }
 0x16b   :  { %2871 = vmatpush1.bf16.msra.mxu0 %v10341_v17  ;;  %v3325_v17 = vld [vmem:[%s10257_s4 + $0xb0] sm:$0xff] }
 0x16c   :  { %2872 = vmatprep.subr.bf16.mxu0 %v10343_v0  ;;  %4602 = vmatpush1.bf16.msra.mxu1 %v6958_v12  ;;  %v9255_v12 = vcombine.low %v10276_v62, %v10277_v14  ;;  %v3446_v51 = vunpack.c.h.s8.bf16 %v3325_v17  ;;  %v3448_v0 = vunpack.c.h.s8.bf16 %v3326_v21  ;;  %v3445_v25 = vunpack.c.l.s8.bf16 %v3325_v17  ;;  %v3327_v62 = vld [vmem:[%s10257_s4 + $0xc0] sm:$0xff] }
 0x16d   :  { %4603 = vmatprep.subr.bf16.mxu1 %v6963_v31  ;;  %v10346_v31 = vld [vmem:[#allocation23_spill] sm:$0xff] }
 0x16e   :  { %v9269_v57 = vcombine.high %v3446_v51, %v3448_v0  ;;  %v9271_v1 = vcombine.low %v3446_v51, %v3448_v0  ;;  %v6975_v21 = vcombine.high %v3445_v25, %v3447_v3  ;;  %v3330_v51 = vld [vmem:[%s10257_s4 + $0xd8] sm:$0xff] }
 0x16f   :  { %2873 = vmatpush1.bf16.msra.mxu0 %v10344_v16  ;;  %v3328_v16 = vld [vmem:[%s10257_s4 + $0xc8] sm:$0xff]  ;;  %v3456_v34 = vunpack.c.h.s8.bf16 %v3330_v51 }
 0x170   :  { %2874 = vmatprep.subr.bf16.mxu0 %v10346_v31  ;;  %4604 = vmatpush1.bf16.msra.mxu1 %v6962_v39  ;;  %10347 = vst [vmem:[#allocation38_spill] sm:$0xff] %v9269_v57  ;;  %10348 = vst [vmem:[#allocation41_spill] sm:$0xff] %v9271_v1  ;;  %v10349_v39 = vld [vmem:[#allocation24_spill] sm:$0xff]  ;;  %v3452_v17 = vunpack.c.h.s8.bf16 %v3328_v16  ;;  %v3449_v31 = vunpack.c.l.s8.bf16 %v3327_v62  ;;  %v3451_v14 = vunpack.c.l.s8.bf16 %v3328_v16  ;;  %v3455_v1 = vunpack.c.l.s8.bf16 %v3330_v51  ;;  %v10361_v57 = vld [vmem:[#allocation35_spill] sm:$0xff] }
 0x171   :  { %4605 = vmatprep.subr.bf16.mxu1 %v6967_v29  ;;  %v3450_v29 = vunpack.c.h.s8.bf16 %v3327_v62  ;;  %v3454_v62 = vunpack.c.h.s8.bf16 %v3329_v19 }
 0x172   :  { %v6979_v16 = vcombine.high %v3449_v31, %v3451_v14 }
 0x173   :  { %2875 = vmatpush1.bf16.msra.mxu0 %v10349_v39  ;;  %v9281_v0 = vcombine.high %v3450_v29, %v3452_v17  ;;  %v10352_v39 = vld [vmem:[#allocation28_spill] sm:$0xff] }
 0x174   :  { %2876 = vmatprep.subr.bf16.mxu0 %v10350_v35  ;;  %4606 = vmatpush1.bf16.msra.mxu1 %v6966_v63  ;;  %v9284_v63 = vcombine.low %v3450_v29, %v3452_v17  ;;  %v3453_v35 = vunpack.c.l.s8.bf16 %v3329_v19  ;;  %v3332_v29 = vld [vmem:[%s10257_s4 + $0xe8] sm:$0xff]  ;;  %v9294_v17 = vcombine.high %v3454_v62, %v3456_v34 }
 0x175   :  { %4607 = vmatprep.subr.bf16.mxu1 %v6971_v42  ;;  %10351 = vst [vmem:[#allocation42_spill] sm:$0xff] %v9281_v0  ;;  %v6974_v42 = vcombine.low %v3445_v25, %v3447_v3  ;;  %v3331_v0 = vld [vmem:[%s10257_s4 + $0xe0] sm:$0xff]  ;;  %v10358_v25 = vld [vmem:[#allocation32_spill] sm:$0xff] }
 0x176   :  { %10353 = vst [vmem:[#allocation14_spill] sm:$0xff] %v9284_v63  ;;  %10355 = vst [vmem:[#allocation21_spill] sm:$0xff] %v9294_v17  ;;  %v10357_v3 = vld [vmem:[#allocation31_spill] sm:$0xff]  ;;  %v3458_v19 = vunpack.c.h.s8.bf16 %v3331_v0  ;;  %v6983_v51 = vcombine.high %v3453_v35, %v3455_v1  ;;  %v3333_v17 = vld [vmem:[%s10257_s4 + $0xf0] sm:$0xff] }
 0x177   :  { %2877 = vmatpush1.bf16.msra.mxu0 %v10352_v39  ;;  %v3457_v39 = vunpack.c.l.s8.bf16 %v3331_v0  ;;  %v3462_v0 = vunpack.c.h.s8.bf16 %v3333_v17 }
 0x178   :  { %2889 = vmatprep.subr.bf16.mxu0 %v10354_v5  ;;  %4608 = vmatpush1.bf16.msra.mxu1 %v6970_v52  ;;  %v9296_v52 = vcombine.low %v3454_v62, %v3456_v34  ;;  %v3459_v5 = vunpack.c.l.s8.bf16 %v3332_v29  ;;  %v3334_v62 = vld [vmem:[%s10257_s4 + $0xf8] sm:$0xff] }
 0x179   :  { %4609 = vmatprep.subr.bf16.mxu1 %v6975_v21  ;;  %v3460_v21 = vunpack.c.h.s8.bf16 %v3332_v29 }
 0x17a   :  { %2879 = vmatmul.mubr.bf16.vlgmr.msra.gmra.mrb[8].mxu0 %v8999_v44  ;;  %10356 = vst [vmem:[#allocation8_spill] sm:$0xff] %v9296_v52  ;;  %v6978_v44 = vcombine.low %v3449_v31, %v3451_v14  ;;  %v10360_v14 = vld [vmem:[#allocation34_spill] sm:$0xff]  ;;  %v6982_v31 = vcombine.low %v3453_v35, %v3455_v1  ;;  %v6987_v29 = vcombine.high %v3457_v39, %v3459_v5  ;;  %v3468_v1 = vunpack.c.h.s8.bf16 %v9237_v60 }
 0x17b   :  { %2890 = vmatpush1.bf16.msra.mxu0 %v10357_v3  ;;  %2921 = vmatprep.mubr.bf16.mxu0 %v9009_v40  ;;  %v9307_v34 = vcombine.high %v3458_v19, %v3460_v21  ;;  %v9309_v40 = vcombine.low %v3458_v19, %v3460_v21  ;;  %v3461_v3 = vunpack.c.l.s8.bf16 %v3333_v17  ;;  %v10362_v19 = vld [vmem:[#allocation36_spill] sm:$0xff]  ;;  %v6986_v21 = vcombine.low %v3457_v39, %v3459_v5 }
 0x17c   :  { %2891 = vmatprep.subr.bf16.mxu0 %v10358_v25  ;;  %4610 = vmatpush1.bf16.msra.mxu1 %v6974_v42  ;;  %v10359_v42 = vld [vmem:[#allocation33_spill] sm:$0xff]  ;;  %v3463_v25 = vunpack.c.l.s8.bf16 %v3334_v62  ;;  %v10366_v39 = vunpack.c.l.s8.bf16 %v9232_v38 }
 0x17d   :  { %4611 = vmatprep.subr.bf16.mxu1 %v6979_v16  ;;  %v3464_v16 = vunpack.c.h.s8.bf16 %v3334_v62  ;;  %v10364_v62 = vld [vmem:[#allocation39_spill] sm:$0xff] }
 0x17e   :  { %v6991_v35 = vcombine.high %v3461_v3, %v3463_v25 }
 0x17f   :  { %2892 = vmatpush1.bf16.msra.mxu0 %v10359_v42  ;;  %v9313_v52 = vcombine.high %v3462_v0, %v3464_v16  ;;  %v9315_v63 = vcombine.low %v3462_v0, %v3464_v16  ;;  %v3466_v42 = vunpack.c.h.s8.bf16 %v9232_v38  ;;  %v10368_v0 = vld [vmem:[#allocation43_spill] sm:$0xff]  ;;  %v10369_v16 = vld [vmem:[#allocation44_spill] sm:$0xff] }
 0x180   :  { %2893 = vmatprep.subr.bf16.mxu0 %v10360_v14  ;;  %4612 = vmatpush1.bf16.msra.mxu1 %v6978_v44  ;;  %v10365_v14 = vunpack.c.l.s8.bf16 %v9237_v60  ;;  %v594_v60 = vunpack.c.l.s8.bf16 %v8955_v55 }
 0x181   :  { %4613 = vmatprep.subr.bf16.mxu1 %v6983_v51  ;;  %v9321_v44 = vcombine.high %v3466_v42, %v3468_v1  ;;  %v9323_v17 = vcombine.low %v3466_v42, %v3468_v1  ;;  %v10363_v51 = vld [vmem:[#allocation37_spill] sm:$0xff] }
 0x182   :  { %v6995_v5 = vcombine.high %v10366_v39, %v10365_v14  ;;  %v626_v14 = vunpack.c.l.s8.bf16 %v9031_v27  ;;  %v630_v39 = vunpack.c.l.s8.bf16 %v9036_v28 }
 0x183   :  { %2894 = vmatpush1.bf16.msra.mxu0 %v10361_v57  ;;  %v6990_v57 = vcombine.low %v3461_v3, %v3463_v25  ;;  %v590_v3 = vunpack.c.l.s8.bf16 %v8944_v20  ;;  %v10371_v25 = vld [vmem:[#allocation46_spill] sm:$0xff] }
 0x184   :  { %2895 = vmatprep.subr.bf16.mxu0 %v10362_v19  ;;  %4614 = vmatpush1.bf16.msra.mxu1 %v6982_v31  ;;  %v10367_v31 = vld [vmem:[#allocation40_spill] sm:$0xff]  ;;  %v586_v19 = vunpack.c.l.s8.bf16 %v8939_v46  ;;  %v606_v46 = vunpack.c.l.s8.bf16 %v8976_v11 }
 0x185   :  { %4615 = vmatprep.subr.bf16.mxu1 %v6987_v29  ;;  %v10370_v29 = vld [vmem:[#allocation45_spill] sm:$0xff] }
 0x186   :  { %v6854_v38 = vcombine.high %v586_v19, %v590_v3  ;;  %v6853_v42 = vcombine.low %v586_v19, %v590_v3  ;;  %v654_v19 = vunpack.c.l.s8.bf16 %v9100_v9 }
 0x187   :  { %2896 = vmatpush1.bf16.msra.mxu0 %v10363_v51 }
 0x188   :  { %2897 = vmatprep.subr.bf16.mxu0 %v10364_v62  ;;  %4616 = vmatpush1.bf16.msra.mxu1 %v6986_v21  ;;  %v598_v21 = vunpack.c.l.s8.bf16 %v8960_v43  ;;  %v614_v62 = vunpack.c.l.s8.bf16 %v8992_v58  ;;  %v6889_v58 = vcombine.high %v626_v14, %v630_v39 }
 0x189   :  { %4617 = vmatprep.subr.bf16.mxu1 %v6991_v35  ;;  %v602_v35 = vunpack.c.l.s8.bf16 %v8971_v10 }
 0x18a   :  { %v6861_v1 = vcombine.high %v594_v60, %v598_v21  ;;  %v6860_v20 = vcombine.low %v594_v60, %v598_v21 }
 0x18b   :  { %2898 = vmatpush1.bf16.msra.mxu0 %v10367_v31  ;;  %v6868_v51 = vcombine.high %v602_v35, %v606_v46  ;;  %v6867_v55 = vcombine.low %v602_v35, %v606_v46  ;;  %v638_v31 = vunpack.c.l.s8.bf16 %v9052_v22  ;;  %v9374_v46 = vstv %s6560_s26 }
 0x18c   :  { %2899 = vmatprep.subr.bf16.mxu0 %v10368_v0  ;;  %4618 = vmatpush1.bf16.msra.mxu1 %v6990_v57  ;;  %v622_v57 = vunpack.c.l.s8.bf16 %v9020_v59  ;;  %v642_v0 = vunpack.c.l.s8.bf16 %v9063_v36  ;;  %v7878_v36 = vld [vmem:[%s10254_s1 + $0x10] ss:$28 sps:$4 sm:$0xff]  }
 0x18d   :  { %4630 = vmatprep.subr.bf16.mxu1 %v6995_v5  ;;  %v634_v5 = vunpack.c.l.s8.bf16 %v9047_v6 }
 0x18f   :  { %2900 = vmatpush1.bf16.msra.mxu0 %v10369_v16  ;;  %v6896_v59 = vcombine.high %v634_v5, %v638_v31  ;;  %v646_v16 = vunpack.c.l.s8.bf16 %v9068_v53  ;;  %v6895_v27 = vcombine.low %v634_v5, %v638_v31 }
 0x190   :  { %2901 = vmatprep.subr.bf16.mxu0 %v10370_v29  ;;  %v650_v29 = vunpack.c.l.s8.bf16 %v9095_v49  ;;  %v10372_v49 = vmov 0  }
 0x191   :  { %v6903_v28 = vcombine.high %v642_v0, %v646_v16  ;;  %v6902_v6 = vcombine.low %v642_v0, %v646_v16 }
 0x192   :  { %v6910_v22 = vcombine.high %v650_v29, %v654_v19  ;;  %v6909_v3 = vcombine.low %v650_v29, %v654_v19 }
 0x193   :  { %2902 = vmatpush1.bf16.msra.mxu0 %v10371_v25  ;;  %v3156_v25 = vlaneseq }
 0x194   :  { %2903 = vmatprep.subr.bf16.mxu0 %v8904_v56  ;;  %v610_v56 = vunpack.c.l.s8.bf16 %v8987_v32 }
 0x195   :  { %v9361_v21 = vshrl.u32 %v3156_v25, 7 }
 0x196   :  { %v6875_v43 = vcombine.high %v610_v56, %v614_v62  ;;  %v6874_v10 = vcombine.low %v610_v56, %v614_v62  ;;  %v7879_v62 = vld [vmem:[%s10254_s1 + $0x18] ss:$28 sps:$4 sm:$0xff]  }
 0x197   :  { %2904 = vmatpush1.bf16.msra.mxu0 %v8906_v13  ;;  %v618_v13 = vunpack.c.l.s8.bf16 %v9015_v24  ;;  %v6888_v24 = vcombine.low %v626_v14, %v630_v39  ;;  %v9372_v35 = vsub.s32 1, %v9361_v21 }
 0x198   :  { %2905 = vmatprep.subr.bf16.mxu0 %v6854_v38 }
 0x199   :  { %v6882_v11 = vcombine.high %v618_v13, %v622_v57  ;;  %v6881_v32 = vcombine.low %v618_v13, %v622_v57 }
 0x19b   :  { %2906 = vmatpush1.bf16.msra.mxu0 %v6853_v42  ;;  %v9364_v42 = vsub.s32 0, %v9361_v21 }
 0x19c   :  { %2907 = vmatprep.subr.bf16.mxu0 %v6861_v1  ;;  %v9369_v1 = vld [vmem:[%s10260_s7] sm:$0x7f] }
 0x19f   :  { %2908 = vmatpush1.bf16.msra.mxu0 %v6860_v20  ;;  %v3159_v20 = vrot.slane %v9369_v1, %v9364_v42 }
 0x1a0   :  { %2909 = vmatprep.subr.bf16.mxu0 %v6868_v51 }
 0x1a3   :  { %2910 = vmatpush1.bf16.msra.mxu0 %v6867_v55 }
 0x1a4   :  { %2911 = vmatprep.subr.bf16.mxu0 %v6875_v43 }
 0x1a7   :  { %2912 = vmatpush1.bf16.msra.mxu0 %v6874_v10 }
 0x1a8   :  { %2913 = vmatprep.subr.bf16.mxu0 %v6882_v11 }
 0x1ab   :  { %2914 = vmatpush1.bf16.msra.mxu0 %v6881_v32 }
 0x1ac   :  { %2915 = vmatprep.subr.bf16.mxu0 %v6889_v58 }
 0x1af   :  { %2916 = vmatpush1.bf16.msra.mxu0 %v6888_v24  ;;  %v3170_v24 = vsub.s32 3, %v9361_v21 }
 0x1b0   :  { %2917 = vmatprep.subr.bf16.mxu0 %v6896_v59 }
 0x1b1   :  { %v3171_v29 = vrot.slane %v9369_v1, %v3170_v24 }
 0x1b3   :  { %2918 = vmatpush1.bf16.msra.mxu0 %v6895_v27 }
 0x1b4   :  { %2919 = vmatprep.subr.bf16.mxu0 %v6903_v28 }
 0x1b7   :  { %2920 = vmatpush1.bf16.msra.mxu0 %v6902_v6 }
 0x1b8   :  { %2932 = vmatprep.subr.bf16.mxu0 %v6910_v22 }
 0x1b9   :  { %v2751_v38 = vpop.f32.mrb[0].mxu1 }
 0x1ba   :  { %2922 = vmatmul.mubr.bf16.vlgmr.msra.gmra.mrb[8].mxu0 %v7878_v36  ;;  %v2753_v53 = vpop.f32.mrb[1].mxu1 }
 0x1bb   :  { %2933 = vmatpush1.bf16.msra.mxu0 %v6909_v3  ;;  %v2755_v60 = vpop.f32.mrb[2].mxu1  ;;  %2964 = vmatprep.mubr.bf16.mxu0 %v10372_v49 }
 0x1bc   :  { %v2757_v9 = vpop.f32.mrb[3].mxu1  ;;  %4759 = vmatprep.subr.bf16.mxu0 %v9106_v23  ;;  %v3163_v23 = vrot.slane %v9369_v1, %v9372_v35 }
 0x1c5   :  { %v2622_v51 = vpop.f32.mrb[0].mxu0 }
 0x1c6   :  { %v3140_v56 = vmul.f32 %v9374_v46, %v2622_v51  ;;  %6914 = vmatmul.mubr.msk.bf16.vlgmr.msra.gmra.mrb[8].mxu0 %vm2455_vm0, %v7879_v62  ;;  %v2624_v55 = vpop.f32.mrb[1].mxu0 }
 0x1c7   :  { %4760 = vmatpush1.bf16.msra.mxu0 %v9114_v26  ;;  %v3141_v43 = vmul.f32 %v9374_v46, %v2624_v55  ;;  %v2626_v13 = vpop.f32.mrb[2].mxu0  ;;  %v3166_v26 = vsub.s32 2, %v9361_v21 }
 0x1c8   :  { %v9387_v57 = vadd.f32 %v3159_v20, %v3140_v56  ;;  %v3147_v10 = vmul.f32 %v9374_v46, %v2626_v13  ;;  %v2628_v11 = vpop.f32.mrb[3].mxu0  ;;  %4761 = vmatprep.subr.bf16.mxu0 %v9126_v4 }
 0x1c9   :  { %v9391_v14 = vadd.f32 %v3163_v23, %v3141_v43  ;;  %v3148_v39 = vmul.f32 %v9374_v46, %v2628_v11  ;;  %v3167_v27 = vrot.slane %v9369_v1, %v3166_v26 }
 0x1ca   :  { %v6916_v32 = vmul.f32 -1.442695, %v9387_v57  ;;  %v9395_v58 = vadd.f32 %v3159_v20, %v3147_v10 }
 0x1cb   :  { %v6917_v5 = vmul.f32 -1.442695, %v9391_v14  ;;  %v9399_v31 = vadd.f32 %v3163_v23, %v3148_v39  ;;  %4762 = vmatpush1.bf16.msra.mxu0 %v9136_v47 }
 0x1cc   :  { %7729 = vpow2.f32 %v6916_v32  ;;  %v6923_v4 = vmul.f32 -1.442695, %v9395_v58  ;;  %4763 = vmatprep.subr.bf16.mxu0 %v9140_v48 }
 0x1cd   :  { %7731 = vpow2.f32 %v6917_v5  ;;  %v6924_v59 = vmul.f32 -1.442695, %v9399_v31  ;;  %v2794_v0 = vpop.f32.mrb[4].mxu0 }
 0x1ce   :  { %7733 = vpow2.f32 %v6923_v4  ;;  %v7517_v16 = vadd.f32 %v2794_v0, %v2751_v38  ;;  %v2796_v28 = vpop.f32.mrb[5].mxu0 }
 0x1cf   :  { %7735 = vpow2.f32 %v6924_v59  ;;  %4764 = vmatpush1.bf16.msra.mxu0 %v9142_v37  ;;  %v7518_v47 = vadd.f32 %v2796_v28, %v2753_v53  ;;  %v2798_v48 = vpop.f32.mrb[6].mxu0 }
 0x1d0   :  { %v3142_v19 = vmul.f32 %v7517_v16, %v9374_v46  ;;  %v7519_v6 = vadd.f32 %v2798_v48, %v2755_v60  ;;  %v2800_v22 = vpop.f32.mrb[7].mxu0  ;;  %4765 = vmatprep.subr.bf16.mxu0 %v9158_v33 }
 0x1d1   :  { %v3143_v3 = vmul.f32 %v7518_v47, %v9374_v46  ;;  %v7520_v25 = vadd.f32 %v2800_v22, %v2757_v9 }
 0x1d2   :  { %v9416_v38 = vadd.f32 %v3167_v27, %v3142_v19  ;;  %v3149_v36 = vmul.f32 %v7519_v6, %v9374_v46 }
 0x1d3   :  { %v9419_v37 = vadd.f32 %v3171_v29, %v3143_v3  ;;  %v3150_v53 = vmul.f32 %v7520_v25, %v9374_v46  ;;  %4766 = vmatpush1.bf16.msra.mxu0 %v9160_v41 }
 0x1d4   :  { %v6918_v20 = vmul.f32 -1.442695, %v9416_v38  ;;  %v9424_v51 = vadd.f32 %v3167_v27, %v3149_v36  ;;  %4767 = vmatprep.subr.bf16.mxu0 %v9168_v61  ;;  %v10373_v36 = vld [vmem:[#allocation22_spill] sm:$0xff] }
 0x1d5   :  { %v6919_v33 = vmul.f32 -1.442695, %v9419_v37  ;;  %v9428_v60 = vadd.f32 %v3171_v29, %v3150_v53 }
 0x1d6   :  { %v7730_v9 = vpop.eup %7729  ;;  %7737 = vpow2.f32 %v6918_v20  ;;  %v6925_v23 = vmul.f32 -1.442695, %v9424_v51  ;;  %v10374_v20 = vld [vmem:[#allocation25_spill] sm:$0xff] }
 0x1d7   :  { %v7732_v56 = vpop.eup %7731  ;;  %v3247_v62 = vadd.f32 1.0, %v7730_v9  ;;  %7739 = vpow2.f32 %v6919_v33  ;;  %4768 = vmatpush1.bf16.msra.mxu0 %v9170_v50  ;;  %v6926_v13 = vmul.f32 -1.442695, %v9428_v60 }
 0x1d8   :  { %v7734_v41 = vpop.eup %7733  ;;  %v3248_v55 = vadd.f32 1.0, %v7732_v56  ;;  %7741 = vpow2.f32 %v6925_v23  ;;  %4769 = vmatprep.subr.bf16.mxu0 %v9179_v2  ;;  %v10375_v23 = vld [vmem:[#allocation26_spill] sm:$0xff]  ;;  %v9480_v56 = vld [vmem:[%s10257_s4 + $0x130] sm:$0xff] }
 0x1d9   :  { %v7736_v43 = vpop.eup %7735  ;;  %7743 = vrcp.f32 %v3247_v62  ;;  %v3254_v61 = vadd.f32 1.0, %v7734_v41  ;;  %v9485_v62 = vld [vmem:[%s10257_s4 + $0x138] sm:$0xff] }
 0x1da   :  { %7745 = vrcp.f32 %v3248_v55  ;;  %v3255_v10 = vadd.f32 1.0, %v7736_v43  ;;  %v7281_v11 = vpop.f32.mrb[4].mxu1 }
 0x1db   :  { %7747 = vrcp.f32 %v3254_v61  ;;  %4770 = vmatpush1.bf16.msra.mxu0 %v9182_v15  ;;  %v7282_v39 = vpop.f32.mrb[5].mxu1  ;;  %v3477_v61 = vunpack.c.l.s8.bf16 %v9480_v56 }
 0x1dc   :  { %7749 = vrcp.f32 %v3255_v10  ;;  %4771 = vmatprep.subr.bf16.mxu0 %v9191_v45  ;;  %v9436_v50 = vadd.f32 %v7282_v39, %v7281_v11  ;;  %v7284_v32 = vpop.f32.mrb[6].mxu1  ;;  %v9446_v45 = vld [vmem:[%s10257_s4 + $0x110] sm:$0xff]  ;;  %v9496_v39 = vld [vmem:[%s10257_s4 + $0x140] sm:$0xff] }
 0x1dd   :  { %7751 = vpow2.f32 %v6926_v13  ;;  %v7285_v2 = vpop.f32.mrb[7].mxu1  ;;  %v3469_v19 = vunpack.c.l.s8.bf16 %v9446_v45  ;;  %v3479_v13 = vunpack.c.l.s8.bf16 %v9485_v62  ;;  %v10376_v11 = vld [vmem:[#allocation29_spill] sm:$0xff] }
 0x1de   :  { %v9438_v5 = vadd.f32 %v7285_v2, %v7284_v32  ;;  %v10377_v2 = vld [vmem:[#allocation38_spill] sm:$0xff] }
 0x1df   :  { %4772 = vmatpush1.bf16.msra.mxu0 %v9194_v7  ;;  %v9451_v7 = vld [vmem:[%s10257_s4 + $0x118] sm:$0xff] }
 0x1e0   :  { %v7738_v4 = vpop.eup %7737  ;;  %4773 = vmatprep.subr.bf16.mxu0 %v9203_v18  ;;  %v3471_v6 = vunpack.c.l.s8.bf16 %v9451_v7 }
 0x1e1   :  { %v7740_v59 = vpop.eup %7739  ;;  %v3249_v0 = vadd.f32 1.0, %v7738_v4 }
 0x1e2   :  { %v7742_v16 = vpop.eup %7741  ;;  %v3250_v18 = vadd.f32 1.0, %v7740_v59  ;;  %v6998_v55 = vcombine.low %v3469_v19, %v3471_v6 }
 0x1e3   :  { %v7744_v15 = vpop.eup %7743  ;;  %7753 = vrcp.f32 %v3249_v0  ;;  %v3256_v27 = vadd.f32 1.0, %v7742_v16  ;;  %4774 = vmatpush1.bf16.msra.mxu0 %v9206_v30  ;;  %v7007_v0 = vcombine.high %v3477_v61, %v3479_v13  ;;  %v3481_v16 = vunpack.c.l.s8.bf16 %v9496_v39 }
 0x1e4   :  { %v7746_v28 = vpop.eup %7745  ;;  %4775 = vmatprep.subr.bf16.mxu0 %v9215_v8  ;;  %v3289_v48 = vmul.f32 %v7744_v15, %v9387_v57  ;;  %v9464_v8 = vld [vmem:[%s10257_s4 + $0x120] sm:$0xff]  ;;  %v9469_v57 = vld [vmem:[%s10257_s4 + $0x128] sm:$0xff] }
 0x1e5   :  { %v7748_v47 = vpop.eup %7747  ;;  %7755 = vrcp.f32 %v3256_v27  ;;  %v3290_v3 = vmul.f32 %v7746_v28, %v9391_v14  ;;  %v3473_v33 = vunpack.c.l.s8.bf16 %v9464_v8  ;;  %v3475_v9 = vunpack.c.l.s8.bf16 %v9469_v57  ;;  %v10378_v28 = vld [vmem:[#allocation41_spill] sm:$0xff] }
 0x1e6   :  { %v7750_v29 = vpop.eup %7749  ;;  %v3296_v30 = vmul.f32 %v7748_v47, %v9395_v58  ;;  %7757 = vrcp.f32 %v3250_v18  ;;  %v10379_v47 = vld [vmem:[#allocation42_spill] sm:$0xff] }
 0x1e7   :  { %v7752_v22 = vpop.eup %7751  ;;  %v3297_v25 = vmul.f32 %v7750_v29, %v9399_v31  ;;  %4776 = vmatpush1.bf16.msra.mxu0 %v10373_v36  ;;  %v6999_v31 = vcombine.high %v3469_v19, %v3471_v6  ;;  %v7003_v43 = vcombine.high %v3473_v33, %v3475_v9  ;;  %v7002_v4 = vcombine.low %v3473_v33, %v3475_v9  ;;  %v10380_v36 = vld [vmem:[#allocation14_spill] sm:$0xff]  ;;  %v10382_v9 = vld [vmem:[#allocation8_spill] sm:$0xff] }
 0x1e8   :  { %v9471_v58 = vpack.c.bf16 %v3296_v30, %v3289_v48  ;;  %v3257_v53 = vadd.f32 1.0, %v7752_v22  ;;  %4777 = vmatprep.subr.bf16.mxu0 %v10374_v20  ;;  %v7006_v30 = vcombine.low %v3477_v61, %v3479_v13 }
 0x1e9   :  { %v3598_v14 = vpack.c.bf16 %v3297_v25, %v3290_v3  ;;  %v9529_v3 = vld [vmem:[%s10257_s4 + $0x160] sm:$0xff]  ;;  %v9534_v25 = vld [vmem:[%s10257_s4 + $0x168] sm:$0xff] }
 0x1ea   :  { %7759 = vrcp.f32 %v3257_v53  ;;  %v3489_v20 = vunpack.c.l.s8.bf16 %v9529_v3 }
 0x1eb   :  { %4778 = vmatpush1.bf16.msra.mxu0 %v10375_v23  ;;  %4619 = vmatprep.mubr.bf16.mxu1 %v3598_v14  ;;  %v9544_v23 = vld [vmem:[%s10257_s4 + $0x170] sm:$0xff] }
 0x1ec   :  { %4791 = vmatprep.mubr.bf16.mxu0 %v3598_v14  ;;  %4620 = vmatmul.mubr.bf16.vlgmr.msra.gmra.mrb[20].mxu1 %v9471_v58  ;;  %v3491_v14 = vunpack.c.l.s8.bf16 %v9534_v25 }
 0x1ed   :  { %v7754_v41 = vpop.eup %7753  ;;  %4631 = vmatpush1.bf16.msra.mxu1 %v9255_v12  ;;  %4779 = vmatprep.subr.bf16.mxu0 %v9257_v54  ;;  %v9501_v12 = vld [vmem:[%s10257_s4 + $0x148] sm:$0xff] }
 0x1ee   :  { %4632 = vmatprep.subr.bf16.mxu1 %v6999_v31  ;;  %v3291_v54 = vmul.f32 %v7754_v41, %v9416_v38  ;;  %v3483_v15 = vunpack.c.l.s8.bf16 %v9501_v12  ;;  %v9514_v38 = vld [vmem:[%s10257_s4 + $0x150] sm:$0xff]  ;;  %v9549_v41 = vld [vmem:[%s10257_s4 + $0x178] sm:$0xff] }
 0x1ef   :  { %v7756_v10 = vpop.eup %7755  ;;  %4780 = vmatpush1.bf16.msra.mxu0 %v10376_v11  ;;  %v3485_v6 = vunpack.c.l.s8.bf16 %v9514_v38 }
 0x1f0   :  { %v3298_v32 = vmul.f32 %v7756_v10, %v9424_v51  ;;  %4781 = vmatprep.subr.bf16.mxu0 %v10377_v2  ;;  %v7758_v59 = vpop.eup %7757  ;;  %v9519_v51 = vld [vmem:[%s10257_s4 + $0x158] sm:$0xff]  ;;  %v7011_v19 = vcombine.high %v3481_v16, %v3483_v15  ;;  %v7010_v53 = vcombine.low %v3481_v16, %v3483_v15  ;;  %v7019_v10 = vcombine.high %v3489_v20, %v3491_v14 }
 0x1f1   :  { %4633 = vmatpush1.bf16.msra.mxu1 %v6998_v55  ;;  %v3292_v29 = vmul.f32 %v7758_v59, %v9419_v37  ;;  %v3487_v22 = vunpack.c.l.s8.bf16 %v9519_v51  ;;  %v9566_v59 = vld [vmem:[%s10257_s4 + $0x188] sm:$0xff] }
 0x1f2   :  { %4634 = vmatprep.subr.bf16.mxu1 %v7003_v43  ;;  %v9508_v27 = vpack.c.bf16 %v3298_v32, %v3291_v54  ;;  %v3493_v54 = vunpack.c.l.s8.bf16 %v9544_v23  ;;  %v3495_v32 = vunpack.c.l.s8.bf16 %v9549_v41 }
 0x1f3   :  { %4782 = vmatpush1.bf16.msra.mxu0 %v10378_v28  ;;  %v7015_v31 = vcombine.high %v3485_v6, %v3487_v22  ;;  %v7014_v13 = vcombine.low %v3485_v6, %v3487_v22  ;;  %v3480_v6 = vunpack.c.h.s8.bf16 %v9485_v62 }
 0x1f4   :  { %v7760_v18 = vpop.eup %7759  ;;  %4783 = vmatprep.subr.bf16.mxu0 %v10379_v47  ;;  %v7023_v15 = vcombine.high %v3493_v54, %v3495_v32  ;;  %v3476_v47 = vunpack.c.h.s8.bf16 %v9469_v57 }
 0x1f5   :  { %4635 = vmatpush1.bf16.msra.mxu1 %v7002_v4  ;;  %v3299_v48 = vmul.f32 %v7760_v18, %v9428_v60  ;;  %v10381_v60 = vld [vmem:[#allocation21_spill] sm:$0xff]  ;;  %v3499_v18 = vunpack.c.l.s8.bf16 %v9566_v59 }
 0x1f6   :  { %4636 = vmatprep.subr.bf16.mxu1 %v7007_v0  ;;  %v3470_v0 = vunpack.c.h.s8.bf16 %v9446_v45 }
 0x1f7   :  { %v3600_v37 = vpack.c.bf16 %v3299_v48, %v3292_v29  ;;  %4784 = vmatpush1.bf16.msra.mxu0 %v10380_v36  ;;  %v7022_v29 = vcombine.low %v3493_v54, %v3495_v32 }
 0x1f8   :  { %4785 = vmatprep.subr.bf16.mxu0 %v10381_v60 }
 0x1f9   :  { %4662 = vmatprep.mubr.bf16.mxu1 %v3600_v37  ;;  %4637 = vmatpush1.bf16.msra.mxu1 %v7006_v30 }
 0x1fa   :  { %4638 = vmatprep.subr.bf16.mxu1 %v7011_v19  ;;  %v7303_v33 = vpop.f32.mrb[8].mxu1 }
 0x1fb   :  { %4786 = vmatpush1.bf16.msra.mxu0 %v10382_v9  ;;  %v7304_v55 = vpop.f32.mrb[9].mxu1 }
 0x1fc   :  { %4787 = vmatprep.subr.bf16.mxu0 %v9307_v34  ;;  %v7305_v43 = vadd.f32 %v7304_v55, %v7303_v33  ;;  %v7306_v61 = vpop.f32.mrb[10].mxu1  ;;  %v9561_v34 = vld [vmem:[%s10257_s4 + $0x180] sm:$0xff] }
 0x1fd   :  { %4639 = vmatpush1.bf16.msra.mxu1 %v7010_v53  ;;  %v7307_v11 = vpop.f32.mrb[11].mxu1  ;;  %v3497_v28 = vunpack.c.l.s8.bf16 %v9561_v34  ;;  %v9611_v53 = vld [vmem:[%s10257_s4 + $0x1b0] sm:$0xff] }
 0x1fe   :  { %4640 = vmatprep.subr.bf16.mxu1 %v7015_v31  ;;  %v9555_v2 = vadd.f32 %v7305_v43, %v9436_v50  ;;  %v7308_v4 = vadd.f32 %v7307_v11, %v7306_v61  ;;  %v3472_v50 = vunpack.c.h.s8.bf16 %v9451_v7  ;;  %v3474_v7 = vunpack.c.h.s8.bf16 %v9464_v8  ;;  %v9602_v8 = vld [vmem:[%s10257_s4 + $0x1a8] sm:$0xff]  ;;  %v9625_v61 = vld [vmem:[%s10257_s4 + $0x1c0] sm:$0xff] }
 0x1ff   :  { %4788 = vmatpush1.bf16.msra.mxu0 %v9309_v40  ;;  %v7018_v40 = vcombine.low %v3489_v20, %v3491_v14  ;;  %v3507_v36 = vunpack.c.l.s8.bf16 %v9602_v8  ;;  %v3482_v20 = vunpack.c.h.s8.bf16 %v9496_v39  ;;  %v3484_v14 = vunpack.c.h.s8.bf16 %v9501_v12  ;;  %v9630_v39 = vld [vmem:[%s10257_s4 + $0x1c8] sm:$0xff] }
 0x200   :  { %4789 = vmatprep.subr.bf16.mxu0 %v9313_v52  ;;  %v9572_v16 = vadd.f32 %v7308_v4, %v9438_v5  ;;  %v9580_v52 = vld [vmem:[%s10257_s4 + $0x190] sm:$0xff]  ;;  %v9585_v5 = vld [vmem:[%s10257_s4 + $0x198] sm:$0xff]  ;;  %v7001_v45 = vcombine.high %v3470_v0, %v3472_v50  ;;  %v7000_v19 = vcombine.low %v3470_v0, %v3472_v50  ;;  %v7005_v57 = vcombine.high %v3474_v7, %v3476_v47 }
 0x201   :  { %4641 = vmatpush1.bf16.msra.mxu1 %v7014_v13  ;;  %v3501_v48 = vunpack.c.l.s8.bf16 %v9580_v52  ;;  %v3503_v30 = vunpack.c.l.s8.bf16 %v9585_v5  ;;  %v7004_v60 = vcombine.low %v3474_v7, %v3476_v47  ;;  %v3509_v9 = vunpack.c.l.s8.bf16 %v9611_v53  ;;  %v9639_v50 = vld [vmem:[%s10257_s4 + $0x1d0] sm:$0xff]  ;;  %v9653_v47 = vld [vmem:[%s10257_s4 + $0x1e0] sm:$0xff] }
 0x202   :  { %4642 = vmatprep.subr.bf16.mxu1 %v7019_v10  ;;  %v7013_v12 = vcombine.high %v3482_v20, %v3484_v14  ;;  %v3486_v13 = vunpack.c.h.s8.bf16 %v9514_v38  ;;  %v3488_v10 = vunpack.c.h.s8.bf16 %v9519_v51  ;;  %v3513_v32 = vunpack.c.l.s8.bf16 %v9625_v61  ;;  %v9644_v38 = vld [vmem:[%s10257_s4 + $0x1d8] sm:$0xff] }
 0x203   :  { %4790 = vmatpush1.bf16.msra.mxu0 %v9315_v63  ;;  %v7027_v63 = vcombine.high %v3497_v28, %v3499_v18  ;;  %v7031_v22 = vcombine.high %v3501_v48, %v3503_v30  ;;  %v7030_v31 = vcombine.low %v3501_v48, %v3503_v30  ;;  %v3515_v4 = vunpack.c.l.s8.bf16 %v9630_v39 }
 0x204   :  { %4802 = vmatprep.subr.bf16.mxu0 %v9321_v44  ;;  %v9597_v44 = vld [vmem:[%s10257_s4 + $0x1a0] sm:$0xff]  ;;  %v7012_v0 = vcombine.low %v3482_v20, %v3484_v14  ;;  %v7017_v51 = vcombine.high %v3486_v13, %v3488_v10  ;;  %v3519_v7 = vunpack.c.l.s8.bf16 %v9644_v38  ;;  %v3496_v48 = vunpack.c.h.s8.bf16 %v9549_v41 }
 0x205   :  { %4643 = vmatpush1.bf16.msra.mxu1 %v7018_v40  ;;  %v3490_v40 = vunpack.c.h.s8.bf16 %v9529_v3  ;;  %v7016_v3 = vcombine.low %v3486_v13, %v3488_v10  ;;  %v7042_v30 = vcombine.low %v3513_v32, %v3515_v4  ;;  %v9688_v10 = vld [vmem:[%s10257_s4 + $0x208] sm:$0xff] }
 0x206   :  { %4792 = vmatmul.mubr.bf16.vlgmr.msra.gmra.mrb[12].mxu0 %v9471_v58  ;;  %4644 = vmatprep.subr.bf16.mxu1 %v7023_v15  ;;  %v3478_v58 = vunpack.c.h.s8.bf16 %v9480_v56  ;;  %v9616_v56 = vld [vmem:[%s10257_s4 + $0x1b8] sm:$0xff]  ;;  %v3492_v15 = vunpack.c.h.s8.bf16 %v9534_v25 }
 0x207   :  { %4803 = vmatpush1.bf16.msra.mxu0 %v9323_v17  ;;  %4834 = vmatprep.mubr.bf16.mxu0 %v3600_v37  ;;  %v7026_v17 = vcombine.low %v3497_v28, %v3499_v18  ;;  %v3505_v37 = vunpack.c.l.s8.bf16 %v9597_v44  ;;  %v3511_v55 = vunpack.c.l.s8.bf16 %v9616_v56  ;;  %v7043_v18 = vcombine.high %v3513_v32, %v3515_v4 }
 0x208   :  { %4804 = vmatprep.subr.bf16.mxu0 %v7001_v45  ;;  %v7009_v62 = vcombine.high %v3478_v58, %v3480_v6  ;;  %v7008_v43 = vcombine.low %v3478_v58, %v3480_v6  ;;  %v3517_v45 = vunpack.c.l.s8.bf16 %v9639_v50  ;;  %v7021_v25 = vcombine.high %v3490_v40, %v3492_v15 }
 0x209   :  { %4645 = vmatpush1.bf16.msra.mxu1 %v7022_v29  ;;  %v7035_v33 = vcombine.high %v3505_v37, %v3507_v36  ;;  %v7034_v11 = vcombine.low %v3505_v37, %v3507_v36  ;;  %v7039_v54 = vcombine.high %v3509_v9, %v3511_v55  ;;  %v7038_v28 = vcombine.low %v3509_v9, %v3511_v55  ;;  %v9658_v29 = vld [vmem:[%s10257_s4 + $0x1e8] sm:$0xff] }
 0x20a   :  { %4646 = vmatprep.subr.bf16.mxu1 %v7027_v63  ;;  %v3494_v63 = vunpack.c.h.s8.bf16 %v9544_v23  ;;  %v7047_v58 = vcombine.high %v3517_v45, %v3519_v7  ;;  %v9672_v23 = vld [vmem:[%s10257_s4 + $0x1f8] sm:$0xff]  ;;  %v3498_v36 = vunpack.c.h.s8.bf16 %v9561_v34  ;;  %v7046_v14 = vcombine.low %v3517_v45, %v3519_v7 }
 0x20b   :  { %4805 = vmatpush1.bf16.msra.mxu0 %v7000_v19  ;;  %v3521_v19 = vunpack.c.l.s8.bf16 %v9653_v47  ;;  %v3527_v55 = vunpack.c.l.s8.bf16 %v9672_v23  ;;  %v3182_v34 = vsub.s32 6, %v9361_v21 }
 0x20c   :  { %4806 = vmatprep.subr.bf16.mxu0 %v7005_v57  ;;  %v3523_v57 = vunpack.c.l.s8.bf16 %v9658_v29  ;;  %v7025_v37 = vcombine.high %v3494_v63, %v3496_v48  ;;  %v7024_v13 = vcombine.low %v3494_v63, %v3496_v48 }
 0x20d   :  { %4647 = vmatpush1.bf16.msra.mxu1 %v7026_v17  ;;  %v7020_v17 = vcombine.low %v3490_v40, %v3492_v15  ;;  %v3531_v15 = vunpack.c.l.s8.bf16 %v9688_v10  ;;  %v3183_v45 = vrot.slane %v9369_v1, %v3182_v34  ;;  %v3514_v34 = vunpack.c.h.s8.bf16 %v9625_v61  ;;  %v9755_v61 = vld [vmem:[%s10257_s4 + $0x248] sm:$0xff] }
 0x20e   :  { %4648 = vmatprep.subr.bf16.mxu1 %v7031_v22  ;;  %v9667_v22 = vld [vmem:[%s10257_s4 + $0x1f0] sm:$0xff]  ;;  %v7050_v4 = vcombine.low %v3521_v19, %v3523_v57 }
 0x20f   :  { %4807 = vmatpush1.bf16.msra.mxu0 %v7004_v60  ;;  %v3500_v60 = vunpack.c.h.s8.bf16 %v9566_v59  ;;  %v3525_v9 = vunpack.c.l.s8.bf16 %v9667_v22  ;;  %v9683_v59 = vld [vmem:[%s10257_s4 + $0x200] sm:$0xff] }
 0x210   :  { %4808 = vmatprep.subr.bf16.mxu0 %v7009_v62  ;;  %v3529_v40 = vunpack.c.l.s8.bf16 %v9683_v59 }
 0x211   :  { %4649 = vmatpush1.bf16.msra.mxu1 %v7030_v31  ;;  %v7051_v31 = vcombine.high %v3521_v19, %v3523_v57  ;;  %v7054_v1 = vcombine.low %v3525_v9, %v3527_v55 }
 0x212   :  { %4650 = vmatprep.subr.bf16.mxu1 %v7035_v33  ;;  %v7059_v57 = vcombine.high %v3529_v40, %v3531_v15 }
 0x213   :  { %4809 = vmatpush1.bf16.msra.mxu0 %v7008_v43 }
 0x214   :  { %4810 = vmatprep.subr.bf16.mxu0 %v7013_v12 }
 0x215   :  { %4651 = vmatpush1.bf16.msra.mxu1 %v7034_v11  ;;  %v7029_v11 = vcombine.high %v3498_v36, %v3500_v60 }
 0x216   :  { %4652 = vmatprep.subr.bf16.mxu1 %v7039_v54  ;;  %v3502_v54 = vunpack.c.h.s8.bf16 %v9580_v52  ;;  %v9699_v52 = vld [vmem:[%s10257_s4 + $0x210] sm:$0xff] }
 0x217   :  { %4811 = vmatpush1.bf16.msra.mxu0 %v7012_v0  ;;  %v7055_v0 = vcombine.high %v3525_v9, %v3527_v55 }
 0x218   :  { %4812 = vmatprep.subr.bf16.mxu0 %v7017_v51 }
 0x219   :  { %4653 = vmatpush1.bf16.msra.mxu1 %v7038_v28  ;;  %v7028_v28 = vcombine.low %v3498_v36, %v3500_v60  ;;  %v3510_v60 = vunpack.c.h.s8.bf16 %v9611_v53  ;;  %v9735_v53 = vld [vmem:[%s10257_s4 + $0x230] sm:$0xff] }
 0x21a   :  { %4654 = vmatprep.subr.bf16.mxu1 %v7043_v18  ;;  %v7325_v6 = vpop.f32.mrb[12].mxu1 }
 0x21b   :  { %4813 = vmatpush1.bf16.msra.mxu0 %v7016_v3  ;;  %v7326_v41 = vpop.f32.mrb[13].mxu1  ;;  %v3506_v3 = vunpack.c.h.s8.bf16 %v9597_v44 }
 0x21c   :  { %4814 = vmatprep.subr.bf16.mxu0 %v7021_v25  ;;  %v7327_v62 = vadd.f32 %v7326_v41, %v7325_v6  ;;  %v7328_v20 = vpop.f32.mrb[14].mxu1  ;;  %v3508_v25 = vunpack.c.h.s8.bf16 %v9602_v8  ;;  %v9717_v8 = vld [vmem:[%s10257_s4 + $0x220] sm:$0xff] }
 0x21d   :  { %4655 = vmatpush1.bf16.msra.mxu1 %v7042_v30  ;;  %v7329_v33 = vpop.f32.mrb[15].mxu1  ;;  %v3537_v9 = vunpack.c.l.s8.bf16 %v9717_v8 }
 0x21e   :  { %4656 = vmatprep.subr.bf16.mxu1 %v7047_v58  ;;  %v7330_v43 = vadd.f32 %v7329_v33, %v7328_v20  ;;  %v3092_v12 = vadd.f32 %v7327_v62, %v9555_v2  ;;  %v3504_v2 = vunpack.c.h.s8.bf16 %v9585_v5  ;;  %v3533_v58 = vunpack.c.l.s8.bf16 %v9699_v52 }
 0x21f   :  { %4815 = vmatpush1.bf16.msra.mxu0 %v7020_v17  ;;  %v7037_v36 = vcombine.high %v3506_v3, %v3508_v25  ;;  %v3512_v62 = vunpack.c.h.s8.bf16 %v9616_v56  ;;  %v9740_v56 = vld [vmem:[%s10257_s4 + $0x238] sm:$0xff] }
 0x220   :  { %4816 = vmatprep.subr.bf16.mxu0 %v7025_v37  ;;  %v3095_v32 = vadd.f32 %v7330_v43, %v9572_v16  ;;  %v9704_v16 = vld [vmem:[%s10257_s4 + $0x218] sm:$0xff]  ;;  %v7033_v5 = vcombine.high %v3502_v54, %v3504_v2  ;;  %v7032_v17 = vcombine.low %v3502_v54, %v3504_v2  ;;  %v9722_v37 = vld [vmem:[%s10257_s4 + $0x228] sm:$0xff]  ;;  %v7036_v43 = vcombine.low %v3506_v3, %v3508_v25 }
 0x221   :  { %4657 = vmatpush1.bf16.msra.mxu1 %v7046_v14  ;;  %v3535_v6 = vunpack.c.l.s8.bf16 %v9704_v16  ;;  %v3539_v55 = vunpack.c.l.s8.bf16 %v9722_v37  ;;  %v3522_v3 = vunpack.c.h.s8.bf16 %v9653_v47  ;;  %v3524_v25 = vunpack.c.h.s8.bf16 %v9658_v29 }
 0x222   :  { %4658 = vmatprep.subr.bf16.mxu1 %v7051_v31  ;;  %v3132_v51 = vpop.f32.mrb[16].mxu1  ;;  %v7058_v31 = vcombine.low %v3529_v40, %v3531_v15  ;;  %v3518_v40 = vunpack.c.h.s8.bf16 %v9639_v50  ;;  %v3520_v15 = vunpack.c.h.s8.bf16 %v9644_v38  ;;  %v9766_v50 = vld [vmem:[%s10257_s4 + $0x250] sm:$0xff]  ;;  %v9771_v38 = vld [vmem:[%s10257_s4 + $0x258] sm:$0xff] }
 0x223   :  { %4817 = vmatpush1.bf16.msra.mxu0 %v7024_v13  ;;  %v3133_v18 = vadd.f32 %v3132_v51, %v3092_v12  ;;  %v7405_v7 = vpop.f32.mrb[17].mxu1  ;;  %v7063_v33 = vcombine.high %v3533_v58, %v3535_v6  ;;  %v7041_v13 = vcombine.high %v3510_v60, %v3512_v62  ;;  %v7062_v54 = vcombine.low %v3533_v58, %v3535_v6  ;;  %v9750_v51 = vld [vmem:[%s10257_s4 + $0x240] sm:$0xff] }
 0x224   :  { %4818 = vmatprep.subr.bf16.mxu0 %v7029_v11  ;;  %v3135_v63 = vpop.f32.mrb[18].mxu1  ;;  %v3516_v11 = vunpack.c.h.s8.bf16 %v9630_v39  ;;  %v7067_v2 = vcombine.high %v3537_v9, %v3539_v55  ;;  %v3547_v7 = vunpack.c.l.s8.bf16 %v9755_v61  ;;  %v3549_v29 = vunpack.c.l.s8.bf16 %v9766_v50 }
 0x225   :  { %4659 = vmatpush1.bf16.msra.mxu1 %v7050_v4  ;;  %v3146_v48 = vmul.f32 %v9374_v46, %v3133_v18  ;;  %v3136_v30 = vadd.f32 %v3135_v63, %v3095_v32  ;;  %v7406_v19 = vpop.f32.mrb[19].mxu1  ;;  %v3541_v32 = vunpack.c.l.s8.bf16 %v9735_v53  ;;  %v3543_v4 = vunpack.c.l.s8.bf16 %v9740_v56 }
 0x226   :  { %4660 = vmatprep.subr.bf16.mxu1 %v7055_v0  ;;  %v7040_v0 = vcombine.low %v3510_v60, %v3512_v62  ;;  %v7045_v39 = vcombine.high %v3514_v34, %v3516_v11  ;;  %v7049_v63 = vcombine.high %v3518_v40, %v3520_v15  ;;  %v3551_v19 = vunpack.c.l.s8.bf16 %v9771_v38 }
 0x227   :  { %4819 = vmatpush1.bf16.msra.mxu0 %v7028_v28  ;;  %v9711_v41 = vadd.f32 %v3183_v45, %v3146_v48  ;;  %v3153_v44 = vmul.f32 %v9374_v46, %v3136_v30  ;;  %v7066_v28 = vcombine.low %v3537_v9, %v3539_v55  ;;  %v7071_v18 = vcombine.high %v3541_v32, %v3543_v4 }
 0x228   :  { %4820 = vmatprep.subr.bf16.mxu0 %v7033_v5  ;;  %v7044_v5 = vcombine.low %v3514_v34, %v3516_v11  ;;  %v7070_v48 = vcombine.low %v3541_v32, %v3543_v4  ;;  %v7048_v58 = vcombine.low %v3518_v40, %v3520_v15  ;;  %v7053_v6 = vcombine.high %v3522_v3, %v3524_v25  ;;  %v9806_v4 = vld [vmem:[%s10257_s4 + $0x280] sm:$0xff]  ;;  %v9823_v15 = vld [vmem:[%s10257_s4 + $0x308] sm:$0xff] }
 0x229   :  { %4661 = vmatpush1.bf16.msra.mxu1 %v7054_v1  ;;  %v6922_v20 = vmul.f32 -1.442695, %v9711_v41  ;;  %v9727_v14 = vadd.f32 %v3183_v45, %v3153_v44  ;;  %v3545_v45 = vunpack.c.l.s8.bf16 %v9750_v51  ;;  %v9783_v44 = vld [vmem:[%s10257_s4 + $0x268] sm:$0xff]  ;;  %v3528_v60 = vunpack.c.h.s8.bf16 %v9672_v23  ;;  %v9818_v40 = vld [vmem:[%s10257_s4 + $0x300] sm:$0xff] }
 0x22a   :  { %4673 = vmatprep.subr.bf16.mxu1 %v7059_v57  ;;  %v3555_v9 = vunpack.c.l.s8.bf16 %v9783_v44  ;;  %v7052_v55 = vcombine.low %v3522_v3, %v3524_v25  ;;  %v7078_v34 = vcombine.low %v3549_v29, %v3551_v19 }
 0x22b   :  { %4821 = vmatpush1.bf16.msra.mxu0 %v7032_v17  ;;  %7761 = vpow2.f32 %v6922_v20  ;;  %v6929_v12 = vmul.f32 -1.442695, %v9727_v14  ;;  %v7075_v47 = vcombine.high %v3545_v45, %v3547_v7  ;;  %v9778_v17 = vld [vmem:[%s10257_s4 + $0x260] sm:$0xff]  ;;  %v7074_v20 = vcombine.low %v3545_v45, %v3547_v7 }
 0x22c   :  { %4663 = vmatmul.mubr.bf16.vlgmr.msra.gmra.mrb[20].mxu1 %v9508_v27  ;;  %4822 = vmatprep.subr.bf16.mxu0 %v7037_v36  ;;  %v3526_v36 = vunpack.c.h.s8.bf16 %v9667_v22  ;;  %v9797_v22 = vld [vmem:[%s10257_s4 + $0x278] sm:$0xff]  ;;  %v3595_v45 = vunpack.c.l.s8.bf16 %v9823_v15 }
 0x22d   :  { %7763 = vpow2.f32 %v6929_v12  ;;  %4674 = vmatpush1.bf16.msra.mxu1 %v7058_v31  ;;  %v7079_v31 = vcombine.high %v3549_v29, %v3551_v19  ;;  %v3530_v12 = vunpack.c.h.s8.bf16 %v9683_v59  ;;  %v9811_v59 = vld [vmem:[%s10257_s4 + $0x288] sm:$0xff]  ;;  %v3540_v29 = vunpack.c.h.s8.bf16 %v9722_v37 }
 0x22e   :  { %4675 = vmatprep.subr.bf16.mxu1 %v7063_v33  ;;  %v3553_v33 = vunpack.c.l.s8.bf16 %v9778_v17  ;;  %v7057_v23 = vcombine.high %v3526_v36, %v3528_v60  ;;  %v7056_v32 = vcombine.low %v3526_v36, %v3528_v60  ;;  %v9862_v37 = vld [vmem:[%s10257_s4 + $0x2a8] sm:$0xff] }
 0x22f   :  { %4823 = vmatpush1.bf16.msra.mxu0 %v7036_v43  ;;  %v9792_v43 = vld [vmem:[%s10257_s4 + $0x270] sm:$0xff] }
 0x230   :  { %4824 = vmatprep.subr.bf16.mxu0 %v7041_v13  ;;  %v3532_v13 = vunpack.c.h.s8.bf16 %v9688_v10  ;;  %v7083_v11 = vcombine.high %v3553_v33, %v3555_v9 }
 0x231   :  { %4676 = vmatpush1.bf16.msra.mxu1 %v7062_v54  ;;  %v3557_v54 = vunpack.c.l.s8.bf16 %v9792_v43 }
 0x232   :  { %4677 = vmatprep.subr.bf16.mxu1 %v7067_v2  ;;  %v3559_v2 = vunpack.c.l.s8.bf16 %v9797_v22  ;;  %v7061_v10 = vcombine.high %v3530_v12, %v3532_v13  ;;  %v7060_v25 = vcombine.low %v3530_v12, %v3532_v13  ;;  %v9871_v12 = vld [vmem:[%s10257_s4 + $0x2b0] sm:$0xff]  ;;  %v3546_v13 = vunpack.c.h.s8.bf16 %v9750_v51  ;;  %v9890_v51 = vld [vmem:[%s10257_s4 + $0x2c8] sm:$0xff] }
 0x233   :  { %4825 = vmatpush1.bf16.msra.mxu0 %v7040_v0  ;;  %v3534_v0 = vunpack.c.h.s8.bf16 %v9699_v52 }
 0x234   :  { %4826 = vmatprep.subr.bf16.mxu0 %v7045_v39  ;;  %v3536_v39 = vunpack.c.h.s8.bf16 %v9704_v16  ;;  %v7087_v52 = vcombine.high %v3557_v54, %v3559_v2  ;;  %v3561_v16 = vunpack.c.l.s8.bf16 %v9806_v4 }
 0x235   :  { %v7762_v1 = vpop.eup %7761  ;;  %4678 = vmatpush1.bf16.msra.mxu1 %v7066_v28  ;;  %v7082_v28 = vcombine.low %v3553_v33, %v3555_v9 }
 0x236   :  { %v3253_v30 = vadd.f32 1.0, %v7762_v1  ;;  %4679 = vmatprep.subr.bf16.mxu1 %v7071_v18  ;;  %v3593_v18 = vunpack.c.l.s8.bf16 %v9818_v40  ;;  %v9838_v1 = vld [vmem:[%s10257_s4 + $0x298] sm:$0xff] }
 0x237   :  { %v7764_v57 = vpop.eup %7763  ;;  %4827 = vmatpush1.bf16.msra.mxu0 %v7044_v5  ;;  %v3563_v5 = vunpack.c.l.s8.bf16 %v9811_v59  ;;  %v3567_v36 = vunpack.c.l.s8.bf16 %v9838_v1 }
 0x238   :  { %4828 = vmatprep.subr.bf16.mxu0 %v7049_v63  ;;  %7765 = vrcp.f32 %v3253_v30  ;;  %v3260_v62 = vadd.f32 1.0, %v7764_v57  ;;  %v9833_v63 = vld [vmem:[%s10257_s4 + $0x290] sm:$0xff]  ;;  %v7086_v57 = vcombine.low %v3557_v54, %v3559_v2  ;;  %v3573_v2 = vunpack.c.l.s8.bf16 %v9871_v12 }
 0x239   :  { %4680 = vmatpush1.bf16.msra.mxu1 %v7070_v48  ;;  %v9844_v48 = vcombine.low %v3593_v18, %v3595_v45 }
 0x23a   :  { %7767 = vrcp.f32 %v3260_v62  ;;  %4681 = vmatprep.subr.bf16.mxu1 %v7075_v47  ;;  %v3538_v47 = vunpack.c.h.s8.bf16 %v9717_v8  ;;  %v7064_v62 = vcombine.low %v3534_v0, %v3536_v39  ;;  %v9857_v8 = vld [vmem:[%s10257_s4 + $0x2a0] sm:$0xff] }
 0x23b   :  { %4829 = vmatpush1.bf16.msra.mxu0 %v7048_v58  ;;  %v7091_v58 = vcombine.high %v3561_v16, %v3563_v5  ;;  %v3569_v9 = vunpack.c.l.s8.bf16 %v9857_v8 }
 0x23c   :  { %4830 = vmatprep.subr.bf16.mxu0 %v7053_v6  ;;  %v3565_v6 = vunpack.c.l.s8.bf16 %v9833_v63 }
 0x23d   :  { %4682 = vmatpush1.bf16.msra.mxu1 %v7074_v20  ;;  %v3544_v20 = vunpack.c.h.s8.bf16 %v9740_v56 }
 0x23e   :  { %4683 = vmatprep.subr.bf16.mxu1 %v7079_v31  ;;  %v7090_v31 = vcombine.low %v3561_v16, %v3563_v5  ;;  %v7095_v33 = vcombine.high %v3565_v6, %v3567_v36  ;;  %v3579_v5 = vunpack.c.l.s8.bf16 %v9890_v51 }
 0x23f   :  { %4831 = vmatpush1.bf16.msra.mxu0 %v7052_v55  ;;  %v3571_v55 = vunpack.c.l.s8.bf16 %v9862_v37 }
 0x240   :  { %4832 = vmatprep.subr.bf16.mxu0 %v7057_v23  ;;  %v7068_v23 = vcombine.low %v3538_v47, %v3540_v29 }
 0x241   :  { %4684 = vmatpush1.bf16.msra.mxu1 %v7078_v34  ;;  %v3548_v34 = vunpack.c.h.s8.bf16 %v9755_v61  ;;  %v7099_v54 = vcombine.high %v3569_v9, %v3571_v55 }
 0x242   :  { %v7766_v7 = vpop.eup %7765  ;;  %4685 = vmatprep.subr.bf16.mxu1 %v7083_v11  ;;  %v7094_v11 = vcombine.low %v3565_v6, %v3567_v36  ;;  %v9913_v6 = vld [vmem:[%s10257_s4 + $0x2e0] sm:$0xff]  ;;  %v3558_v36 = vunpack.c.h.s8.bf16 %v9792_v43  ;;  %v9932_v43 = vld [vmem:[%s10257_s4 + $0x2f8] sm:$0xff] }
 0x243   :  { %4833 = vmatpush1.bf16.msra.mxu0 %v7056_v32  ;;  %v3295_v3 = vmul.f32 %v7766_v7, %v9711_v41  ;;  %v7065_v41 = vcombine.high %v3534_v0, %v3536_v39  ;;  %v9885_v0 = vld [vmem:[%s10257_s4 + $0x2c0] sm:$0xff]  ;;  %v7077_v61 = vcombine.high %v3546_v13, %v3548_v34  ;;  %v3550_v39 = vunpack.c.h.s8.bf16 %v9766_v50  ;;  %v9904_v50 = vld [vmem:[%s10257_s4 + $0x2d8] sm:$0xff] }
 0x244   :  { %v7768_v30 = vpop.eup %7767  ;;  %4845 = vmatprep.subr.bf16.mxu0 %v7061_v10  ;;  %v7098_v7 = vcombine.low %v3569_v9, %v3571_v55  ;;  %v3577_v16 = vunpack.c.l.s8.bf16 %v9885_v0  ;;  %v9927_v9 = vld [vmem:[%s10257_s4 + $0x2f0] sm:$0xff]  ;;  %v3562_v55 = vunpack.c.h.s8.bf16 %v9806_v4 }
 0x245   :  { %v3302_v19 = vmul.f32 %v7768_v30, %v9727_v14  ;;  %4686 = vmatpush1.bf16.msra.mxu1 %v7082_v28  ;;  %v3542_v14 = vunpack.c.h.s8.bf16 %v9735_v53  ;;  %v9876_v53 = vld [vmem:[%s10257_s4 + $0x2b8] sm:$0xff]  ;;  %v3552_v28 = vunpack.c.h.s8.bf16 %v9771_v38  ;;  %v3554_v30 = vunpack.c.h.s8.bf16 %v9778_v17  ;;  %v9918_v17 = vld [vmem:[%s10257_s4 + $0x2e8] sm:$0xff] }
 0x246   :  { %4835 = vmatmul.mubr.bf16.vlgmr.msra.gmra.mrb[12].mxu0 %v9508_v27  ;;  %4687 = vmatprep.subr.bf16.mxu1 %v7087_v52  ;;  %v7069_v27 = vcombine.high %v3538_v47, %v3540_v29  ;;  %v3575_v32 = vunpack.c.l.s8.bf16 %v9876_v53  ;;  %v7107_v29 = vcombine.high %v3577_v16, %v3579_v5 }
 0x247   :  { %v9852_v60 = vpack.c.bf16 %v3302_v19, %v3295_v3  ;;  %4846 = vmatpush1.bf16.msra.mxu0 %v7060_v25  ;;  %v7073_v56 = vcombine.high %v3542_v14, %v3544_v20  ;;  %v7072_v10 = vcombine.low %v3542_v14, %v3544_v20  ;;  %v7076_v3 = vcombine.low %v3546_v13, %v3548_v34  ;;  %v9899_v25 = vld [vmem:[%s10257_s4 + $0x2d0] sm:$0xff] }
 0x248   :  { %4847 = vmatprep.subr.bf16.mxu0 %v7065_v41  ;;  %v7103_v52 = vcombine.high %v3573_v2, %v3575_v32  ;;  %v7081_v38 = vcombine.high %v3550_v39, %v3552_v28  ;;  %v3556_v41 = vunpack.c.h.s8.bf16 %v9783_v44  ;;  %v7102_v47 = vcombine.low %v3573_v2, %v3575_v32 }
 0x249   :  { %4688 = vmatpush1.bf16.msra.mxu1 %v7086_v57  ;;  %v3581_v19 = vunpack.c.l.s8.bf16 %v9899_v25  ;;  %v3583_v57 = vunpack.c.l.s8.bf16 %v9904_v50  ;;  %v3585_v20 = vunpack.c.l.s8.bf16 %v9913_v6  ;;  %v3589_v34 = vunpack.c.l.s8.bf16 %v9927_v9 }
 0x24a   :  { %4689 = vmatprep.subr.bf16.mxu1 %v7091_v58  ;;  %v7080_v58 = vcombine.low %v3550_v39, %v3552_v28  ;;  %v7085_v44 = vcombine.high %v3554_v30, %v3556_v41  ;;  %v3566_v32 = vunpack.c.h.s8.bf16 %v9833_v63  ;;  %v3570_v28 = vunpack.c.h.s8.bf16 %v9857_v8 }
 0x24b   :  { %4848 = vmatpush1.bf16.msra.mxu0 %v7064_v62  ;;  %v3560_v62 = vunpack.c.h.s8.bf16 %v9797_v22  ;;  %v7111_v14 = vcombine.high %v3581_v19, %v3583_v57  ;;  %v7123_v63 = vcombine.high %v3593_v18, %v3595_v45 }
 0x24c   :  { %4849 = vmatprep.subr.bf16.mxu0 %v7069_v27  ;;  %v7106_v27 = vcombine.low %v3577_v16, %v3579_v5  ;;  %v3574_v5 = vunpack.c.h.s8.bf16 %v9871_v12  ;;  %v3584_v12 = vunpack.c.h.s8.bf16 %v9904_v50 }
 0x24d   :  { %4690 = vmatpush1.bf16.msra.mxu1 %v7090_v31  ;;  %v3587_v31 = vunpack.c.l.s8.bf16 %v9918_v17  ;;  %v7089_v22 = vcombine.high %v3558_v36, %v3560_v62 }
 0x24e   :  { %4691 = vmatprep.subr.bf16.mxu1 %v7095_v33  ;;  %v7084_v33 = vcombine.low %v3554_v30, %v3556_v41  ;;  %v3580_v30 = vunpack.c.h.s8.bf16 %v9890_v51  ;;  %v3582_v41 = vunpack.c.h.s8.bf16 %v9899_v25 }
 0x24f   :  { %4850 = vmatpush1.bf16.msra.mxu0 %v7068_v23  ;;  %v3564_v23 = vunpack.c.h.s8.bf16 %v9811_v59  ;;  %v7115_v13 = vcombine.high %v3585_v20, %v3587_v31  ;;  %v7114_v4 = vcombine.low %v3585_v20, %v3587_v31 }
 0x250   :  { %4851 = vmatprep.subr.bf16.mxu0 %v7073_v56  ;;  %v7110_v56 = vcombine.low %v3581_v19, %v3583_v57  ;;  %v3588_v19 = vunpack.c.h.s8.bf16 %v9918_v17  ;;  %v3590_v57 = vunpack.c.h.s8.bf16 %v9927_v9 }
 0x251   :  { %4692 = vmatpush1.bf16.msra.mxu1 %v7094_v11  ;;  %v3591_v11 = vunpack.c.l.s8.bf16 %v9932_v43  ;;  %v7093_v2 = vcombine.high %v3562_v55, %v3564_v23 }
 0x252   :  { %4693 = vmatprep.subr.bf16.mxu1 %v7099_v54  ;;  %v7088_v54 = vcombine.low %v3558_v36, %v3560_v62  ;;  %v3596_v36 = vunpack.c.h.s8.bf16 %v9823_v15  ;;  %v3174_v62 = vsub.s32 4, %v9361_v21 }
 0x253   :  { %4852 = vmatpush1.bf16.msra.mxu0 %v7072_v10  ;;  %v3568_v10 = vunpack.c.h.s8.bf16 %v9838_v1  ;;  %v7119_v59 = vcombine.high %v3589_v34, %v3591_v11 }
 0x254   :  { %4853 = vmatprep.subr.bf16.mxu0 %v7077_v61  ;;  %v7092_v61 = vcombine.low %v3562_v55, %v3564_v23 }
 0x255   :  { %4694 = vmatpush1.bf16.msra.mxu1 %v7098_v7  ;;  %v7097_v39 = vcombine.high %v3566_v32, %v3568_v10  ;;  %v3572_v7 = vunpack.c.h.s8.bf16 %v9862_v37  ;;  %v7096_v1 = vcombine.low %v3566_v32, %v3568_v10 }
 0x256   :  { %4695 = vmatprep.subr.bf16.mxu1 %v7103_v52  ;;  %v7118_v52 = vcombine.low %v3589_v34, %v3591_v11 }
 0x257   :  { %4854 = vmatpush1.bf16.msra.mxu0 %v7076_v3  ;;  %v7101_v16 = vcombine.high %v3570_v28, %v3572_v7  ;;  %v3576_v3 = vunpack.c.h.s8.bf16 %v9876_v53  ;;  %v7100_v8 = vcombine.low %v3570_v28, %v3572_v7 }
 0x258   :  { %4855 = vmatprep.subr.bf16.mxu0 %v7081_v38  ;;  %v3578_v38 = vunpack.c.h.s8.bf16 %v9885_v0  ;;  %v7112_v0 = vcombine.low %v3582_v41, %v3584_v12 }
 0x259   :  { %4696 = vmatpush1.bf16.msra.mxu1 %v7102_v47  ;;  %v7105_v37 = vcombine.high %v3574_v5, %v3576_v3  ;;  %v7104_v18 = vcombine.low %v3574_v5, %v3576_v3  ;;  %v7113_v47 = vcombine.high %v3582_v41, %v3584_v12  ;;  %v7604_v41 = vld [vmem:[#allocation5 + $0x4] ss:$8 sps:$4 sm:$0xff]   ;;  %v7602_v12 = vld [vmem:[#allocation5] ss:$8 sps:$4 sm:$0xff]  }
 0x25a   :  { %4697 = vmatprep.subr.bf16.mxu1 %v7107_v29  ;;  %v7109_v45 = vcombine.high %v3578_v38, %v3580_v30  ;;  %v7108_v53 = vcombine.low %v3578_v38, %v3580_v30  ;;  %v3586_v29 = vunpack.c.h.s8.bf16 %v9913_v6 }
 0x25b   :  { %4856 = vmatpush1.bf16.msra.mxu0 %v7080_v58  ;;  %v3592_v58 = vunpack.c.h.s8.bf16 %v9932_v43 }
 0x25c   :  { %4857 = vmatprep.subr.bf16.mxu0 %v7085_v44  ;;  %v7117_v51 = vcombine.high %v3586_v29, %v3588_v19  ;;  %v7116_v25 = vcombine.low %v3586_v29, %v3588_v19  ;;  %v3594_v44 = vunpack.c.h.s8.bf16 %v9818_v40  ;;  %v7610_v29 = vld [vmem:[#allocation5 + $0x24] ss:$8 sps:$4 sm:$0xff]   ;;  %v7613_v19 = vld [vmem:[#allocation5 + $0x34] ss:$8 sps:$4 sm:$0xff]  }
 0x25d   :  { %4698 = vmatpush1.bf16.msra.mxu1 %v7106_v27  ;;  %v7121_v50 = vcombine.high %v3590_v57, %v3592_v58  ;;  %v7120_v6 = vcombine.low %v3590_v57, %v3592_v58  ;;  %v3178_v27 = vsub.s32 5, %v9361_v21  ;;  %v7619_v57 = vld [vmem:[#allocation5 + $0x54] ss:$8 sps:$4 sm:$0xff]   ;;  %v7617_v58 = vld [vmem:[#allocation5 + $0x50] ss:$8 sps:$4 sm:$0xff]  }
 0x25e   :  { %4699 = vmatprep.subr.bf16.mxu1 %v7111_v14  ;;  %v7125_v17 = vcombine.high %v3594_v44, %v3596_v36  ;;  %v7880_v14 = vld [vmem:[%s10260_s7] sm:$0x7f] }
 0x25f   :  { %4858 = vmatpush1.bf16.msra.mxu0 %v7084_v33  ;;  %v3175_v20 = vrot.slane %v7880_v14, %v3174_v62  ;;  %v3179_v33 = vrot.slane %v7880_v14, %v3178_v27  ;;  %v7629_v62 = vld [vmem:[#allocation5 + $0x90] ss:$8 sps:$4 sm:$0xff]   ;;  %v7634_v27 = vld [vmem:[#allocation5 + $0xa4] ss:$8 sps:$4 sm:$0xff]   ;;  %v7632_v14 = vld [vmem:[#allocation5 + $0xa0] ss:$8 sps:$4 sm:$0xff]  }
 0x260   :  { %4859 = vmatprep.subr.bf16.mxu0 %v7089_v22 }
 0x261   :  { %4700 = vmatpush1.bf16.msra.mxu1 %v7110_v56 }
 0x262   :  { %4701 = vmatprep.subr.bf16.mxu1 %v7115_v13 }
 0x263   :  { %4860 = vmatpush1.bf16.msra.mxu0 %v7088_v54 }
 0x264   :  { %4861 = vmatprep.subr.bf16.mxu0 %v7093_v2 }
 0x265   :  { %4702 = vmatpush1.bf16.msra.mxu1 %v7114_v4 }
 0x266   :  { %4703 = vmatprep.subr.bf16.mxu1 %v7119_v59 }
 0x267   :  { %4862 = vmatpush1.bf16.msra.mxu0 %v7092_v61 }
 0x268   :  { %4863 = vmatprep.subr.bf16.mxu0 %v7097_v39 }
 0x269   :  { %4704 = vmatpush1.bf16.msra.mxu1 %v7118_v52 }
 0x26a   :  { %4716 = vmatprep.subr.bf16.mxu1 %v7123_v63 }
 0x26b   :  { %4864 = vmatpush1.bf16.msra.mxu0 %v7096_v1 }
 0x26c   :  { %4865 = vmatprep.subr.bf16.mxu0 %v7101_v16 }
 0x26f   :  { %4866 = vmatpush1.bf16.msra.mxu0 %v7100_v8 }
 0x270   :  { %4867 = vmatprep.subr.bf16.mxu0 %v7105_v37 }
 0x273   :  { %4868 = vmatpush1.bf16.msra.mxu0 %v7104_v18 }
 0x274   :  { %4869 = vmatprep.subr.bf16.mxu0 %v7109_v45  ;;  %v7124_v45 = vcombine.low %v3594_v44, %v3596_v36  ;;  %v7623_v44 = vld [vmem:[#allocation5 + $0x70] ss:$8 sps:$4 sm:$0xff]   ;;  %v7628_v36 = vld [vmem:[#allocation5 + $0x84] ss:$8 sps:$4 sm:$0xff]  }
 0x277   :  { %4870 = vmatpush1.bf16.msra.mxu0 %v7108_v53  ;;  %v7607_v53 = vld [vmem:[#allocation5 + $0x14] ss:$8 sps:$4 sm:$0xff]  }
 0x278   :  { %4871 = vmatprep.subr.bf16.mxu0 %v7113_v47  ;;  %v7605_v47 = vld [vmem:[#allocation5 + $0x10] ss:$8 sps:$4 sm:$0xff]  }
 0x27b   :  { %4872 = vmatpush1.bf16.msra.mxu0 %v7112_v0  ;;  %v7611_v0 = vld [vmem:[#allocation5 + $0x30] ss:$8 sps:$4 sm:$0xff]  }
 0x27c   :  { %4873 = vmatprep.subr.bf16.mxu0 %v7117_v51  ;;  %v7614_v51 = vld [vmem:[#allocation5 + $0x40] ss:$8 sps:$4 sm:$0xff]  }
 0x27f   :  { %4874 = vmatpush1.bf16.msra.mxu0 %v7116_v25  ;;  %v7620_v25 = vld [vmem:[#allocation5 + $0x60] ss:$8 sps:$4 sm:$0xff]  }
 0x280   :  { %4875 = vmatprep.subr.bf16.mxu0 %v7121_v50  ;;  %v7625_v50 = vld [vmem:[#allocation5 + $0x74] ss:$8 sps:$4 sm:$0xff]  }
 0x283   :  { %4876 = vmatpush1.bf16.msra.mxu0 %v7120_v6  ;;  %v7626_v6 = vld [vmem:[#allocation5 + $0x80] ss:$8 sps:$4 sm:$0xff]  }
 0x284   :  { %4888 = vmatprep.subr.bf16.mxu0 %v7125_v17  ;;  %v7631_v17 = vld [vmem:[#allocation5 + $0x94] ss:$8 sps:$4 sm:$0xff]  }
 0x299   :  { %v2966_v31 = vpop.f32.mrb[8].mxu0 }
 0x29a   :  { %v3144_v40 = vmul.f32 %v9374_v46, %v2966_v31  ;;  %v2968_v15 = vpop.f32.mrb[9].mxu0  ;;  %v7635_v31 = vld [vmem:[#allocation5 + $0xb0] ss:$8 sps:$4 sm:$0xff]  }
 0x29b   :  { %v3145_v9 = vmul.f32 %v9374_v46, %v2968_v15  ;;  %v2970_v43 = vpop.f32.mrb[10].mxu0  ;;  %v7643_v15 = vld [vmem:[#allocation5 + $0xd4] ss:$8 sps:$4 sm:$0xff]  }
 0x29c   :  { %v3195_v22 = vadd.f32 %v3175_v20, %v3144_v40  ;;  %v3151_v55 = vmul.f32 %v9374_v46, %v2970_v43  ;;  %v2972_v23 = vpop.f32.mrb[11].mxu0  ;;  %v7638_v40 = vld [vmem:[#allocation5 + $0xc0] ss:$8 sps:$4 sm:$0xff]   ;;  %v7646_v43 = vld [vmem:[#allocation5 + $0xe4] ss:$8 sps:$4 sm:$0xff]  }
 0x29d   :  { %v3196_v56 = vadd.f32 %v3179_v33, %v3145_v9  ;;  %v3152_v13 = vmul.f32 %v9374_v46, %v2972_v23  ;;  %v7641_v9 = vld [vmem:[#allocation5 + $0xd0] ss:$8 sps:$4 sm:$0xff]  }
 0x29e   :  { %v6920_v34 = vmul.f32 -1.442695, %v3195_v22  ;;  %v3202_v11 = vadd.f32 %v3175_v20, %v3151_v55  ;;  %v7637_v20 = vld [vmem:[#allocation5 + $0xb4] ss:$8 sps:$4 sm:$0xff]   ;;  %v7647_v23 = vld [vmem:[#allocation5 + $0xf0] ss:$8 sps:$4 sm:$0xff]  }
 0x29f   :  { %v6921_v54 = vmul.f32 -1.442695, %v3196_v56  ;;  %v3203_v2 = vadd.f32 %v3179_v33, %v3152_v13  ;;  %v7640_v33 = vld [vmem:[#allocation5 + $0xc4] ss:$8 sps:$4 sm:$0xff]   ;;  %v7649_v55 = vld [vmem:[#allocation5 + $0xf4] ss:$8 sps:$4 sm:$0xff]  }
 0x2a0   :  { %7769 = vpow2.f32 %v6920_v34  ;;  %v6927_v32 = vmul.f32 -1.442695, %v3202_v11  ;;  %v4940_v13 = vld [vmem:[%s10260_s7 + $0x7] sm:$0xf]  ;;  %v4931_v34 = vstv %s6561_s29 }
 0x2a1   :  { %7771 = vpow2.f32 %v6921_v54  ;;  %v6928_v10 = vmul.f32 -1.442695, %v3203_v2  ;;  %v4953_v54 = vrot.slane %v4940_v13, %v3166_v26 }
 0x2a2   :  { %7773 = vpow2.f32 %v6927_v32 }
 0x2a3   :  { %7775 = vpow2.f32 %v6928_v10  ;;  %v4949_v10 = vrot.slane %v4940_v13, %v9372_v35 }
 0x2aa   :  { %v7770_v4 = vpop.eup %7769 }
 0x2ab   :  { %v7772_v59 = vpop.eup %7771  ;;  %v3251_v61 = vadd.f32 1.0, %v7770_v4  ;;  %v4957_v4 = vrot.slane %v4940_v13, %v3170_v24 }
 0x2ac   :  { %v7774_v39 = vpop.eup %7773  ;;  %v3252_v28 = vadd.f32 1.0, %v7772_v59 }
 0x2ad   :  { %v7776_v7 = vpop.eup %7775  ;;  %7777 = vrcp.f32 %v3251_v61  ;;  %v3258_v52 = vadd.f32 1.0, %v7774_v39 }
 0x2ae   :  { %7779 = vrcp.f32 %v3252_v28  ;;  %v3259_v46 = vadd.f32 1.0, %v7776_v7 }
 0x2af   :  { %7781 = vrcp.f32 %v3258_v52 }
 0x2b0   :  { %7783 = vrcp.f32 %v3259_v46 }
 0x2b7   :  { %v7778_v63 = vpop.eup %7777 }
 0x2b8   :  { %v7780_v1 = vpop.eup %7779  ;;  %v3293_v3 = vmul.f32 %v7778_v63, %v3195_v22  ;;  %v7644_v22 = vld [vmem:[#allocation5 + $0xe0] ss:$8 sps:$4 sm:$0xff]  }
 0x2b9   :  { %v7782_v16 = vpop.eup %7781  ;;  %v3294_v37 = vmul.f32 %v7780_v1, %v3196_v56  ;;  %v7652_v56 = vld [vmem:[#allocation5 + $0x104] ss:$8 sps:$4 sm:$0xff]  }
 0x2ba   :  { %v7784_v5 = vpop.eup %7783  ;;  %v3300_v8 = vmul.f32 %v7782_v16, %v3202_v11  ;;  %v4945_v11 = vrot.slane %v4940_v13, %v9364_v42 }
 0x2bb   :  { %v3301_v38 = vmul.f32 %v7784_v5, %v3203_v2 }
 0x2bc   :  { %v3601_v30 = vpack.c.bf16 %v3300_v8, %v3293_v3 }
 0x2bd   :  { %v3602_v18 = vpack.c.bf16 %v3301_v38, %v3294_v37 }
 0x2bf   :  { %4705 = vmatprep.mubr.bf16.mxu1 %v3602_v18  ;;  %4877 = vmatprep.mubr.bf16.mxu0 %v3602_v18 }
 0x2c0   :  { %4706 = vmatmul.mubr.bf16.vlgmr.msra.gmra.mrb[20].mxu1 %v3601_v30  ;;  %4878 = vmatmul.mubr.bf16.vlgmr.msra.gmra.mrb[12].mxu0 %v3601_v30 }
 0x2c1   :  { %4717 = vmatpush1.bf16.msra.mxu1 %v9844_v48  ;;  %4889 = vmatpush1.bf16.msra.mxu0 %v7124_v45  ;;  %v7608_v48 = vld [vmem:[#allocation5 + $0x20] ss:$8 sps:$4 sm:$0xff]  }
 0x2c2   :  { %4748 = vmatprep.mubr.bf16.mxu1 %v10372_v49  ;;  %4920 = vmatprep.mubr.bf16.mxu0 %v10372_v49  ;;  %v7616_v49 = vld [vmem:[#allocation5 + $0x44] ss:$8 sps:$4 sm:$0xff]  }
 0x2c3   :  { %5347 = vmatprep.subr.bf16.mxu1 %v7604_v41 }
 0x2cc   :  { %7126 = vmatmul.mubr.msk.bf16.vlgmr.msra.gmra.mrb[20].mxu1 %vm2455_vm0, %v9852_v60  ;;  %7127 = vmatmul.mubr.msk.bf16.vlgmr.msra.gmra.mrb[12].mxu0 %vm2455_vm0, %v9852_v60  ;;  %v7622_v60 = vld [vmem:[#allocation5 + $0x64] ss:$8 sps:$4 sm:$0xff]  }
 0x2cd   :  { %5348 = vmatpush1.bf16.msra.mxu1 %v7602_v12 }
 0x2ce   :  { %5349 = vmatprep.subr.bf16.mxu1 %v7607_v53 }
 0x2d1   :  { %5350 = vmatpush1.bf16.msra.mxu1 %v7605_v47 }
 0x2d2   :  { %5351 = vmatprep.subr.bf16.mxu1 %v7610_v29 }
 0x2d5   :  { %5352 = vmatpush1.bf16.msra.mxu1 %v7608_v48 }
 0x2d6   :  { %5353 = vmatprep.subr.bf16.mxu1 %v7613_v19 }
 0x2d9   :  { %5354 = vmatpush1.bf16.msra.mxu1 %v7611_v0 }
 0x2da   :  { %5355 = vmatprep.subr.bf16.mxu1 %v7616_v49 }
 0x2dd   :  { %5356 = vmatpush1.bf16.msra.mxu1 %v7614_v51 }
 0x2de   :  { %5357 = vmatprep.subr.bf16.mxu1 %v7619_v57 }
 0x2e1   :  { %5358 = vmatpush1.bf16.msra.mxu1 %v7617_v58 }
 0x2e2   :  { %5359 = vmatprep.subr.bf16.mxu1 %v7622_v60 }
 0x2e5   :  { %5360 = vmatpush1.bf16.msra.mxu1 %v7620_v25 }
 0x2e6   :  { %5361 = vmatprep.subr.bf16.mxu1 %v7625_v50 }
 0x2e9   :  { %5362 = vmatpush1.bf16.msra.mxu1 %v7623_v44 }
 0x2ea   :  { %5363 = vmatprep.subr.bf16.mxu1 %v7628_v36 }
 0x2ed   :  { %5364 = vmatpush1.bf16.msra.mxu1 %v7626_v6 }
 0x2ee   :  { %5365 = vmatprep.subr.bf16.mxu1 %v7631_v17 }
 0x2f1   :  { %5366 = vmatpush1.bf16.msra.mxu1 %v7629_v62 }
 0x2f2   :  { %5367 = vmatprep.subr.bf16.mxu1 %v7634_v27 }
 0x2f5   :  { %5368 = vmatpush1.bf16.msra.mxu1 %v7632_v14 }
 0x2f6   :  { %5369 = vmatprep.subr.bf16.mxu1 %v7637_v20 }
 0x2f9   :  { %5370 = vmatpush1.bf16.msra.mxu1 %v7635_v31 }
 0x2fa   :  { %5371 = vmatprep.subr.bf16.mxu1 %v7640_v33 }
 0x2fd   :  { %5372 = vmatpush1.bf16.msra.mxu1 %v7638_v40 }
 0x2fe   :  { %5373 = vmatprep.subr.bf16.mxu1 %v7643_v15 }
 0x301   :  { %5374 = vmatpush1.bf16.msra.mxu1 %v7641_v9 }
 0x302   :  { %5375 = vmatprep.subr.bf16.mxu1 %v7646_v43 }
 0x305   :  { %5376 = vmatpush1.bf16.msra.mxu1 %v7644_v22 }
 0x306   :  { %5377 = vmatprep.subr.bf16.mxu1 %v7649_v55 }
 0x309   :  { %5378 = vmatpush1.bf16.msra.mxu1 %v7647_v23 }
 0x30a   :  { %5390 = vmatprep.subr.bf16.mxu1 %v7652_v56 }
 0x39f   :  { %v4750_v2 = vpop.f32.mrb[20].mxu1  ;;  %v4922_v32 = vpop.f32.mrb[12].mxu0 }
 0x3a0   :  { %v4932_v59 = vmul.f32 %v4931_v34, %v4750_v2  ;;  %v4934_v61 = vmul.f32 %v4931_v34, %v4922_v32  ;;  %v4752_v39 = vpop.f32.mrb[21].mxu1  ;;  %v4924_v28 = vpop.f32.mrb[13].mxu0 }
 0x3a1   :  { %v4933_v7 = vmul.f32 %v4931_v34, %v4752_v39  ;;  %v4935_v52 = vmul.f32 %v4931_v34, %v4924_v28  ;;  %v4754_v46 = vpop.f32.mrb[22].mxu1  ;;  %v4926_v63 = vpop.f32.mrb[14].mxu0  ;;  %v7650_v28 = vld [vmem:[#allocation5 + $0x100] ss:$8 sps:$4 sm:$0xff]  }
 0x3a2   :  { %v4962_v1 = vadd.f32 %v4945_v11, %v4932_v59  ;;  %v4964_v16 = vadd.f32 %v4953_v54, %v4934_v61  ;;  %v4936_v5 = vmul.f32 %v4931_v34, %v4754_v46  ;;  %v4938_v3 = vmul.f32 %v4931_v34, %v4926_v63  ;;  %v4756_v26 = vpop.f32.mrb[23].mxu1  ;;  %v4928_v8 = vpop.f32.mrb[15].mxu0  ;;  %v7653_v46 = vld [vmem:[#allocation5 + $0x110] ss:$8 sps:$4 sm:$0xff]   ;;  %v7658_v63 = vld [vmem:[#allocation5 + $0x124] ss:$8 sps:$4 sm:$0xff]  }
 0x3a3   :  { %v4963_v37 = vadd.f32 %v4949_v10, %v4933_v7  ;;  %v4965_v38 = vadd.f32 %v4957_v4, %v4935_v52  ;;  %v4937_v30 = vmul.f32 %v4931_v34, %v4756_v26  ;;  %v4939_v18 = vmul.f32 %v4931_v34, %v4928_v8  ;;  %v7655_v52 = vld [vmem:[#allocation5 + $0x114] ss:$8 sps:$4 sm:$0xff]   ;;  %v7662_v26 = vld [vmem:[#allocation5 + $0x140] ss:$8 sps:$4 sm:$0xff]  }
 0x3a4   :  { %v7128_v21 = vmul.f32 -1.442695, %v4962_v1  ;;  %v7130_v24 = vmul.f32 -1.442695, %v4964_v16  ;;  %v4966_v45 = vadd.f32 %v4945_v11, %v4936_v5  ;;  %v4968_v41 = vadd.f32 %v4953_v54, %v4938_v3  ;;  %v7659_v5 = vld [vmem:[#allocation5 + $0x130] ss:$8 sps:$4 sm:$0xff]  }
 0x3a5   :  { %v7129_v12 = vmul.f32 -1.442695, %v4963_v37  ;;  %v7131_v53 = vmul.f32 -1.442695, %v4965_v38  ;;  %v4967_v47 = vadd.f32 %v4949_v10, %v4937_v30  ;;  %v4969_v29 = vadd.f32 %v4957_v4, %v4939_v18  ;;  %v7664_v3 = vld [vmem:[#allocation5 + $0x144] ss:$8 sps:$4 sm:$0xff]  }
 0x3a6   :  { %7785 = vpow2.f32 %v7128_v21  ;;  %v7132_v48 = vmul.f32 -1.442695, %v4966_v45  ;;  %v7134_v19 = vmul.f32 -1.442695, %v4968_v41  ;;  %v7667_v8 = vld [vmem:[#allocation5 + $0x154] ss:$8 sps:$4 sm:$0xff]  }
 0x3a7   :  { %7787 = vpow2.f32 %v7130_v24  ;;  %v7133_v0 = vmul.f32 -1.442695, %v4967_v47  ;;  %v7135_v49 = vmul.f32 -1.442695, %v4969_v29  ;;  %v7668_v30 = vld [vmem:[#allocation5 + $0x160] ss:$8 sps:$4 sm:$0xff]  }
 0x3a8   :  { %7789 = vpow2.f32 %v7129_v12  ;;  %v7673_v18 = vld [vmem:[#allocation5 + $0x174] ss:$8 sps:$4 sm:$0xff]   ;;  %v5074_v21 = vld [vmem:[#allocation5 + $0x180] sm:$0xff]  ;;  %v7671_v24 = vld [vmem:[#allocation5 + $0x170] ss:$8 sps:$4 sm:$0xff]  }
 0x3a9   :  { %7791 = vpow2.f32 %v7131_v53  ;;  %v10383_v53 = vmov 0.0  }
 0x3aa   :  { %7793 = vpow2.f32 %v7132_v48  ;;  %v7678_v48 = vld [vmem:[%s10259_s6 + $0x48] sm:$0xff]  }
 0x3ab   :  { %7795 = vpow2.f32 %v7134_v19  ;;  %v7679_v19 = vld [vmem:[%s10259_s6 + $0x8] sm:$0xff]  }
 0x3ac   :  { %7797 = vpow2.f32 %v7133_v0  ;;  %v7680_v0 = vld [vmem:[%s10259_s6 + $0x50] sm:$0xff]  }
 0x3ad   :  { %7799 = vpow2.f32 %v7135_v49  ;;  %v7681_v49 = vld [vmem:[%s10259_s6 + $0x10] sm:$0xff]  }
 0x3b0   :  { %v7786_v51 = vpop.eup %7785 }
 0x3b1   :  { %v7788_v57 = vpop.eup %7787  ;;  %v4994_v58 = vadd.f32 1.0, %v7786_v51  ;;  %v7682_v51 = vld [vmem:[%s10259_s6 + $0x58] sm:$0xff]  }
 0x3b2   :  { %v7790_v60 = vpop.eup %7789  ;;  %v4996_v25 = vadd.f32 1.0, %v7788_v57  ;;  %v7683_v57 = vld [vmem:[%s10259_s6 + $0x18] sm:$0xff]  }
 0x3b3   :  { %v7792_v50 = vpop.eup %7791  ;;  %7801 = vrcp.f32 %v4994_v58  ;;  %v4995_v44 = vadd.f32 1.0, %v7790_v60  ;;  %v7684_v58 = vld [vmem:[%s10259_s6 + $0x60] sm:$0xff]  }
 0x3b4   :  { %v7794_v36 = vpop.eup %7793  ;;  %7803 = vrcp.f32 %v4996_v25  ;;  %v4997_v6 = vadd.f32 1.0, %v7792_v50  ;;  %v7685_v60 = vld [vmem:[%s10259_s6 + $0x20] sm:$0xff]   ;;  %v7686_v25 = vld [vmem:[%s10259_s6 + $0x68] sm:$0xff]  }
 0x3b5   :  { %v7796_v17 = vpop.eup %7795  ;;  %7805 = vrcp.f32 %v4995_v44  ;;  %v4998_v62 = vadd.f32 1.0, %v7794_v36  ;;  %v7687_v50 = vld [vmem:[%s10259_s6 + $0x28] sm:$0xff]   ;;  %v7688_v44 = vld [vmem:[%s10259_s6 + $0x70] sm:$0xff]  }
 0x3b6   :  { %v7798_v27 = vpop.eup %7797  ;;  %7807 = vrcp.f32 %v4997_v6  ;;  %v5000_v14 = vadd.f32 1.0, %v7796_v17  ;;  %v7689_v36 = vld [vmem:[%s10259_s6 + $0x30] sm:$0xff]   ;;  %v7690_v6 = vld [vmem:[%s10259_s6 + $0x78] sm:$0xff]  }
 0x3b7   :  { %v7800_v20 = vpop.eup %7799  ;;  %7809 = vrcp.f32 %v4998_v62  ;;  %v4999_v31 = vadd.f32 1.0, %v7798_v27  ;;  %v7691_v17 = vld [vmem:[%s10259_s6 + $0x38] sm:$0xff]   ;;  %v5079_v62 = vld [vmem:[%s10260_s7 + $0xb] sm:$0x3] }
 0x3b8   :  { %7811 = vrcp.f32 %v5000_v14  ;;  %v5001_v33 = vadd.f32 1.0, %v7800_v20  ;;  %v5084_v27 = vrot.slane %v5079_v62, %v9364_v42  ;;  %v5088_v14 = vrot.slane %v5079_v62, %v9372_v35 }
 0x3b9   :  { %7813 = vrcp.f32 %v4999_v31 }
 0x3ba   :  { %7815 = vrcp.f32 %v5001_v33 }
 0x3bd   :  { %v7802_v40 = vpop.eup %7801 }
 0x3be   :  { %v7804_v15 = vpop.eup %7803  ;;  %v5018_v23 = vmul.f32 %v7802_v40, %v4962_v1  ;;  %v7656_v1 = vld [vmem:[#allocation5 + $0x120] ss:$8 sps:$4 sm:$0xff]  }
 0x3bf   :  { %v7806_v9 = vpop.eup %7805  ;;  %v5020_v34 = vmul.f32 %v7804_v15, %v4964_v16  ;;  %v7661_v16 = vld [vmem:[#allocation5 + $0x134] ss:$8 sps:$4 sm:$0xff]  }
 0x3c0   :  { %v7808_v43 = vpop.eup %7807  ;;  %v5019_v2 = vmul.f32 %v7806_v9, %v4963_v37  ;;  %v7665_v37 = vld [vmem:[#allocation5 + $0x150] ss:$8 sps:$4 sm:$0xff]  }
 0x3c1   :  { %v7810_v22 = vpop.eup %7809  ;;  %v5021_v4 = vmul.f32 %v7808_v43, %v4965_v38  ;;  %v7670_v38 = vld [vmem:[#allocation5 + $0x164] ss:$8 sps:$4 sm:$0xff]  }
 0x3c2   :  { %v7812_v55 = vpop.eup %7811  ;;  %v5022_v56 = vmul.f32 %v7810_v22, %v4966_v45  ;;  %v7185_v45 = vcombine.high %v5074_v21, %v5074_v21 }
 0x3c3   :  { %v7814_v13 = vpop.eup %7813  ;;  %v5024_v11 = vmul.f32 %v7812_v55, %v4968_v41  ;;  %v7184_v41 = vcombine.low %v5074_v21, %v5074_v21  ;;  %v7701_v21 = vld [vmem:[%s10259_s6 + $0xb8] sm:$0xff]  }
 0x3c4   :  { %v7816_v54 = vpop.eup %7815  ;;  %v5075_v32 = vpack.c.bf16 %v5022_v56, %v5018_v23  ;;  %v5023_v10 = vmul.f32 %v7814_v13, %v4967_v47  ;;  %v7676_v47 = vld [vmem:[%s10259_s6 + $0x40] sm:$0xff]  }
 0x3c5   :  { %v5077_v59 = vpack.c.bf16 %v5024_v11, %v5020_v34  ;;  %v5025_v61 = vmul.f32 %v7816_v54, %v4969_v29  ;;  %v5342_v12 = vsel %vm5340_vm3, %v7184_v41, 0  ;;  %v7677_v29 = vld [vmem:[%s10259_s6] sm:$0xff]   ;;  %7333 = vmatprep.subr.bf16.mxu0 %v7676_v47 }
 0x3c6   :  { %v5076_v39 = vpack.c.bf16 %v5023_v10, %v5019_v2  ;;  %7334 = vmatpush3.bf16.msra.mxu0 %v7677_v29 }
 0x3c7   :  { %v5078_v7 = vpack.c.bf16 %v5025_v61, %v5021_v4  ;;  %7335 = vmatprep.subr.bf16.mxu0 %v7678_v48 }
 0x3c8   :  { %5379 = vmatprep.mubr.bf16.mxu1 %v5076_v39 }
 0x3c9   :  { %5380 = vmatmul.mubr.bf16.vlgmr.msra.gmra.mrb[24].mxu1 %v5075_v32 }
 0x3ca   :  { %5391 = vmatpush1.bf16.msra.mxu1 %v7650_v28  ;;  %7187 = vmatprep.mubr.msk.bf16.mxu1 %vm5336_vm2, %v5078_v7 }
 0x3cb   :  { %5392 = vmatprep.subr.bf16.mxu1 %v7655_v52  ;;  %7336 = vmatpush3.bf16.msra.mxu0 %v7679_v19 }
 0x3cc   :  { %7337 = vmatprep.subr.bf16.mxu0 %v7680_v0 }
 0x3ce   :  { %5393 = vmatpush1.bf16.msra.mxu1 %v7653_v46 }
 0x3cf   :  { %5394 = vmatprep.subr.bf16.mxu1 %v7658_v63  ;;  %7338 = vmatpush3.bf16.msra.mxu0 %v7681_v49 }
 0x3d0   :  { %7339 = vmatprep.subr.bf16.mxu0 %v7682_v51  ;;  %v7220_v51 = vld [vmem:[%s10260_s7 + $0xf] ss:$0 sm:$0xff] }
 0x3d2   :  { %5395 = vmatpush1.bf16.msra.mxu1 %v7656_v1 }
 0x3d3   :  { %5396 = vmatprep.subr.bf16.mxu1 %v7661_v16  ;;  %7340 = vmatpush3.bf16.msra.mxu0 %v7683_v57  ;;  %v7692_v16 = vld [vmem:[%s10259_s6 + $0x180] sm:$0xff]  }
 0x3d4   :  { %7341 = vmatprep.subr.bf16.mxu0 %v7684_v58 }
 0x3d6   :  { %5397 = vmatpush1.bf16.msra.mxu1 %v7659_v5  ;;  %v7693_v5 = vld [vmem:[%s10255_s2] sm:$0xff]  }
 0x3d7   :  { %5398 = vmatprep.subr.bf16.mxu1 %v7664_v3  ;;  %7342 = vmatpush3.bf16.msra.mxu0 %v7685_v60  ;;  %v7694_v3 = vld [vmem:[%s10259_s6 + $0x80] sm:$0xff]  }
 0x3d8   :  { %7343 = vmatprep.subr.bf16.mxu0 %v7686_v25 }
 0x3da   :  { %5399 = vmatpush1.bf16.msra.mxu1 %v7662_v26  ;;  %v7695_v26 = vld [vmem:[%s10259_s6 + $0x88] sm:$0xff]  }
 0x3db   :  { %5400 = vmatprep.subr.bf16.mxu1 %v7667_v8  ;;  %7344 = vmatpush3.bf16.msra.mxu0 %v7687_v50  ;;  %v7696_v8 = vld [vmem:[%s10259_s6 + $0x90] sm:$0xff]  }
 0x3dc   :  { %7345 = vmatprep.subr.bf16.mxu0 %v7688_v44 }
 0x3de   :  { %5401 = vmatpush1.bf16.msra.mxu1 %v7665_v37  ;;  %v7697_v37 = vld [vmem:[%s10259_s6 + $0x98] sm:$0xff]  }
 0x3df   :  { %5402 = vmatprep.subr.bf16.mxu1 %v7670_v38  ;;  %7346 = vmatpush3.bf16.msra.mxu0 %v7689_v36  ;;  %v7698_v38 = vld [vmem:[%s10259_s6 + $0xa0] sm:$0xff]  }
 0x3e0   :  { %7347 = vmatprep.subr.bf16.mxu0 %v7690_v6 }
 0x3e2   :  { %5403 = vmatpush1.bf16.msra.mxu1 %v7668_v30  ;;  %v7699_v30 = vld [vmem:[%s10259_s6 + $0xa8] sm:$0xff]  }
 0x3e3   :  { %5404 = vmatprep.subr.bf16.mxu1 %v7673_v18  ;;  %7348 = vmatpush3.bf16.msra.mxu0 %v7691_v17  ;;  %v7700_v18 = vld [vmem:[%s10259_s6 + $0xb0] sm:$0xff]  }
 0x3e4   :  { %7427 = vmatprep.subr.bf16.mxu0 %v10383_v53 }
 0x3e6   :  { %5405 = vmatpush1.bf16.msra.mxu1 %v7671_v24 }
 0x3e7   :  { %7186 = vmatprep.subr.msk.bf16.mxu1 %vm5340_vm3, %v7185_v45  ;;  %v7192_v45 = vld [vmem:[%s10260_s7 + $0xd] ss:$0 sm:$0xff] }
 0x3ea   :  { %5407 = vmatpush1.bf16.msra.mxu1 %v5342_v12 }
 0x3eb   :  { %7407 = vmatprep.subr.bf16.mxu1 %v10383_v53 }
 0x3ed   :  { %5423 = vmatmul.mubr.bf16.vlgmr.msra.gmra.mrb[24].mxu1 %v5077_v59 }
 0x3ee   :  { %7423 = vmatprep.mubr.msk.bf16.mxu1 %vm7925_vm1, %v10383_v53  ;;  %7408 = vmatpush3.bf16.msra.mxu1 %v7694_v3 }
 0x3ef   :  { %7409 = vmatprep.subr.bf16.mxu1 %v10383_v53 }
 0x3f2   :  { %7410 = vmatpush3.bf16.msra.mxu1 %v7695_v26 }
 0x3f3   :  { %7411 = vmatprep.subr.bf16.mxu1 %v10383_v53 }
 0x3f6   :  { %7412 = vmatpush3.bf16.msra.mxu1 %v7696_v8 }
 0x3f7   :  { %7413 = vmatprep.subr.bf16.mxu1 %v10383_v53 }
 0x3fa   :  { %7414 = vmatpush3.bf16.msra.mxu1 %v7697_v37 }
 0x3fb   :  { %7415 = vmatprep.subr.bf16.mxu1 %v10383_v53 }
 0x3fe   :  { %7416 = vmatpush3.bf16.msra.mxu1 %v7698_v38 }
 0x3ff   :  { %7417 = vmatprep.subr.bf16.mxu1 %v10383_v53 }
 0x402   :  { %7418 = vmatpush3.bf16.msra.mxu1 %v7699_v30 }
 0x403   :  { %7419 = vmatprep.subr.bf16.mxu1 %v10383_v53 }
 0x406   :  { %7420 = vmatpush3.bf16.msra.mxu1 %v7700_v18 }
 0x407   :  { %7421 = vmatprep.subr.bf16.mxu1 %v10383_v53 }
 0x40a   :  { %7422 = vmatpush3.bf16.msra.mxu1 %v7701_v21 }
 0x40b   :  { %7433 = vmatprep.subr.bf16.mxu1 %v10383_v53 }
 0x4c0   :  { %v5424_v20 = vpop.f32.mrb[24].mxu1 }
 0x4c1   :  { %v7521_v31 = vadd.f32 %v5424_v20, %v5084_v27  ;;  %v5426_v33 = vpop.f32.mrb[25].mxu1 }
 0x4c2   :  { %v7522_v40 = vadd.f32 %v5426_v33, %v5088_v14  ;;  %v5428_v15 = vpop.f32.mrb[26].mxu1 }
 0x4c3   :  { %v7188_v9 = vmul.f32 -1.442695, %v7521_v31  ;;  %v7523_v43 = vadd.f32 %v5428_v15, %v5084_v27  ;;  %v5430_v22 = vpop.f32.mrb[27].mxu1 }
 0x4c4   :  { %v7189_v55 = vmul.f32 -1.442695, %v7522_v40  ;;  %v7524_v23 = vadd.f32 %v5430_v22, %v5088_v14 }
 0x4c5   :  { %7817 = vpow2.f32 %v7188_v9  ;;  %v7190_v56 = vmul.f32 -1.442695, %v7523_v43 }
 0x4c6   :  { %7819 = vpow2.f32 %v7189_v55  ;;  %v7191_v13 = vmul.f32 -1.442695, %v7524_v23 }
 0x4c7   :  { %7821 = vpow2.f32 %v7190_v56 }
 0x4c8   :  { %7823 = vpow2.f32 %v7191_v13 }
 0x4cf   :  { %v7818_v34 = vpop.eup %7817 }
 0x4d0   :  { %v7820_v42 = vpop.eup %7819  ;;  %v5445_v11 = vadd.f32 1.0, %v7818_v34 }
 0x4d1   :  { %v7822_v35 = vpop.eup %7821  ;;  %v5446_v54 = vadd.f32 1.0, %v7820_v42 }
 0x4d2   :  { %v7824_v2 = vpop.eup %7823  ;;  %7825 = vrcp.f32 %v5445_v11  ;;  %v5447_v32 = vadd.f32 1.0, %v7822_v35  ;;  %v7702_v11 = vld [vmem:[%s10259_s6 + $0x188] sm:$0xff]  }
 0x4d3   :  { %7827 = vrcp.f32 %v5446_v54  ;;  %v5448_v10 = vadd.f32 1.0, %v7824_v2  ;;  %v7703_v54 = vld [vmem:[%s10259_s6 + $0xc0] sm:$0xff]   ;;  %v7704_v2 = vld [vmem:[%s10259_s6 + $0xc8] sm:$0xff]  }
 0x4d4   :  { %7829 = vrcp.f32 %v5447_v32  ;;  %v7705_v32 = vld [vmem:[%s10259_s6 + $0xd0] sm:$0xff]  }
 0x4d5   :  { %7831 = vrcp.f32 %v5448_v10  ;;  %v7706_v10 = vld [vmem:[%s10259_s6 + $0xd8] sm:$0xff]  }
 0x4dc   :  { %v7826_v4 = vpop.eup %7825 }
 0x4dd   :  { %v7828_v59 = vpop.eup %7827  ;;  %v5457_v28 = vmul.f32 %v7826_v4, %v7521_v31  ;;  %v7707_v4 = vld [vmem:[%s10259_s6 + $0x190] sm:$0xff]  }
 0x4de   :  { %v7830_v61 = vpop.eup %7829  ;;  %v5458_v52 = vmul.f32 %v7828_v59, %v7522_v40  ;;  %v7708_v59 = vld [vmem:[%s10259_s6 + $0x198] sm:$0xff]  }
 0x4df   :  { %v7832_v39 = vpop.eup %7831  ;;  %v5459_v7 = vmul.f32 %v7830_v61, %v7523_v43  ;;  %v7211_v61 = vld [vmem:[%s10260_s7 + $0xe] ss:$0 sm:$0xff] }
 0x4e0   :  { %v5460_v46 = vmul.f32 %v7832_v39, %v7524_v23 }
 0x4e1   :  { %v5493_v63 = vpack.c.bf16 %v5459_v7, %v5457_v28 }
 0x4e2   :  { %v5494_v1 = vpack.c.bf16 %v5460_v46, %v5458_v52 }
 0x4e4   :  { %5630 = vmatprep.mubr.bf16.mxu0 %v5494_v1 }
 0x4e5   :  { %5631 = vmatmul.mubr.bf16.vlgmr.msra.gmra.mrb[16].mxu0 %v5493_v63 }
 0x4e6   :  { %7428 = vmatpush3.bf16.msra.mxu0 %v7692_v16  ;;  %7429 = vmatprep.mubr.msk.bf16.mxu0 %vm7925_vm1, %v10383_v53  ;;  %v7224_v16 = vld [vmem:[%s10260_s7 + $0x10] ss:$0 sm:$0xff] }
 0x4e7   :  { %7439 = vmatprep.subr.bf16.mxu0 %v10383_v53 }
 0x4ed   :  { %7430 = vmatmul.mubr.msk.bf16.vlgmr.msra.gmra.mrb[20].mxu0 %vm2455_vm0, %v7693_v5 }
 0x4ee   :  { %7443 = vmatprep.mubr.msk.bf16.mxu0 %vm7925_vm1, %v10383_v53  ;;  %7440 = vmatpush3.bf16.msra.mxu0 %v7707_v4 }
 0x4ef   :  { %7441 = vmatprep.subr.bf16.mxu0 %v10383_v53 }
 0x4f2   :  { %7442 = vmatpush3.bf16.msra.mxu0 %v7708_v59 }
 0x4f3   :  { %7459 = vmatprep.subr.bf16.mxu0 %v10383_v53 }
 0x5b8   :  { %v7349_v24 = vpop.f32.mrb[16].mxu0 }
 0x5b9   :  { %v7350_v41 = vpop.f32.mrb[17].mxu0 }
 0x5ba   :  { %v7351_v12 = vadd.f32 %v7350_v41, %v7349_v24  ;;  %v7352_v47 = vpop.f32.mrb[18].mxu0 }
 0x5bb   :  { %v7353_v29 = vpop.f32.mrb[19].mxu0 }
 0x5bc   :  { %v5633_v48 = vadd.f32 %v7351_v12, %v7192_v45  ;;  %v7354_v19 = vadd.f32 %v7353_v29, %v7352_v47 }
 0x5be   :  { %v7209_v0 = vmul.f32 -1.442695, %v5633_v48  ;;  %v5636_v49 = vadd.f32 %v7354_v19, %v7192_v45  ;;  %v7709_v19 = vld [vmem:[%s10259_s6 + $0xe0] sm:$0xff]  }
 0x5c0   :  { %7833 = vpow2.f32 %v7209_v0  ;;  %v7210_v57 = vmul.f32 -1.442695, %v5636_v49  ;;  %v5825_v58 = vpop.f32.mrb[20].mxu0 }
 0x5c1   :  { %v5826_v60 = vadd.f32 %v7220_v51, %v5825_v58  ;;  %v7431_v25 = vpop.f32.mrb[21].mxu0  ;;  %v7713_v58 = vld [vmem:[%s10259_s6 + $0x100] sm:$0xff]  }
 0x5c2   :  { %7835 = vpow2.f32 %v7210_v57  ;;  %v5828_v50 = vpop.f32.mrb[22].mxu0  ;;  %v7712_v57 = vld [vmem:[%s10259_s6 + $0xf8] sm:$0xff]   ;;  %v7715_v25 = vld [vmem:[%s10259_s6 + $0x110] sm:$0xff]  }
 0x5c3   :  { %v5835_v44 = vmul.f32 0.70710677, %v5826_v60  ;;  %v5829_v36 = vadd.f32 %v7220_v51, %v5828_v50  ;;  %v7432_v6 = vpop.f32.mrb[23].mxu0  ;;  %v5832_v31 = vmul.f32 0.5, %v5826_v60  ;;  %v7711_v51 = vld [vmem:[%s10259_s6 + $0xf0] sm:$0xff]   ;;  %v7714_v60 = vld [vmem:[%s10259_s6 + $0x108] sm:$0xff]  }
 0x5c4   :  { %v7716_v50 = vld [vmem:[%s10259_s6 + $0x120] sm:$0xff]   ;;  %v7719_v6 = vld [vmem:[%s10259_s6 + $0x130] sm:$0xff]  }
 0x5c5   :  { %7837 = verf.f32 %v5835_v44  ;;  %v5836_v17 = vmul.f32 0.70710677, %v5829_v36  ;;  %v5833_v15 = vmul.f32 0.5, %v5829_v36  ;;  %v7717_v44 = vld [vmem:[%s10259_s6 + $0x118] sm:$0xff]   ;;  %v7718_v36 = vld [vmem:[%s10259_s6 + $0x128] sm:$0xff]  }
 0x5c7   :  { %7839 = verf.f32 %v5836_v17  ;;  %v7720_v17 = vld [vmem:[%s10259_s6 + $0x138] sm:$0xff]  }
 0x5ca   :  { %v7834_v62 = vpop.eup %7833 }
 0x5cb   :  { %v5645_v27 = vadd.f32 1.0, %v7834_v62  ;;  %v7231_v62 = vld [vmem:[%s10260_s7 + $0x12] ss:$0 sm:$0xff] }
 0x5cc   :  { %v7836_v14 = vpop.eup %7835 }
 0x5cd   :  { %7841 = vrcp.f32 %v5645_v27  ;;  %v5646_v20 = vadd.f32 1.0, %v7836_v14 }
 0x5cf   :  { %v7838_v33 = vpop.eup %7837  ;;  %7843 = vrcp.f32 %v5646_v20 }
 0x5d0   :  { %v5839_v40 = vadd.f32 1.0, %v7838_v33 }
 0x5d1   :  { %v7840_v9 = vpop.eup %7839 }
 0x5d2   :  { %v5841_v43 = vmul.f32 %v5839_v40, %v5832_v31  ;;  %v5840_v22 = vadd.f32 1.0, %v7840_v9 }
 0x5d4   :  { %v5842_v55 = vmul.f32 %v5840_v22, %v5833_v15 }
 0x5d6   :  { %v5845_v23 = vpack.c.bf16 %v5842_v55, %v5841_v43 }
 0x5d7   :  { %v7842_v56 = vpop.eup %7841 }
 0x5d8   :  { %v5651_v34 = vmul.f32 %v7842_v56, %v5633_v48 }
 0x5d9   :  { %v7844_v13 = vpop.eup %7843 }
 0x5da   :  { %v5652_v42 = vmul.f32 %v7844_v13, %v5636_v49  ;;  %v7710_v49 = vld [vmem:[%s10259_s6 + $0xe8] sm:$0xff]  }
 0x5dc   :  { %v5669_v35 = vpack.c.bf16 %v5652_v42, %v5651_v34 }
 0x5de   :  { %7424 = vmatmul.mubr.bf16.vlgmr.msra.gmra.mrb[28].mxu1 %v5669_v35  ;;  %v7227_v35 = vld [vmem:[%s10260_s7 + $0x11] ss:$0 sm:$0xff] }
 0x5df   :  { %7434 = vmatpush3.bf16.msra.mxu1 %v7702_v11  ;;  %7435 = vmatprep.mubr.msk.bf16.mxu1 %vm7925_vm1, %v10383_v53 }
 0x5e0   :  { %7447 = vmatprep.subr.bf16.mxu1 %v10383_v53 }
 0x5e6   :  { %7436 = vmatmul.mubr.msk.bf16.vlgmr.msra.gmra.mrb[32].mxu1 %vm2455_vm0, %v5845_v23 }
 0x5e7   :  { %7448 = vmatpush3.bf16.msra.mxu1 %v7703_v54  ;;  %7455 = vmatprep.mubr.msk.bf16.mxu1 %vm7925_vm1, %v10383_v53 }
 0x5e8   :  { %7449 = vmatprep.subr.bf16.mxu1 %v10383_v53 }
 0x5eb   :  { %7450 = vmatpush3.bf16.msra.mxu1 %v7704_v2 }
 0x5ec   :  { %7451 = vmatprep.subr.bf16.mxu1 %v10383_v53 }
 0x5ef   :  { %7452 = vmatpush3.bf16.msra.mxu1 %v7705_v32 }
 0x5f0   :  { %7453 = vmatprep.subr.bf16.mxu1 %v10383_v53 }
 0x5f3   :  { %7454 = vmatpush3.bf16.msra.mxu1 %v7706_v10 }
 0x5f4   :  { %7479 = vmatprep.subr.bf16.mxu1 %v10383_v53 }
 0x6b1   :  { %v5759_v39 = vpop.f32.mrb[28].mxu1 }
 0x6b2   :  { %v7425_v28 = vpop.f32.mrb[29].mxu1  ;;  %v5760_v52 = vadd.f32 %v7211_v61, %v5759_v39  ;;  %v7721_v39 = vld [vmem:[%s10259_s6 + $0x140] sm:$0xff]  }
 0x6b3   :  { %v5762_v7 = vpop.f32.mrb[30].mxu1  ;;  %v7722_v28 = vld [vmem:[%s10259_s6 + $0x148] sm:$0xff]  }
 0x6b4   :  { %v5763_v46 = vadd.f32 %v7211_v61, %v5762_v7  ;;  %v7426_v63 = vpop.f32.mrb[31].mxu1  ;;  %v7723_v7 = vld [vmem:[%s10259_s6 + $0x150] sm:$0xff]  }
 0x6b5   :  { %v7726_v63 = vld [vmem:[%s10259_s6 + $0x168] sm:$0xff]  }
 0x6b6   :  { %v6010_v1 = vpack.c.bf16 %v5763_v46, %v5760_v52  ;;  %v7724_v52 = vld [vmem:[%s10259_s6 + $0x158] sm:$0xff]   ;;  %v7725_v46 = vld [vmem:[%s10259_s6 + $0x160] sm:$0xff]  }
 0x6b8   :  { %7456 = vmatmul.mubr.msk.bf16.vlgmr.msra.gmra.mrb[36].mxu1 %vm6041_vm4, %v6010_v1  ;;  %v7727_v1 = vld [vmem:[%s10259_s6 + $0x170] sm:$0xff]  }
 0x6b9   :  { %v5896_v5 = vpop.f32.mrb[32].mxu1  ;;  %7487 = vmatprep.mubr.msk.bf16.mxu1 %vm7925_vm1, %v10383_v53  ;;  %7480 = vmatpush3.bf16.msra.mxu1 %v7716_v50 }
 0x6ba   :  { %v5897_v3 = vadd.f32 %v7224_v16, %v5896_v5  ;;  %v7437_v26 = vpop.f32.mrb[33].mxu1  ;;  %7481 = vmatprep.subr.bf16.mxu1 %v10383_v53  ;;  %v7237_v5 = vld [vmem:[%s10260_s7 + $0x13] ss:$0 sm:$0xff] }
 0x6bb   :  { %v5899_v8 = vpop.f32.mrb[34].mxu1 }
 0x6bc   :  { %v5905_v37 = vmul.f32 0.70710677, %v5897_v3  ;;  %v5900_v38 = vadd.f32 %v7224_v16, %v5899_v8  ;;  %v7438_v30 = vpop.f32.mrb[35].mxu1  ;;  %v5903_v41 = vmul.f32 0.5, %v5897_v3  ;;  %v7728_v16 = vld [vmem:[%s10259_s6 + $0x178] sm:$0xff]  }
 0x6bd   :  { %7482 = vmatpush3.bf16.msra.mxu1 %v7718_v36  ;;  %v7254_v36 = vld [vmem:[%s10260_s7 + $0x17] ss:$0 sm:$0xff] }
 0x6be   :  { %7845 = verf.f32 %v5905_v37  ;;  %v5906_v18 = vmul.f32 0.70710677, %v5900_v38  ;;  %v5904_v12 = vmul.f32 0.5, %v5900_v38  ;;  %7483 = vmatprep.subr.bf16.mxu1 %v10383_v53 }
 0x6c0   :  { %7847 = verf.f32 %v5906_v18 }
 0x6c1   :  { %7484 = vmatpush3.bf16.msra.mxu1 %v7719_v6 }
 0x6c2   :  { %7485 = vmatprep.subr.bf16.mxu1 %v10383_v53 }
 0x6c5   :  { %7486 = vmatpush3.bf16.msra.mxu1 %v7720_v17 }
 0x6c6   :  { %7491 = vmatprep.subr.bf16.mxu1 %v10383_v53 }
 0x6c8   :  { %v7846_v21 = vpop.eup %7845 }
 0x6c9   :  { %v5909_v24 = vadd.f32 1.0, %v7846_v21 }
 0x6ca   :  { %v7848_v45 = vpop.eup %7847 }
 0x6cb   :  { %v5910_v47 = vadd.f32 1.0, %v7848_v45  ;;  %v5911_v29 = vmul.f32 %v5909_v24, %v5903_v41 }
 0x6cd   :  { %v5912_v48 = vmul.f32 %v5910_v47, %v5904_v12 }
 0x6cf   :  { %v5917_v0 = vpack.c.bf16 %v5912_v48, %v5911_v29 }
 0x6d1   :  { %7444 = vmatmul.mubr.msk.bf16.vlgmr.msra.gmra.mrb[24].mxu0 %vm5937_vm5, %v5917_v0 }
 0x6d2   :  { %7460 = vmatpush3.bf16.msra.mxu0 %v7709_v19  ;;  %7475 = vmatprep.mubr.msk.bf16.mxu0 %vm7925_vm1, %v10383_v53 }
 0x6d3   :  { %7461 = vmatprep.subr.bf16.mxu0 %v10383_v53 }
 0x6d6   :  { %7462 = vmatpush3.bf16.msra.mxu0 %v7710_v49 }
 0x6d7   :  { %7463 = vmatprep.subr.bf16.mxu0 %v10383_v53 }
 0x6da   :  { %7464 = vmatpush3.bf16.msra.mxu0 %v7711_v51 }
 0x6db   :  { %7465 = vmatprep.subr.bf16.mxu0 %v10383_v53 }
 0x6de   :  { %7466 = vmatpush3.bf16.msra.mxu0 %v7712_v57 }
 0x6df   :  { %7467 = vmatprep.subr.bf16.mxu0 %v10383_v53 }
 0x6e2   :  { %7468 = vmatpush3.bf16.msra.mxu0 %v7713_v58 }
 0x6e3   :  { %7469 = vmatprep.subr.bf16.mxu0 %v10383_v53 }
 0x6e6   :  { %7470 = vmatpush3.bf16.msra.mxu0 %v7714_v60 }
 0x6e7   :  { %7471 = vmatprep.subr.bf16.mxu0 %v10383_v53 }
 0x6ea   :  { %7472 = vmatpush3.bf16.msra.mxu0 %v7715_v25 }
 0x6eb   :  { %7473 = vmatprep.subr.bf16.mxu0 %v10383_v53 }
 0x6ee   :  { %7474 = vmatpush3.bf16.msra.mxu0 %v7717_v44 }
 0x6ef   :  { %7511 = vmatprep.subr.bf16.mxu0 %v10383_v53 }
 0x78b   :  { %v6079_v27 = vpop.f32.mrb[36].mxu1 }
 0x78c   :  { %v6080_v14 = vadd.f32 %v7231_v62, %v6079_v27  ;;  %v7457_v20 = vpop.f32.mrb[37].mxu1 }
 0x78d   :  { %v6082_v31 = vpop.f32.mrb[38].mxu1 }
 0x78e   :  { %v6088_v33 = vmul.f32 0.70710677, %v6080_v14  ;;  %v6083_v40 = vadd.f32 %v7231_v62, %v6082_v31  ;;  %v7458_v15 = vpop.f32.mrb[39].mxu1  ;;  %v6086_v23 = vmul.f32 0.5, %v6080_v14 }
 0x790   :  { %7849 = verf.f32 %v6088_v33  ;;  %v6089_v9 = vmul.f32 0.70710677, %v6083_v40  ;;  %v6087_v56 = vmul.f32 0.5, %v6083_v40 }
 0x792   :  { %7851 = verf.f32 %v6089_v9 }
 0x79a   :  { %v7850_v43 = vpop.eup %7849 }
 0x79b   :  { %v6092_v22 = vadd.f32 1.0, %v7850_v43 }
 0x79c   :  { %v7852_v55 = vpop.eup %7851 }
 0x79d   :  { %v6093_v13 = vadd.f32 1.0, %v7852_v55  ;;  %v6094_v34 = vmul.f32 %v6092_v22, %v6086_v23 }
 0x79f   :  { %v6095_v42 = vmul.f32 %v6093_v13, %v6087_v56 }
 0x7a1   :  { %v6096_v11 = vpack.c.bf16 %v6095_v42, %v6094_v34 }
 0x7a3   :  { %7476 = vmatmul.mubr.bf16.vlgmr.msra.gmra.mrb[28].mxu0 %v6096_v11 }
 0x7a4   :  { %v5975_v54 = vpop.f32.mrb[24].mxu0  ;;  %7513 = vmatprep.mubr.msk.bf16.mxu0 %vm7925_vm1, %v10383_v53 }
 0x7a5   :  { %v7445_v2 = vpop.f32.mrb[25].mxu0  ;;  %v5976_v10 = vadd.f32 %v7227_v35, %v5975_v54 }
 0x7a6   :  { %v5978_v32 = vpop.f32.mrb[26].mxu0 }
 0x7a7   :  { %v5979_v4 = vadd.f32 %v7227_v35, %v5978_v32  ;;  %v7446_v59 = vpop.f32.mrb[27].mxu0 }
 0x7a9   :  { %v6261_v61 = vpack.c.bf16 %v5979_v4, %v5976_v10 }
 0x7ab   :  { %7488 = vmatmul.mubr.msk.bf16.vlgmr.msra.gmra.mrb[40].mxu1 %vm6041_vm4, %v6261_v61 }
 0x7ac   :  { %7507 = vmatprep.mubr.msk.bf16.mxu1 %vm7925_vm1, %v10383_v53  ;;  %7492 = vmatpush3.bf16.msra.mxu1 %v7721_v39 }
 0x7ad   :  { %7493 = vmatprep.subr.bf16.mxu1 %v10383_v53 }
 0x7b0   :  { %7494 = vmatpush3.bf16.msra.mxu1 %v7722_v28 }
 0x7b1   :  { %7495 = vmatprep.subr.bf16.mxu1 %v10383_v53 }
 0x7b4   :  { %7496 = vmatpush3.bf16.msra.mxu1 %v7723_v7 }
 0x7b5   :  { %7497 = vmatprep.subr.bf16.mxu1 %v10383_v53 }
 0x7b8   :  { %7498 = vmatpush3.bf16.msra.mxu1 %v7724_v52 }
 0x7b9   :  { %7499 = vmatprep.subr.bf16.mxu1 %v10383_v53 }
 0x7bc   :  { %7500 = vmatpush3.bf16.msra.mxu1 %v7725_v46 }
 0x7bd   :  { %7501 = vmatprep.subr.bf16.mxu1 %v10383_v53 }
 0x7c0   :  { %7502 = vmatpush3.bf16.msra.mxu1 %v7726_v63 }
 0x7c1   :  { %7503 = vmatprep.subr.bf16.mxu1 %v10383_v53 }
 0x7c4   :  { %7504 = vmatpush3.bf16.msra.mxu1 %v7727_v1 }
 0x7c5   :  { %7505 = vmatprep.subr.bf16.mxu1 %v10383_v53  ;;  %v7248_v53 = vld [vmem:[%s10260_s7 + $0x16] ss:$0 sm:$0xff] }
 0x7c8   :  { %7506 = vmatpush3.bf16.msra.mxu1 %v7728_v16 }
 0x876   :  { %v6185_v3 = vpop.f32.mrb[28].mxu0 }
 0x877   :  { %v6186_v26 = vadd.f32 %v7237_v5, %v6185_v3  ;;  %v7477_v8 = vpop.f32.mrb[29].mxu0  ;;  %v7263_v3 = vld [vmem:[%s10260_s7 + $0x18] ss:$0 sm:$0xff] }
 0x878   :  { %v6188_v37 = vpop.f32.mrb[30].mxu0  ;;  %v7264_v8 = vld [vmem:[%s10260_s7 + $0x19] ss:$0 sm:$0xff] }
 0x879   :  { %v6189_v38 = vadd.f32 %v7237_v5, %v6188_v37  ;;  %v7478_v30 = vpop.f32.mrb[31].mxu0  ;;  %v6192_v18 = vadd.f32 %v6186_v26, %v6080_v14 }
 0x87b   :  { %6194 = vadd.xlane.f32.xlu1 %v6192_v18  ;;  %v6193_v21 = vadd.f32 %v6189_v38, %v6083_v40 }
 0x87e   :  { %v6329_v24 = vpop.f32.mrb[40].mxu1 }
 0x87f   :  { %v6330_v45 = vadd.f32 %v7248_v53, %v6329_v24  ;;  %6196 = vadd.xlane.f32.xlu1 %v6193_v21  ;;  %v7489_v41 = vpop.f32.mrb[41].mxu1 }
 0x880   :  { %v6332_v12 = vpop.f32.mrb[42].mxu1 }
 0x881   :  { %v6338_v47 = vmul.f32 0.70710677, %v6330_v45  ;;  %v6333_v29 = vadd.f32 %v7248_v53, %v6332_v12  ;;  %v7490_v48 = vpop.f32.mrb[43].mxu1  ;;  %v6336_v57 = vmul.f32 0.5, %v6330_v45  ;;  %v7247_v12 = vld [vmem:[%s10260_s7 + $0x15] ss:$0 sm:$0xff] }
 0x883   :  { %7853 = verf.f32 %v6338_v47  ;;  %v6339_v19 = vmul.f32 0.70710677, %v6333_v29  ;;  %v6337_v58 = vmul.f32 0.5, %v6333_v29 }
 0x885   :  { %7855 = verf.f32 %v6339_v19 }
 0x88d   :  { %v7854_v0 = vpop.eup %7853 }
 0x88e   :  { %v6342_v49 = vadd.f32 1.0, %v7854_v0 }
 0x88f   :  { %v7856_v51 = vpop.eup %7855 }
 0x890   :  { %v6343_v60 = vadd.f32 1.0, %v7856_v51  ;;  %v6344_v25 = vmul.f32 %v6342_v49, %v6336_v57 }
 0x892   :  { %v6345_v50 = vmul.f32 %v6343_v60, %v6337_v58 }
 0x894   :  { %v6346_v44 = vpack.c.bf16 %v6345_v50, %v6344_v25 }
 0x896   :  { %7508 = vmatmul.mubr.bf16.vlgmr.msra.gmra.mrb[44].mxu1 %v6346_v44 }
 0x908   :  { %v6195_v40 = vpop.xlane.xlu1 %6194 }
 0x909   :  { %v6199_v9 = vmul.f32 0.0078125, %v6195_v40 }
 0x90b   :  { %v6201_v56 = vsub.f32 %v6192_v18, %v6199_v9 }
 0x90c   :  { %v6197_v22 = vpop.xlane.xlu1 %6196 }
 0x90d   :  { %v6200_v13 = vmul.f32 0.0078125, %v6197_v22  ;;  %v6203_v54 = vmul.f32 %v6201_v56, %v6201_v56 }
 0x90f   :  { %v6202_v35 = vsub.f32 %v6193_v21, %v6200_v13  ;;  %v7246_v21 = vld [vmem:[%s10260_s7 + $0x14] ss:$0 sm:$0xff]  ;;  %s57_s7 = sld [smem:[#allocation2]] }
 0x911   :  { %v6204_v32 = vmul.f32 %v6202_v35, %v6202_v35 }
 0x969   :  { %v6435_v6 = vpop.f32.mrb[44].mxu1 }
 0x96a   :  { %v6436_v17 = vadd.f32 %v7254_v36, %v6435_v6  ;;  %v7509_v62 = vpop.f32.mrb[45].mxu1 }
 0x96b   :  { %v6438_v27 = vpop.f32.mrb[46].mxu1 }
 0x96c   :  { %v6439_v14 = vadd.f32 %v7254_v36, %v6438_v27  ;;  %v7510_v20 = vpop.f32.mrb[47].mxu1  ;;  %v6442_v31 = vadd.f32 %v6436_v17, %v6330_v45 }
 0x96e   :  { %6444 = vadd.xlane.f32.xlu0 %v6442_v31  ;;  %v6443_v33 = vadd.f32 %v6439_v14, %v6333_v29 }
 0x972   :  { %6446 = vadd.xlane.f32.xlu0 %v6443_v33 }
 0x9fb   :  { %v6445_v15 = vpop.xlane.xlu0 %6444 }
 0x9fc   :  { %v6448_v43 = vmul.f32 0.0078125, %v6445_v15 }
 0x9fe   :  { %v6450_v55 = vsub.f32 %v6442_v31, %v6448_v43  ;;  %v6498_v31 = vstv %s57_s7 }
 0x9ff   :  { %v6447_v23 = vpop.xlane.xlu0 %6446 }
 0xa00   :  { %v6449_v34 = vmul.f32 0.0078125, %v6447_v23  ;;  %v6452_v42 = vmul.f32 %v6450_v55, %v6450_v55 }
 0xa02   :  { %v6451_v11 = vsub.f32 %v6443_v33, %v6449_v34  ;;  %6454 = vadd.xlane.f32.xlu0 %v6452_v42 }
 0xa04   :  { %v6453_v2 = vmul.f32 %v6451_v11, %v6451_v11 }
 0xa06   :  { %6205 = vadd.xlane.f32.xlu0 %v6203_v54  ;;  %6456 = vadd.xlane.f32.xlu1 %v6453_v2 }
 0xa0a   :  { %6207 = vadd.xlane.f32.xlu1 %v6204_v32 }
 0xa8f   :  { %v6455_v10 = vpop.xlane.xlu0 %6454 }
 0xa90   :  { %v6458_v4 = vmul.f32 0.0078125, %v6455_v10 }
 0xa92   :  { %v6460_v59 = vadd.f32 1e-05, %v6458_v4 }
 0xa93   :  { %v6457_v61 = vpop.xlane.xlu1 %6456  ;;  %v6206_v39 = vpop.xlane.xlu0 %6205 }
 0xa94   :  { %7857 = vrsqrt.f32 %v6460_v59  ;;  %v6459_v28 = vmul.f32 0.0078125, %v6457_v61  ;;  %v6209_v7 = vmul.f32 0.0078125, %v6206_v39 }
 0xa96   :  { %v6461_v52 = vadd.f32 1e-05, %v6459_v28  ;;  %v6211_v46 = vadd.f32 1e-05, %v6209_v7 }
 0xa97   :  { %v6208_v63 = vpop.xlane.xlu1 %6207 }
 0xa98   :  { %7859 = vrsqrt.f32 %v6461_v52  ;;  %v6210_v1 = vmul.f32 0.0078125, %v6208_v63 }
 0xa99   :  { %7861 = vrsqrt.f32 %v6211_v46 }
 0xa9a   :  { %v6212_v16 = vadd.f32 1e-05, %v6210_v1 }
 0xa9c   :  { %7863 = vrsqrt.f32 %v6212_v16 }
 0xa9e   :  { %v7858_v5 = vpop.eup %7857 }
 0xa9f   :  { %v6464_v26 = vmul.f32 %v7858_v5, %v6450_v55 }
 0xaa1   :  { %v6472_v37 = vmul.f32 %v7263_v3, %v6464_v26 }
 0xaa2   :  { %v7860_v38 = vpop.eup %7859 }
 0xaa3   :  { %v7862_v30 = vpop.eup %7861  ;;  %v6480_v18 = vadd.f32 %v7264_v8, %v6472_v37  ;;  %v6465_v53 = vmul.f32 %v7860_v38, %v6451_v11 }
 0xaa4   :  { %v6215_v24 = vmul.f32 %v7862_v30, %v6201_v56 }
 0xaa5   :  { %v6488_v45 = vmul.f32 %v6480_v18, %v6480_v18  ;;  %v6473_v41 = vmul.f32 %v7263_v3, %v6465_v53 }
 0xaa6   :  { %v7864_v47 = vpop.eup %7863  ;;  %v6223_v29 = vmul.f32 %v7246_v21, %v6215_v24 }
 0xaa7   :  { %6490 = vadd.xlane.f32.xlu0 %v6488_v45  ;;  %v6481_v48 = vadd.f32 %v7264_v8, %v6473_v41  ;;  %v6216_v19 = vmul.f32 %v7864_v47, %v6202_v35 }
 0xaa8   :  { %v6231_v0 = vadd.f32 %v7247_v12, %v6223_v29 }
 0xaa9   :  { %v6489_v49 = vmul.f32 %v6481_v48, %v6481_v48  ;;  %v6224_v51 = vmul.f32 %v7246_v21, %v6216_v19 }
 0xaaa   :  { %v6482_v57 = vmul.f32 %v6231_v0, %v6231_v0 }
 0xaab   :  { %6492 = vadd.xlane.f32.xlu1 %v6489_v49  ;;  %v6232_v58 = vadd.f32 %v7247_v12, %v6224_v51 }
 0xaac   :  { %6484 = vadd.xlane.f32.xlu0 %v6482_v57 }
 0xaad   :  { %v6483_v60 = vmul.f32 %v6232_v58, %v6232_v58 }
 0xaaf   :  { %6486 = vadd.xlane.f32.xlu1 %v6483_v60 }
 0xb34   :  { %v6491_v25 = vpop.xlane.xlu0 %6490 }
 0xb35   :  { %v6504_v50 = vmax.f32 %v6491_v25, 1e-24 }
 0xb37   :  { %7865 = vrsqrt.f32 %v6504_v50 }
 0xb38   :  { %v6493_v44 = vpop.xlane.xlu1 %6492 }
 0xb39   :  { %v6505_v36 = vmax.f32 %v6493_v44, 1e-24  ;;  %v6485_v6 = vpop.xlane.xlu0 %6484 }
 0xb3a   :  { %v6494_v17 = vmax.f32 %v6485_v6, 1e-24 }
 0xb3b   :  { %7867 = vrsqrt.f32 %v6505_v36 }
 0xb3c   :  { %7869 = vrsqrt.f32 %v6494_v17  ;;  %v6487_v62 = vpop.xlane.xlu1 %6486 }
 0xb3d   :  { %v6495_v27 = vmax.f32 %v6487_v62, 1e-24 }
 0xb3f   :  { %7871 = vrsqrt.f32 %v6495_v27 }
 0xb41   :  { %v7866_v14 = vpop.eup %7865 }
 0xb42   :  { %v6508_v40 = vmul.f32 %v7866_v14, %v6480_v18 }
 0xb45   :  { %v7868_v20 = vpop.eup %7867 }
 0xb46   :  { %v7870_v33 = vpop.eup %7869  ;;  %v6509_v15 = vmul.f32 %v7868_v20, %v6481_v48 }
 0xb47   :  { %v6499_v9 = vmul.f32 %v7870_v33, %v6498_v31 }
 0xb48   :  { %v6510_v43 = vpack.c.bf16 %v6509_v15, %v6508_v40 }
 0xb49   :  { %v7872_v22 = vpop.eup %7871  ;;  %v6501_v23 = vmul.f32 %v6499_v9, %v6231_v0 }
 0xb4a   :  { %v6500_v55 = vmul.f32 %v7872_v22, %v6498_v31  ;;  %7512 = vmatpush3.bf16.xpose.msra.mxu0 %v6510_v43 }
 0xb4c   :  { %v6502_v56 = vmul.f32 %v6500_v55, %v6232_v58 }
 0xb4e   :  { %v6503_v13 = vpack.c.bf16 %v6502_v56, %v6501_v23 }
 0xb51   :  { %7514 = vmatmul.mubr.bf16.vlgmr.msra.gmra.mrb[32].mxu0 %v6503_v13 }
 0xc24   :  { %v6545_v34 = vpop.f32.mrb[32].mxu0 }
 0xc25   :  { %6552 = vst.msk [vmem:[%s10261_s8] sm:$0xff] %vm2455_vm0, %v6545_v34  ;;  %v7515_v42 = vpop.f32.mrb[33].mxu0 }
 0xc26   :  { %v6548_v11 = vpop.f32.mrb[34].mxu0 }
 0xc27   :  { %6553 = vst.msk [vmem:[%s10261_s8 + $0x8] sm:$0xff] %vm2455_vm0, %v6548_v11  ;;  %v7516_v35 = vpop.f32.mrb[35].mxu0 }
 0xc28   :  { %6558 = vsyncpa [#allocation3], 1 }
 0xc29   :  { %6559 = vsyncpa [#allocation4], 1 }

</bundles_post_ra>
